<compile_context>
chip_gen: v7x
topology: tpu7x:2x2x1
jax: 0.10.0
libtpu: 0.0.40
codegen_flags: <defaults>
</compile_context>

<pallas_src>
import numpy as np
import jax
import jax.numpy as jnp
from jax import lax
from jax.experimental import pallas as pl
from jax.experimental.pallas import tpu as pltpu

# ---------------- config (stand-in for cfg[cfg_key]) ----------------
FEAT_STRIDE = 16
SCALES = np.array([8, 16, 32], dtype=np.float64)
RATIOS = np.array([0.5, 1.0, 2.0], dtype=np.float64)
PRE_NMS_TOP_N = 256
POST_NMS_TOP_N = 32
NMS_THRESH = 0.7
# RPN_MIN_SIZE is read but never applied in the reference forward (dead code).


# ---------------- deterministic anchor generation (numpy, __init__ glue) ----------------
def _whctrs(anchor):
    w = anchor[2] - anchor[0] + 1
    h = anchor[3] - anchor[1] + 1
    x_ctr = anchor[0] + 0.5 * (w - 1)
    y_ctr = anchor[1] + 0.5 * (h - 1)
    return w, h, x_ctr, y_ctr


def _mkanchors(ws, hs, x_ctr, y_ctr):
    ws = ws[:, np.newaxis]
    hs = hs[:, np.newaxis]
    return np.hstack((x_ctr - 0.5 * (ws - 1), y_ctr - 0.5 * (hs - 1),
                      x_ctr + 0.5 * (ws - 1), y_ctr + 0.5 * (hs - 1)))


def _ratio_enum(anchor, ratios):
    w, h, x_ctr, y_ctr = _whctrs(anchor)
    size = w * h
    size_ratios = size / ratios
    ws = np.round(np.sqrt(size_ratios))
    hs = np.round(ws * ratios)
    return _mkanchors(ws, hs, x_ctr, y_ctr)


def _scale_enum(anchor, scales):
    w, h, x_ctr, y_ctr = _whctrs(anchor)
    ws = w * scales
    hs = h * scales
    return _mkanchors(ws, hs, x_ctr, y_ctr)


def generate_anchors(base_size=16, ratios=RATIOS, scales=SCALES):
    base_anchor = np.array([1, 1, base_size, base_size], dtype=np.float64) - 1
    ratio_anchors = _ratio_enum(base_anchor, ratios)
    return np.vstack([_scale_enum(ratio_anchors[i, :], scales)
                      for i in range(ratio_anchors.shape[0])])


# ---------------- Pallas kernel 1: batched decode (bbox_transform_inv) + clip ----------------
def _decode_clip_pallas(base_anchors, im_info, shift_planes, deltas4d, split):
    """deltas4d: (B, 4A, Hs, 128) f32, channel 4a+c = delta coord c of anchor a,
    spatial index p = s*128 + lane = h*W + w (p >= H*W is padding, never selected).
    shift_planes: (2, Hs, 128) f32 = (w*feat_stride, h*feat_stride).
    Returns proposals (B, 4, A, Hs, 128): clipped boxes, coordinate-major."""
    B, fourA, Hs, L = deltas4d.shape
    A = fourA // 4
    Hs_blk = Hs // split

    def kernel(base_ref, info_ref, shifts_ref, deltas_ref, out_ref):
        b = pl.program_id(0)
        sx = shifts_ref[0]                      # (Hs_blk, 128) = w * feat_stride
        sy = shifts_ref[1]                      # (Hs_blk, 128) = h * feat_stride
        # per-batch clip bounds as scalars from SMEM im_info = [H_im, W_im, scale]
        xmax = info_ref[b, 1] - 1.0
        ymax = info_ref[b, 0] - 1.0
        zero = jnp.float32(0.0)
        for a in range(A):                      # static unroll; A is small
            dx = deltas_ref[4 * a + 0]          # (Hs_blk, 128)
            dy = deltas_ref[4 * a + 1]
            dw = deltas_ref[4 * a + 2]
            dh = deltas_ref[4 * a + 3]
            # per-anchor scalar geometry from the SMEM base-anchor table
            bx1 = base_ref[a, 0]
            by1 = base_ref[a, 1]
            bx2 = base_ref[a, 2]
            by2 = base_ref[a, 3]
            aw = bx2 - bx1 + 1.0
            ah = by2 - by1 + 1.0
            acx = sx + (bx1 + 0.5 * aw)
            acy = sy + (by1 + 0.5 * ah)
            pcx = dx * aw + acx
            pcy = dy * ah + acy
            # TODO(synk): reference bbox_transform_inv leaves dw/dh unclamped before exp.
            pw = jnp.exp(dw) * aw
            ph = jnp.exp(dh) * ah
            out_ref[0, a] = jnp.minimum(jnp.maximum(pcx - 0.5 * pw, zero), xmax)
            out_ref[1, a] = jnp.minimum(jnp.maximum(pcy - 0.5 * ph, zero), ymax)
            out_ref[2, a] = jnp.minimum(jnp.maximum(pcx + 0.5 * pw, zero), xmax)
            out_ref[3, a] = jnp.minimum(jnp.maximum(pcy + 0.5 * ph, zero), ymax)

    return pl.pallas_call(
        kernel,
        out_shape=jax.ShapeDtypeStruct((B, 4, A, Hs, L), jnp.float32),
        grid=(B, split),
        in_specs=[
            pl.BlockSpec(memory_space=pltpu.MemorySpace.SMEM),   # base anchors (A, 4)
            pl.BlockSpec(memory_space=pltpu.MemorySpace.SMEM),   # im_info (B, 3)
            pl.BlockSpec((2, Hs_blk, L), lambda b, s: (0, s, 0)),        # shift planes
            pl.BlockSpec((None, fourA, Hs_blk, L), lambda b, s: (b, 0, s, 0)),
        ],
        out_specs=pl.BlockSpec((None, 4, A, Hs_blk, L),
                               lambda b, s: (b, 0, 0, s, 0)),
        compiler_params=pltpu.CompilerParams(
            dimension_semantics=("parallel", "parallel")),
    )(base_anchors, im_info, shift_planes, deltas4d)


# ---------------- Pallas kernel 2: fused greedy NMS (keep mask only) ----------------
def _nms_keep_pallas(boxes_cm, boxes_rm, nms_thresh):
    """boxes_cm: (B, 4, P) score-sorted clipped boxes, coordinate-major.
    boxes_rm: (B, P, 4) same boxes, row-major (cheap column broadcasts).
    Returns (B, P) float32 keep mask (1.0 = kept)."""
    B, _, P = boxes_cm.shape
    thresh = float(nms_thresh)
    unroll = 8 if P % 8 == 0 else 1

    def kernel(cm_ref, rm_ref, keep_ref, sup_ref):
        cm = cm_ref[...]                                        # (4, P)
        rm = rm_ref[...]                                        # (P, 4)
        x1r, y1r, x2r, y2r = (cm[c:c + 1, :] for c in range(4))  # (1, P)
        x1c, y1c, x2c, y2c = (rm[:, c:c + 1] for c in range(4))  # (P, 1)
        area_r = (x2r - x1r + 1.0) * (y2r - y1r + 1.0)
        area_c = (x2c - x1c + 1.0) * (y2c - y1c + 1.0)
        # dense (P, P) pairwise suppression matrix, computed once per batch
        xx1 = jnp.maximum(x1c, x1r)
        yy1 = jnp.maximum(y1c, y1r)
        xx2 = jnp.minimum(x2c, x2r)
        yy2 = jnp.minimum(y2c, y2r)
        iw = jnp.maximum(xx2 - xx1 + 1.0, 0.0)
        ih = jnp.maximum(yy2 - yy1 + 1.0, 0.0)
        inter = iw * ih
        union = area_c + area_r - inter
        row_i = lax.broadcasted_iota(jnp.int32, (P, P), 0)
        col_j = lax.broadcasted_iota(jnp.int32, (P, P), 1)
        # IoU > thresh  <=>  inter > thresh * union   (union >= 1, no divide)
        sup_ref[...] = jnp.where((inter > thresh * union) & (col_j > row_i),
                                 1.0, 0.0).astype(jnp.float32)

        col = lax.broadcasted_iota(jnp.int32, (1, P), 1)

        def body(step, keep):
            for u in range(unroll):             # manual unroll: hide keep[i] extract
                i = step * unroll + u
                keep_i = jnp.max(jnp.where(col == i, keep, 0.0))   # scalar 0/1
                row = sup_ref[pl.ds(i, 1), :]                       # (1, P)
                keep = keep * (1.0 - keep_i * row)
            return keep

        keep = lax.fori_loop(0, P // unroll, body, jnp.ones((1, P), jnp.float32))
        keep_ref[...] = keep

    keep = pl.pallas_call(
        kernel,
        out_shape=jax.ShapeDtypeStruct((B, 1, P), jnp.float32),
        grid=(B,),
        in_specs=[
            pl.BlockSpec((None, 4, P), lambda b: (b, 0, 0)),
            pl.BlockSpec((None, P, 4), lambda b: (b, 0, 0)),
        ],
        out_specs=pl.BlockSpec((None, 1, P), lambda b: (b, 0, 0)),
        scratch_shapes=[pltpu.VMEM((P, P), jnp.float32)],   # 256 KiB at P=256
        compiler_params=pltpu.CompilerParams(dimension_semantics=("parallel",)),
    )(boxes_cm, boxes_rm)
    return keep[:, 0, :]


# ---------------- full forward ----------------
def proposal_forward(rpn_cls_prob, rpn_bbox_pred, im_info, base_anchors):
    B, twoA, H, W = rpn_cls_prob.shape
    A = base_anchors.shape[0]
    HW = H * W
    HWp = ((HW + 1023) // 1024) * 1024        # pad spatial to 8*128 -> full vregs
    Hs = HWp // 128
    split = 2 if (Hs % 16 == 0) else 1        # >=2 parallel decode steps per batch (v7x)

    # deltas stay in native NCHW channel order; reshape (free) to lane-dense planes
    deltas = rpn_bbox_pred.reshape(B, 4 * A, HW)
    if HWp != HW:
        # TODO(synk): this pad is one extra HBM pass over the largest input; a
        # producer emitting the lane-padded layout directly would remove it.
        deltas = jnp.pad(deltas, ((0, 0), (0, 0), (0, HWp - HW)))
    deltas4d = deltas.reshape(B, 4 * A, Hs, 128)

    # constant spatial shift planes (w*stride, h*stride); tiny, VMEM-resident
    p_idx = jnp.arange(HWp, dtype=jnp.int32)
    shift_planes = jnp.stack(
        [(p_idx % W).astype(jnp.float32), (p_idx // W).astype(jnp.float32)],
        axis=0).reshape(2, Hs, 128) * jnp.float32(FEAT_STRIDE)

    proposals = _decode_clip_pallas(base_anchors, im_info, shift_planes,
                                    deltas4d, split)
    proposals_cm = proposals.reshape(B, 4, A * HWp)       # free contiguous reshape

    # fg scores, channel-major n = a*HW + h*W + w, *unpadded*; top_k indices are
    # remapped into the padded proposal layout: n_pad = n + (n // HW)*(HWp - HW)
    # (unpadded top_k can never pick a padded slot, so no score poisoning needed).
    scores = rpn_cls_prob[:, A:, :, :].reshape(B, A * HW)
    k = min(PRE_NMS_TOP_N, A * HW)
    # TODO(synk): top-k sort and the final keep-compaction are data-dependent
    #             gathers on tiny arrays; kept in plain JAX rather than Pallas.
    _, order = lax.top_k(scores, k)                                   # (B, k)
    order_pad = order + (order // HW) * (HWp - HW)
    props_sorted_cm = jnp.take_along_axis(
        proposals_cm, order_pad[:, None, :], axis=2)                  # (B, 4, k)
    props_sorted = jnp.transpose(props_sorted_cm, (0, 2, 1))          # (B, k, 4) tiny

    keep = _nms_keep_pallas(props_sorted_cm, props_sorted, NMS_THRESH) > 0.5

    post = POST_NMS_TOP_N

    def per_batch(keep_b, props_b):
        sel = jnp.argsort(jnp.logical_not(keep_b).astype(jnp.int32),
                          stable=True)[:post]
        num_keep = jnp.minimum(jnp.sum(keep_b.astype(jnp.int32)), post)
        valid = jnp.arange(post) < num_keep
        return jnp.where(valid[:, None], props_b[sel], 0.0)

    out_boxes = jax.vmap(per_batch)(keep, props_sorted)               # (B, post, 4)
    batch_col = jnp.broadcast_to(
        jnp.arange(B, dtype=jnp.float32)[:, None, None], (B, post, 1))
    output = jnp.concatenate([batch_col, out_boxes], axis=2)          # (B, post, 5)
    return output, proposals_cm


if __name__ == "__main__":
    key = jax.random.PRNGKey(0)
    B, H, W = 2, 16, 16
    base_anchors = jnp.asarray(generate_anchors(), dtype=jnp.float32)  # (A=9, 4)
    A = base_anchors.shape[0]
    HW = H * W
    HWp = ((HW + 1023) // 1024) * 1024

    k1, k2 = jax.random.split(key)
    rpn_cls_prob = jax.random.uniform(k1, (B, 2 * A, H, W), dtype=jnp.float32)
    rpn_bbox_pred = 0.2 * jax.random.normal(k2, (B, 4 * A, H, W), dtype=jnp.float32)
    im_info = jnp.array([[H * FEAT_STRIDE, W * FEAT_STRIDE, 1.0],
                         [H * FEAT_STRIDE - 32.0, W * FEAT_STRIDE - 16.0, 1.0]],
                        dtype=jnp.float32)

    output, proposals_cm = jax.jit(proposal_forward)(
        rpn_cls_prob, rpn_bbox_pred, im_info, base_anchors)
    output = jax.block_until_ready(output)
    output_np = np.asarray(output)
    proposals_np = np.asarray(proposals_cm)          # (B, 4, A*HWp)

    # ---- reference decode+clip (numpy, same n = a*HW + h*W + w ordering) ----
    base_np = np.asarray(base_anchors, dtype=np.float64)
    sx, sy = np.meshgrid(np.arange(W) * FEAT_STRIDE, np.arange(H) * FEAT_STRIDE)
    shifts = np.stack([sx.ravel(), sy.ravel(), sx.ravel(), sy.ravel()], 1)   # (HW,4)
    anchors_full = base_np[:, None, :] + shifts[None, :, :]                  # (A,HW,4)
    deltas_np = np.asarray(rpn_bbox_pred).reshape(B, A, 4, HW).transpose(0, 1, 3, 2)
    im_info_np = np.asarray(im_info, dtype=np.float64)

    aw = anchors_full[..., 2] - anchors_full[..., 0] + 1.0
    ah = anchors_full[..., 3] - anchors_full[..., 1] + 1.0
    acx = anchors_full[..., 0] + 0.5 * aw
    acy = anchors_full[..., 1] + 0.5 * ah
    dx, dy, dw, dh = (deltas_np[..., c] for c in range(4))
    pcx = dx * aw + acx
    pcy = dy * ah + acy
    pw = np.exp(dw) * aw
    ph = np.exp(dh) * ah
    ref_boxes = np.stack([pcx - 0.5 * pw, pcy - 0.5 * ph,
                          pcx + 0.5 * pw, pcy + 0.5 * ph], axis=-1)   # (B,A,HW,4)
    xmax = (im_info_np[:, 1] - 1.0)[:, None, None]
    ymax = (im_info_np[:, 0] - 1.0)[:, None, None]
    ref_boxes[..., 0] = np.clip(ref_boxes[..., 0], 0.0, xmax)
    ref_boxes[..., 1] = np.clip(ref_boxes[..., 1], 0.0, ymax)
    ref_boxes[..., 2] = np.clip(ref_boxes[..., 2], 0.0, xmax)
    ref_boxes[..., 3] = np.clip(ref_boxes[..., 3], 0.0, ymax)

    kernel_boxes = proposals_np.reshape(B, 4, A, HWp)[:, :, :, :HW]
    kernel_boxes = kernel_boxes.transpose(0, 2, 3, 1)                 # (B,A,HW,4)
    assert kernel_boxes.shape == ref_boxes.shape
    assert np.allclose(kernel_boxes, ref_boxes, rtol=1e-4, atol=1e-2)

    # ---- reference top-k + greedy NMS + compaction (numpy) on the kernel boxes ----
    scores_np = np.asarray(rpn_cls_prob)[:, A:, :, :].reshape(B, A * HW)
    proposals_valid = proposals_np.reshape(B, 4, A, HWp)[:, :, :, :HW].reshape(
        B, 4, A * HW)
    k = min(PRE_NMS_TOP_N, A * HW)
    post = POST_NMS_TOP_N
    ref_output = np.zeros((B, post, 5), dtype=np.float32)
    for b in range(B):
        order = np.argsort(-scores_np[b], kind="stable")[:k]
        boxes_b = proposals_valid[b].T[order].astype(np.float64)      # (k, 4)
        x1, y1, x2, y2 = boxes_b[:, 0], boxes_b[:, 1], boxes_b[:, 2], boxes_b[:, 3]
        areas = (x2 - x1 + 1.0) * (y2 - y1 + 1.0)
        idx = np.arange(k)
        keep_ref = np.ones(k, dtype=bool)
        for i in range(k):
            if not keep_ref[i]:
                continue
            xx1 = np.maximum(x1[i], x1)
            yy1 = np.maximum(y1[i], y1)
            xx2 = np.minimum(x2[i], x2)
            yy2 = np.minimum(y2[i], y2)
            iw = np.maximum(xx2 - xx1 + 1.0, 0.0)
            ih = np.maximum(yy2 - yy1 + 1.0, 0.0)
            inter = iw * ih
            ovr = inter / (areas[i] + areas - inter)
            keep_ref &= ~((ovr > NMS_THRESH) & (idx > i))
        sel = np.argsort(~keep_ref, kind="stable")[:post]
        num = min(int(keep_ref.sum()), post)
        kept_boxes = boxes_b[sel].astype(np.float32)
        kept_boxes[num:] = 0.0
        ref_output[b, :, 0] = b
        ref_output[b, :, 1:] = kept_boxes

    assert output_np.shape == (B, post, 5)
    assert np.all(np.isfinite(output_np))
    assert np.allclose(output_np, ref_output, rtol=1e-4, atol=1e-2)
    print("KERNEL_OK")
</pallas_src>

<mosaic_0001>
module attributes {stable_mosaic.version = 11 : i64} {
  func.func @kernel(%arg0: i32, %arg1: i32, %arg2: memref<9x4xf32, #tpu.memory_space<smem>>, %arg3: memref<2x3xf32, #tpu.memory_space<smem>>, %arg4: memref<2x8x128xf32, #tpu.memory_space<vmem>>, %arg5: memref<1x36x8x128xf32, #tpu.memory_space<vmem>>, %arg6: memref<1x4x9x8x128xf32, #tpu.memory_space<vmem>>) attributes {dimension_semantics = [#tpu.dimension_semantics<parallel>, #tpu.dimension_semantics<parallel>], iteration_bounds = array<i64: 2, 1>, scalar_prefetch = 0 : i64, scratch_operands = 0 : i64, tpu.core_type = #tpu.core_type<tc>, window_params = [{transform_indices = @transform_0, window_bounds = array<i64: 9, 4>}, {transform_indices = @transform_1, window_bounds = array<i64: 2, 3>}, {transform_indices = @transform_2, window_bounds = array<i64: 2, 8, 128>}, {transform_indices = @transform_3, window_bounds = array<i64: 1, 36, 8, 128>}, {transform_indices = @transform_4, window_bounds = array<i64: 1, 4, 9, 8, 128>}]} {
    %c0 = arith.constant 0 : index
    %c0_0 = arith.constant 0 : index
    %c0_1 = arith.constant 0 : index
    %0 = vector.load %arg4[%c0, %c0_0, %c0_1] : memref<2x8x128xf32, #tpu.memory_space<vmem>>, vector<1x8x128xf32>
    %1 = vector.shape_cast %0 : vector<1x8x128xf32> to vector<8x128xf32>
    %c1 = arith.constant 1 : index
    %c0_2 = arith.constant 0 : index
    %c0_3 = arith.constant 0 : index
    %2 = vector.load %arg4[%c1, %c0_2, %c0_3] : memref<2x8x128xf32, #tpu.memory_space<vmem>>, vector<1x8x128xf32>
    %3 = vector.shape_cast %2 : vector<1x8x128xf32> to vector<8x128xf32>
    %4 = arith.index_cast %arg0 : i32 to index
    %c1_4 = arith.constant 1 : index
    %5 = memref.load %arg3[%4, %c1_4] : memref<2x3xf32, #tpu.memory_space<smem>>
    %cst = arith.constant 1.000000e+00 : f32
    %6 = arith.subf %5, %cst : f32
    %7 = arith.index_cast %arg0 : i32 to index
    %c0_5 = arith.constant 0 : index
    %8 = memref.load %arg3[%7, %c0_5] : memref<2x3xf32, #tpu.memory_space<smem>>
    %cst_6 = arith.constant 1.000000e+00 : f32
    %9 = arith.subf %8, %cst_6 : f32
    %c0_7 = arith.constant 0 : index
    %c0_8 = arith.constant 0 : index
    %c0_9 = arith.constant 0 : index
    %c0_10 = arith.constant 0 : index
    %10 = vector.load %arg5[%c0_7, %c0_8, %c0_9, %c0_10] : memref<1x36x8x128xf32, #tpu.memory_space<vmem>>, vector<1x1x8x128xf32>
    %11 = vector.shape_cast %10 : vector<1x1x8x128xf32> to vector<8x128xf32>
    %c0_11 = arith.constant 0 : index
    %c1_12 = arith.constant 1 : index
    %c0_13 = arith.constant 0 : index
    %c0_14 = arith.constant 0 : index
    %12 = vector.load %arg5[%c0_11, %c1_12, %c0_13, %c0_14] : memref<1x36x8x128xf32, #tpu.memory_space<vmem>>, vector<1x1x8x128xf32>
    %13 = vector.shape_cast %12 : vector<1x1x8x128xf32> to vector<8x128xf32>
    %c0_15 = arith.constant 0 : index
    %c2 = arith.constant 2 : index
    %c0_16 = arith.constant 0 : index
    %c0_17 = arith.constant 0 : index
    %14 = vector.load %arg5[%c0_15, %c2, %c0_16, %c0_17] : memref<1x36x8x128xf32, #tpu.memory_space<vmem>>, vector<1x1x8x128xf32>
    %15 = vector.shape_cast %14 : vector<1x1x8x128xf32> to vector<8x128xf32>
    %c0_18 = arith.constant 0 : index
    %c3 = arith.constant 3 : index
    %c0_19 = arith.constant 0 : index
    %c0_20 = arith.constant 0 : index
    %16 = vector.load %arg5[%c0_18, %c3, %c0_19, %c0_20] : memref<1x36x8x128xf32, #tpu.memory_space<vmem>>, vector<1x1x8x128xf32>
    %17 = vector.shape_cast %16 : vector<1x1x8x128xf32> to vector<8x128xf32>
    %c0_21 = arith.constant 0 : index
    %c0_22 = arith.constant 0 : index
    %18 = memref.load %arg2[%c0_21, %c0_22] : memref<9x4xf32, #tpu.memory_space<smem>>
    %c0_23 = arith.constant 0 : index
    %c1_24 = arith.constant 1 : index
    %19 = memref.load %arg2[%c0_23, %c1_24] : memref<9x4xf32, #tpu.memory_space<smem>>
    %c0_25 = arith.constant 0 : index
    %c2_26 = arith.constant 2 : index
    %20 = memref.load %arg2[%c0_25, %c2_26] : memref<9x4xf32, #tpu.memory_space<smem>>
    %c0_27 = arith.constant 0 : index
    %c3_28 = arith.constant 3 : index
    %21 = memref.load %arg2[%c0_27, %c3_28] : memref<9x4xf32, #tpu.memory_space<smem>>
    %22 = arith.subf %20, %18 : f32
    %cst_29 = arith.constant 1.000000e+00 : f32
    %23 = arith.addf %22, %cst_29 : f32
    %24 = arith.subf %21, %19 : f32
    %cst_30 = arith.constant 1.000000e+00 : f32
    %25 = arith.addf %24, %cst_30 : f32
    %cst_31 = arith.constant 5.000000e-01 : f32
    %26 = arith.mulf %cst_31, %23 : f32
    %27 = arith.addf %18, %26 : f32
    %28 = vector.broadcast %27 : f32 to vector<8x128xf32>
    %29 = arith.addf %1, %28 : vector<8x128xf32>
    %cst_32 = arith.constant 5.000000e-01 : f32
    %30 = arith.mulf %cst_32, %25 : f32
    %31 = arith.addf %19, %30 : f32
    %32 = vector.broadcast %31 : f32 to vector<8x128xf32>
    %33 = arith.addf %3, %32 : vector<8x128xf32>
    %34 = vector.broadcast %23 : f32 to vector<8x128xf32>
    %35 = arith.mulf %11, %34 : vector<8x128xf32>
    %36 = arith.addf %35, %29 : vector<8x128xf32>
    %37 = vector.broadcast %25 : f32 to vector<8x128xf32>
    %38 = arith.mulf %13, %37 : vector<8x128xf32>
    %39 = arith.addf %38, %33 : vector<8x128xf32>
    %40 = math.exp %15 : vector<8x128xf32>
    %41 = vector.broadcast %23 : f32 to vector<8x128xf32>
    %42 = arith.mulf %40, %41 : vector<8x128xf32>
    %43 = math.exp %17 : vector<8x128xf32>
    %44 = vector.broadcast %25 : f32 to vector<8x128xf32>
    %45 = arith.mulf %43, %44 : vector<8x128xf32>
    %cst_33 = arith.constant 5.000000e-01 : f32
    %46 = vector.broadcast %cst_33 : f32 to vector<8x128xf32>
    %47 = arith.mulf %46, %42 : vector<8x128xf32>
    %48 = arith.subf %36, %47 : vector<8x128xf32>
    %cst_34 = arith.constant 0.000000e+00 : f32
    %49 = vector.broadcast %cst_34 : f32 to vector<8x128xf32>
    %50 = arith.maximumf %48, %49 : vector<8x128xf32>
    %51 = vector.broadcast %6 : f32 to vector<8x128xf32>
    %52 = arith.minimumf %50, %51 : vector<8x128xf32>
    %c0_35 = arith.constant 0 : index
    %c0_36 = arith.constant 0 : index
    %c0_37 = arith.constant 0 : index
    %c0_38 = arith.constant 0 : index
    %c0_39 = arith.constant 0 : index
    %53 = vector.load %arg6[%c0_35, %c0_36, %c0_37, %c0_38, %c0_39] : memref<1x4x9x8x128xf32, #tpu.memory_space<vmem>>, vector<1x1x1x8x128xf32>
    %54 = vector.shape_cast %53 : vector<1x1x1x8x128xf32> to vector<8x128xf32>
    %55 = vector.shape_cast %52 : vector<8x128xf32> to vector<1x1x1x8x128xf32>
    tpu.vector_store %arg6[%c0_35, %c0_36, %c0_37, %c0_38, %c0_39], %55 {strides = array<i32>} : memref<1x4x9x8x128xf32, #tpu.memory_space<vmem>>, vector<1x1x1x8x128xf32>,
    %cst_40 = arith.constant 5.000000e-01 : f32
    %56 = vector.broadcast %cst_40 : f32 to vector<8x128xf32>
    %57 = arith.mulf %56, %45 : vector<8x128xf32>
    %58 = arith.subf %39, %57 : vector<8x128xf32>
    %cst_41 = arith.constant 0.000000e+00 : f32
    %59 = vector.broadcast %cst_41 : f32 to vector<8x128xf32>
    %60 = arith.maximumf %58, %59 : vector<8x128xf32>
    %61 = vector.broadcast %9 : f32 to vector<8x128xf32>
    %62 = arith.minimumf %60, %61 : vector<8x128xf32>
    %c0_42 = arith.constant 0 : index
    %c1_43 = arith.constant 1 : index
    %c0_44 = arith.constant 0 : index
    %c0_45 = arith.constant 0 : index
    %c0_46 = arith.constant 0 : index
    %63 = vector.load %arg6[%c0_42, %c1_43, %c0_44, %c0_45, %c0_46] : memref<1x4x9x8x128xf32, #tpu.memory_space<vmem>>, vector<1x1x1x8x128xf32>
    %64 = vector.shape_cast %63 : vector<1x1x1x8x128xf32> to vector<8x128xf32>
    %65 = vector.shape_cast %62 : vector<8x128xf32> to vector<1x1x1x8x128xf32>
    tpu.vector_store %arg6[%c0_42, %c1_43, %c0_44, %c0_45, %c0_46], %65 {strides = array<i32>} : memref<1x4x9x8x128xf32, #tpu.memory_space<vmem>>, vector<1x1x1x8x128xf32>,
    %cst_47 = arith.constant 5.000000e-01 : f32
    %66 = vector.broadcast %cst_47 : f32 to vector<8x128xf32>
    %67 = arith.mulf %66, %42 : vector<8x128xf32>
    %68 = arith.addf %36, %67 : vector<8x128xf32>
    %cst_48 = arith.constant 0.000000e+00 : f32
    %69 = vector.broadcast %cst_48 : f32 to vector<8x128xf32>
    %70 = arith.maximumf %68, %69 : vector<8x128xf32>
    %71 = vector.broadcast %6 : f32 to vector<8x128xf32>
    %72 = arith.minimumf %70, %71 : vector<8x128xf32>
    %c0_49 = arith.constant 0 : index
    %c2_50 = arith.constant 2 : index
    %c0_51 = arith.constant 0 : index
    %c0_52 = arith.constant 0 : index
    %c0_53 = arith.constant 0 : index
    %73 = vector.load %arg6[%c0_49, %c2_50, %c0_51, %c0_52, %c0_53] : memref<1x4x9x8x128xf32, #tpu.memory_space<vmem>>, vector<1x1x1x8x128xf32>
    %74 = vector.shape_cast %73 : vector<1x1x1x8x128xf32> to vector<8x128xf32>
    %75 = vector.shape_cast %72 : vector<8x128xf32> to vector<1x1x1x8x128xf32>
    tpu.vector_store %arg6[%c0_49, %c2_50, %c0_51, %c0_52, %c0_53], %75 {strides = array<i32>} : memref<1x4x9x8x128xf32, #tpu.memory_space<vmem>>, vector<1x1x1x8x128xf32>,
    %cst_54 = arith.constant 5.000000e-01 : f32
    %76 = vector.broadcast %cst_54 : f32 to vector<8x128xf32>
    %77 = arith.mulf %76, %45 : vector<8x128xf32>
    %78 = arith.addf %39, %77 : vector<8x128xf32>
    %cst_55 = arith.constant 0.000000e+00 : f32
    %79 = vector.broadcast %cst_55 : f32 to vector<8x128xf32>
    %80 = arith.maximumf %78, %79 : vector<8x128xf32>
    %81 = vector.broadcast %9 : f32 to vector<8x128xf32>
    %82 = arith.minimumf %80, %81 : vector<8x128xf32>
    %c0_56 = arith.constant 0 : index
    %c3_57 = arith.constant 3 : index
    %c0_58 = arith.constant 0 : index
    %c0_59 = arith.constant 0 : index
    %c0_60 = arith.constant 0 : index
    %83 = vector.load %arg6[%c0_56, %c3_57, %c0_58, %c0_59, %c0_60] : memref<1x4x9x8x128xf32, #tpu.memory_space<vmem>>, vector<1x1x1x8x128xf32>
    %84 = vector.shape_cast %83 : vector<1x1x1x8x128xf32> to vector<8x128xf32>
    %85 = vector.shape_cast %82 : vector<8x128xf32> to vector<1x1x1x8x128xf32>
    tpu.vector_store %arg6[%c0_56, %c3_57, %c0_58, %c0_59, %c0_60], %85 {strides = array<i32>} : memref<1x4x9x8x128xf32, #tpu.memory_space<vmem>>, vector<1x1x1x8x128xf32>,
    %c0_61 = arith.constant 0 : index
    %c4 = arith.constant 4 : index
    %c0_62 = arith.constant 0 : index
    %c0_63 = arith.constant 0 : index
    %86 = vector.load %arg5[%c0_61, %c4, %c0_62, %c0_63] : memref<1x36x8x128xf32, #tpu.memory_space<vmem>>, vector<1x1x8x128xf32>
    %87 = vector.shape_cast %86 : vector<1x1x8x128xf32> to vector<8x128xf32>
    %c0_64 = arith.constant 0 : index
    %c5 = arith.constant 5 : index
    %c0_65 = arith.constant 0 : index
    %c0_66 = arith.constant 0 : index
    %88 = vector.load %arg5[%c0_64, %c5, %c0_65, %c0_66] : memref<1x36x8x128xf32, #tpu.memory_space<vmem>>, vector<1x1x8x128xf32>
    %89 = vector.shape_cast %88 : vector<1x1x8x128xf32> to vector<8x128xf32>
    %c0_67 = arith.constant 0 : index
    %c6 = arith.constant 6 : index
    %c0_68 = arith.constant 0 : index
    %c0_69 = arith.constant 0 : index
    %90 = vector.load %arg5[%c0_67, %c6, %c0_68, %c0_69] : memref<1x36x8x128xf32, #tpu.memory_space<vmem>>, vector<1x1x8x128xf32>
    %91 = vector.shape_cast %90 : vector<1x1x8x128xf32> to vector<8x128xf32>
    %c0_70 = arith.constant 0 : index
    %c7 = arith.constant 7 : index
    %c0_71 = arith.constant 0 : index
    %c0_72 = arith.constant 0 : index
    %92 = vector.load %arg5[%c0_70, %c7, %c0_71, %c0_72] : memref<1x36x8x128xf32, #tpu.memory_space<vmem>>, vector<1x1x8x128xf32>
    %93 = vector.shape_cast %92 : vector<1x1x8x128xf32> to vector<8x128xf32>
    %c1_73 = arith.constant 1 : index
    %c0_74 = arith.constant 0 : index
    %94 = memref.load %arg2[%c1_73, %c0_74] : memref<9x4xf32, #tpu.memory_space<smem>>
    %c1_75 = arith.constant 1 : index
    %c1_76 = arith.constant 1 : index
    %95 = memref.load %arg2[%c1_75, %c1_76] : memref<9x4xf32, #tpu.memory_space<smem>>
    %c1_77 = arith.constant 1 : index
    %c2_78 = arith.constant 2 : index
    %96 = memref.load %arg2[%c1_77, %c2_78] : memref<9x4xf32, #tpu.memory_space<smem>>
    %c1_79 = arith.constant 1 : index
    %c3_80 = arith.constant 3 : index
    %97 = memref.load %arg2[%c1_79, %c3_80] : memref<9x4xf32, #tpu.memory_space<smem>>
    %98 = arith.subf %96, %94 : f32
    %cst_81 = arith.constant 1.000000e+00 : f32
    %99 = arith.addf %98, %cst_81 : f32
    %100 = arith.subf %97, %95 : f32
    %cst_82 = arith.constant 1.000000e+00 : f32
    %101 = arith.addf %100, %cst_82 : f32
    %cst_83 = arith.constant 5.000000e-01 : f32
    %102 = arith.mulf %cst_83, %99 : f32
    %103 = arith.addf %94, %102 : f32
    %104 = vector.broadcast %103 : f32 to vector<8x128xf32>
    %105 = arith.addf %1, %104 : vector<8x128xf32>
    %cst_84 = arith.constant 5.000000e-01 : f32
    %106 = arith.mulf %cst_84, %101 : f32
    %107 = arith.addf %95, %106 : f32
    %108 = vector.broadcast %107 : f32 to vector<8x128xf32>
    %109 = arith.addf %3, %108 : vector<8x128xf32>
    %110 = vector.broadcast %99 : f32 to vector<8x128xf32>
    %111 = arith.mulf %87, %110 : vector<8x128xf32>
    %112 = arith.addf %111, %105 : vector<8x128xf32>
    %113 = vector.broadcast %101 : f32 to vector<8x128xf32>
    %114 = arith.mulf %89, %113 : vector<8x128xf32>
    %115 = arith.addf %114, %109 : vector<8x128xf32>
    %116 = math.exp %91 : vector<8x128xf32>
    %117 = vector.broadcast %99 : f32 to vector<8x128xf32>
    %118 = arith.mulf %116, %117 : vector<8x128xf32>
    %119 = math.exp %93 : vector<8x128xf32>
    %120 = vector.broadcast %101 : f32 to vector<8x128xf32>
    %121 = arith.mulf %119, %120 : vector<8x128xf32>
    %cst_85 = arith.constant 5.000000e-01 : f32
    %122 = vector.broadcast %cst_85 : f32 to vector<8x128xf32>
    %123 = arith.mulf %122, %118 : vector<8x128xf32>
    %124 = arith.subf %112, %123 : vector<8x128xf32>
    %cst_86 = arith.constant 0.000000e+00 : f32
    %125 = vector.broadcast %cst_86 : f32 to vector<8x128xf32>
    %126 = arith.maximumf %124, %125 : vector<8x128xf32>
    %127 = vector.broadcast %6 : f32 to vector<8x128xf32>
    %128 = arith.minimumf %126, %127 : vector<8x128xf32>
    %c0_87 = arith.constant 0 : index
    %c0_88 = arith.constant 0 : index
    %c1_89 = arith.constant 1 : index
    %c0_90 = arith.constant 0 : index
    %c0_91 = arith.constant 0 : index
    %129 = vector.load %arg6[%c0_87, %c0_88, %c1_89, %c0_90, %c0_91] : memref<1x4x9x8x128xf32, #tpu.memory_space<vmem>>, vector<1x1x1x8x128xf32>
    %130 = vector.shape_cast %129 : vector<1x1x1x8x128xf32> to vector<8x128xf32>
    %131 = vector.shape_cast %128 : vector<8x128xf32> to vector<1x1x1x8x128xf32>
    tpu.vector_store %arg6[%c0_87, %c0_88, %c1_89, %c0_90, %c0_91], %131 {strides = array<i32>} : memref<1x4x9x8x128xf32, #tpu.memory_space<vmem>>, vector<1x1x1x8x128xf32>,
    %cst_92 = arith.constant 5.000000e-01 : f32
    %132 = vector.broadcast %cst_92 : f32 to vector<8x128xf32>
    %133 = arith.mulf %132, %121 : vector<8x128xf32>
    %134 = arith.subf %115, %133 : vector<8x128xf32>
    %cst_93 = arith.constant 0.000000e+00 : f32
    %135 = vector.broadcast %cst_93 : f32 to vector<8x128xf32>
    %136 = arith.maximumf %134, %135 : vector<8x128xf32>
    %137 = vector.broadcast %9 : f32 to vector<8x128xf32>
    %138 = arith.minimumf %136, %137 : vector<8x128xf32>
    %c0_94 = arith.constant 0 : index
    %c1_95 = arith.constant 1 : index
    %c1_96 = arith.constant 1 : index
    %c0_97 = arith.constant 0 : index
    %c0_98 = arith.constant 0 : index
    %139 = vector.load %arg6[%c0_94, %c1_95, %c1_96, %c0_97, %c0_98] : memref<1x4x9x8x128xf32, #tpu.memory_space<vmem>>, vector<1x1x1x8x128xf32>
    %140 = vector.shape_cast %139 : vector<1x1x1x8x128xf32> to vector<8x128xf32>
    %141 = vector.shape_cast %138 : vector<8x128xf32> to vector<1x1x1x8x128xf32>
    tpu.vector_store %arg6[%c0_94, %c1_95, %c1_96, %c0_97, %c0_98], %141 {strides = array<i32>} : memref<1x4x9x8x128xf32, #tpu.memory_space<vmem>>, vector<1x1x1x8x128xf32>,
    %cst_99 = arith.constant 5.000000e-01 : f32
    %142 = vector.broadcast %cst_99 : f32 to vector<8x128xf32>
    %143 = arith.mulf %142, %118 : vector<8x128xf32>
    %144 = arith.addf %112, %143 : vector<8x128xf32>
    %cst_100 = arith.constant 0.000000e+00 : f32
    %145 = vector.broadcast %cst_100 : f32 to vector<8x128xf32>
    %146 = arith.maximumf %144, %145 : vector<8x128xf32>
    %147 = vector.broadcast %6 : f32 to vector<8x128xf32>
    %148 = arith.minimumf %146, %147 : vector<8x128xf32>
    %c0_101 = arith.constant 0 : index
    %c2_102 = arith.constant 2 : index
    %c1_103 = arith.constant 1 : index
    %c0_104 = arith.constant 0 : index
    %c0_105 = arith.constant 0 : index
    %149 = vector.load %arg6[%c0_101, %c2_102, %c1_103, %c0_104, %c0_105] : memref<1x4x9x8x128xf32, #tpu.memory_space<vmem>>, vector<1x1x1x8x128xf32>
    %150 = vector.shape_cast %149 : vector<1x1x1x8x128xf32> to vector<8x128xf32>
    %151 = vector.shape_cast %148 : vector<8x128xf32> to vector<1x1x1x8x128xf32>
    tpu.vector_store %arg6[%c0_101, %c2_102, %c1_103, %c0_104, %c0_105], %151 {strides = array<i32>} : memref<1x4x9x8x128xf32, #tpu.memory_space<vmem>>, vector<1x1x1x8x128xf32>,
    %cst_106 = arith.constant 5.000000e-01 : f32
    %152 = vector.broadcast %cst_106 : f32 to vector<8x128xf32>
    %153 = arith.mulf %152, %121 : vector<8x128xf32>
    %154 = arith.addf %115, %153 : vector<8x128xf32>
    %cst_107 = arith.constant 0.000000e+00 : f32
    %155 = vector.broadcast %cst_107 : f32 to vector<8x128xf32>
    %156 = arith.maximumf %154, %155 : vector<8x128xf32>
    %157 = vector.broadcast %9 : f32 to vector<8x128xf32>
    %158 = arith.minimumf %156, %157 : vector<8x128xf32>
    %c0_108 = arith.constant 0 : index
    %c3_109 = arith.constant 3 : index
    %c1_110 = arith.constant 1 : index
    %c0_111 = arith.constant 0 : index
    %c0_112 = arith.constant 0 : index
    %159 = vector.load %arg6[%c0_108, %c3_109, %c1_110, %c0_111, %c0_112] : memref<1x4x9x8x128xf32, #tpu.memory_space<vmem>>, vector<1x1x1x8x128xf32>
    %160 = vector.shape_cast %159 : vector<1x1x1x8x128xf32> to vector<8x128xf32>
    %161 = vector.shape_cast %158 : vector<8x128xf32> to vector<1x1x1x8x128xf32>
    tpu.vector_store %arg6[%c0_108, %c3_109, %c1_110, %c0_111, %c0_112], %161 {strides = array<i32>} : memref<1x4x9x8x128xf32, #tpu.memory_space<vmem>>, vector<1x1x1x8x128xf32>,
    %c0_113 = arith.constant 0 : index
    %c8 = arith.constant 8 : index
    %c0_114 = arith.constant 0 : index
    %c0_115 = arith.constant 0 : index
    %162 = vector.load %arg5[%c0_113, %c8, %c0_114, %c0_115] : memref<1x36x8x128xf32, #tpu.memory_space<vmem>>, vector<1x1x8x128xf32>
    %163 = vector.shape_cast %162 : vector<1x1x8x128xf32> to vector<8x128xf32>
    %c0_116 = arith.constant 0 : index
    %c9 = arith.constant 9 : index
    %c0_117 = arith.constant 0 : index
    %c0_118 = arith.constant 0 : index
    %164 = vector.load %arg5[%c0_116, %c9, %c0_117, %c0_118] : memref<1x36x8x128xf32, #tpu.memory_space<vmem>>, vector<1x1x8x128xf32>
    %165 = vector.shape_cast %164 : vector<1x1x8x128xf32> to vector<8x128xf32>
    %c0_119 = arith.constant 0 : index
    %c10 = arith.constant 10 : index
    %c0_120 = arith.constant 0 : index
    %c0_121 = arith.constant 0 : index
    %166 = vector.load %arg5[%c0_119, %c10, %c0_120, %c0_121] : memref<1x36x8x128xf32, #tpu.memory_space<vmem>>, vector<1x1x8x128xf32>
    %167 = vector.shape_cast %166 : vector<1x1x8x128xf32> to vector<8x128xf32>
    %c0_122 = arith.constant 0 : index
    %c11 = arith.constant 11 : index
    %c0_123 = arith.constant 0 : index
    %c0_124 = arith.constant 0 : index
    %168 = vector.load %arg5[%c0_122, %c11, %c0_123, %c0_124] : memref<1x36x8x128xf32, #tpu.memory_space<vmem>>, vector<1x1x8x128xf32>
    %169 = vector.shape_cast %168 : vector<1x1x8x128xf32> to vector<8x128xf32>
    %c2_125 = arith.constant 2 : index
    %c0_126 = arith.constant 0 : index
    %170 = memref.load %arg2[%c2_125, %c0_126] : memref<9x4xf32, #tpu.memory_space<smem>>
    %c2_127 = arith.constant 2 : index
    %c1_128 = arith.constant 1 : index
    %171 = memref.load %arg2[%c2_127, %c1_128] : memref<9x4xf32, #tpu.memory_space<smem>>
    %c2_129 = arith.constant 2 : index
    %c2_130 = arith.constant 2 : index
    %172 = memref.load %arg2[%c2_129, %c2_130] : memref<9x4xf32, #tpu.memory_space<smem>>
    %c2_131 = arith.constant 2 : index
    %c3_132 = arith.constant 3 : index
    %173 = memref.load %arg2[%c2_131, %c3_132] : memref<9x4xf32, #tpu.memory_space<smem>>
    %174 = arith.subf %172, %170 : f32
    %cst_133 = arith.constant 1.000000e+00 : f32
    %175 = arith.addf %174, %cst_133 : f32
    %176 = arith.subf %173, %171 : f32
    %cst_134 = arith.constant 1.000000e+00 : f32
    %177 = arith.addf %176, %cst_134 : f32
    %cst_135 = arith.constant 5.000000e-01 : f32
    %178 = arith.mulf %cst_135, %175 : f32
    %179 = arith.addf %170, %178 : f32
    %180 = vector.broadcast %179 : f32 to vector<8x128xf32>
    %181 = arith.addf %1, %180 : vector<8x128xf32>
    %cst_136 = arith.constant 5.000000e-01 : f32
    %182 = arith.mulf %cst_136, %177 : f32
    %183 = arith.addf %171, %182 : f32
    %184 = vector.broadcast %183 : f32 to vector<8x128xf32>
    %185 = arith.addf %3, %184 : vector<8x128xf32>
    %186 = vector.broadcast %175 : f32 to vector<8x128xf32>
    %187 = arith.mulf %163, %186 : vector<8x128xf32>
    %188 = arith.addf %187, %181 : vector<8x128xf32>
    %189 = vector.broadcast %177 : f32 to vector<8x128xf32>
    %190 = arith.mulf %165, %189 : vector<8x128xf32>
    %191 = arith.addf %190, %185 : vector<8x128xf32>
    %192 = math.exp %167 : vector<8x128xf32>
    %193 = vector.broadcast %175 : f32 to vector<8x128xf32>
    %194 = arith.mulf %192, %193 : vector<8x128xf32>
    %195 = math.exp %169 : vector<8x128xf32>
    %196 = vector.broadcast %177 : f32 to vector<8x128xf32>
    %197 = arith.mulf %195, %196 : vector<8x128xf32>
    %cst_137 = arith.constant 5.000000e-01 : f32
    %198 = vector.broadcast %cst_137 : f32 to vector<8x128xf32>
    %199 = arith.mulf %198, %194 : vector<8x128xf32>
    %200 = arith.subf %188, %199 : vector<8x128xf32>
    %cst_138 = arith.constant 0.000000e+00 : f32
    %201 = vector.broadcast %cst_138 : f32 to vector<8x128xf32>
    %202 = arith.maximumf %200, %201 : vector<8x128xf32>
    %203 = vector.broadcast %6 : f32 to vector<8x128xf32>
    %204 = arith.minimumf %202, %203 : vector<8x128xf32>
    %c0_139 = arith.constant 0 : index
    %c0_140 = arith.constant 0 : index
    %c2_141 = arith.constant 2 : index
    %c0_142 = arith.constant 0 : index
    %c0_143 = arith.constant 0 : index
    %205 = vector.load %arg6[%c0_139, %c0_140, %c2_141, %c0_142, %c0_143] : memref<1x4x9x8x128xf32, #tpu.memory_space<vmem>>, vector<1x1x1x8x128xf32>
    %206 = vector.shape_cast %205 : vector<1x1x1x8x128xf32> to vector<8x128xf32>
    %207 = vector.shape_cast %204 : vector<8x128xf32> to vector<1x1x1x8x128xf32>
    tpu.vector_store %arg6[%c0_139, %c0_140, %c2_141, %c0_142, %c0_143], %207 {strides = array<i32>} : memref<1x4x9x8x128xf32, #tpu.memory_space<vmem>>, vector<1x1x1x8x128xf32>,
    %cst_144 = arith.constant 5.000000e-01 : f32
    %208 = vector.broadcast %cst_144 : f32 to vector<8x128xf32>
    %209 = arith.mulf %208, %197 : vector<8x128xf32>
    %210 = arith.subf %191, %209 : vector<8x128xf32>
    %cst_145 = arith.constant 0.000000e+00 : f32
    %211 = vector.broadcast %cst_145 : f32 to vector<8x128xf32>
    %212 = arith.maximumf %210, %211 : vector<8x128xf32>
    %213 = vector.broadcast %9 : f32 to vector<8x128xf32>
    %214 = arith.minimumf %212, %213 : vector<8x128xf32>
    %c0_146 = arith.constant 0 : index
    %c1_147 = arith.constant 1 : index
    %c2_148 = arith.constant 2 : index
    %c0_149 = arith.constant 0 : index
    %c0_150 = arith.constant 0 : index
    %215 = vector.load %arg6[%c0_146, %c1_147, %c2_148, %c0_149, %c0_150] : memref<1x4x9x8x128xf32, #tpu.memory_space<vmem>>, vector<1x1x1x8x128xf32>
    %216 = vector.shape_cast %215 : vector<1x1x1x8x128xf32> to vector<8x128xf32>
    %217 = vector.shape_cast %214 : vector<8x128xf32> to vector<1x1x1x8x128xf32>
    tpu.vector_store %arg6[%c0_146, %c1_147, %c2_148, %c0_149, %c0_150], %217 {strides = array<i32>} : memref<1x4x9x8x128xf32, #tpu.memory_space<vmem>>, vector<1x1x1x8x128xf32>,
    %cst_151 = arith.constant 5.000000e-01 : f32
    %218 = vector.broadcast %cst_151 : f32 to vector<8x128xf32>
    %219 = arith.mulf %218, %194 : vector<8x128xf32>
    %220 = arith.addf %188, %219 : vector<8x128xf32>
    %cst_152 = arith.constant 0.000000e+00 : f32
    %221 = vector.broadcast %cst_152 : f32 to vector<8x128xf32>
    %222 = arith.maximumf %220, %221 : vector<8x128xf32>
    %223 = vector.broadcast %6 : f32 to vector<8x128xf32>
    %224 = arith.minimumf %222, %223 : vector<8x128xf32>
    %c0_153 = arith.constant 0 : index
    %c2_154 = arith.constant 2 : index
    %c2_155 = arith.constant 2 : index
    %c0_156 = arith.constant 0 : index
    %c0_157 = arith.constant 0 : index
    %225 = vector.load %arg6[%c0_153, %c2_154, %c2_155, %c0_156, %c0_157] : memref<1x4x9x8x128xf32, #tpu.memory_space<vmem>>, vector<1x1x1x8x128xf32>
    %226 = vector.shape_cast %225 : vector<1x1x1x8x128xf32> to vector<8x128xf32>
    %227 = vector.shape_cast %224 : vector<8x128xf32> to vector<1x1x1x8x128xf32>
    tpu.vector_store %arg6[%c0_153, %c2_154, %c2_155, %c0_156, %c0_157], %227 {strides = array<i32>} : memref<1x4x9x8x128xf32, #tpu.memory_space<vmem>>, vector<1x1x1x8x128xf32>,
    %cst_158 = arith.constant 5.000000e-01 : f32
    %228 = vector.broadcast %cst_158 : f32 to vector<8x128xf32>
    %229 = arith.mulf %228, %197 : vector<8x128xf32>
    %230 = arith.addf %191, %229 : vector<8x128xf32>
    %cst_159 = arith.constant 0.000000e+00 : f32
    %231 = vector.broadcast %cst_159 : f32 to vector<8x128xf32>
    %232 = arith.maximumf %230, %231 : vector<8x128xf32>
    %233 = vector.broadcast %9 : f32 to vector<8x128xf32>
    %234 = arith.minimumf %232, %233 : vector<8x128xf32>
    %c0_160 = arith.constant 0 : index
    %c3_161 = arith.constant 3 : index
    %c2_162 = arith.constant 2 : index
    %c0_163 = arith.constant 0 : index
    %c0_164 = arith.constant 0 : index
    %235 = vector.load %arg6[%c0_160, %c3_161, %c2_162, %c0_163, %c0_164] : memref<1x4x9x8x128xf32, #tpu.memory_space<vmem>>, vector<1x1x1x8x128xf32>
    %236 = vector.shape_cast %235 : vector<1x1x1x8x128xf32> to vector<8x128xf32>
    %237 = vector.shape_cast %234 : vector<8x128xf32> to vector<1x1x1x8x128xf32>
    tpu.vector_store %arg6[%c0_160, %c3_161, %c2_162, %c0_163, %c0_164], %237 {strides = array<i32>} : memref<1x4x9x8x128xf32, #tpu.memory_space<vmem>>, vector<1x1x1x8x128xf32>,
    %c0_165 = arith.constant 0 : index
    %c12 = arith.constant 12 : index
    %c0_166 = arith.constant 0 : index
    %c0_167 = arith.constant 0 : index
    %238 = vector.load %arg5[%c0_165, %c12, %c0_166, %c0_167] : memref<1x36x8x128xf32, #tpu.memory_space<vmem>>, vector<1x1x8x128xf32>
    %239 = vector.shape_cast %238 : vector<1x1x8x128xf32> to vector<8x128xf32>
    %c0_168 = arith.constant 0 : index
    %c13 = arith.constant 13 : index
    %c0_169 = arith.constant 0 : index
    %c0_170 = arith.constant 0 : index
    %240 = vector.load %arg5[%c0_168, %c13, %c0_169, %c0_170] : memref<1x36x8x128xf32, #tpu.memory_space<vmem>>, vector<1x1x8x128xf32>
    %241 = vector.shape_cast %240 : vector<1x1x8x128xf32> to vector<8x128xf32>
    %c0_171 = arith.constant 0 : index
    %c14 = arith.constant 14 : index
    %c0_172 = arith.constant 0 : index
    %c0_173 = arith.constant 0 : index
    %242 = vector.load %arg5[%c0_171, %c14, %c0_172, %c0_173] : memref<1x36x8x128xf32, #tpu.memory_space<vmem>>, vector<1x1x8x128xf32>
    %243 = vector.shape_cast %242 : vector<1x1x8x128xf32> to vector<8x128xf32>
    %c0_174 = arith.constant 0 : index
    %c15 = arith.constant 15 : index
    %c0_175 = arith.constant 0 : index
    %c0_176 = arith.constant 0 : index
    %244 = vector.load %arg5[%c0_174, %c15, %c0_175, %c0_176] : memref<1x36x8x128xf32, #tpu.memory_space<vmem>>, vector<1x1x8x128xf32>
    %245 = vector.shape_cast %244 : vector<1x1x8x128xf32> to vector<8x128xf32>
    %c3_177 = arith.constant 3 : index
    %c0_178 = arith.constant 0 : index
    %246 = memref.load %arg2[%c3_177, %c0_178] : memref<9x4xf32, #tpu.memory_space<smem>>
    %c3_179 = arith.constant 3 : index
    %c1_180 = arith.constant 1 : index
    %247 = memref.load %arg2[%c3_179, %c1_180] : memref<9x4xf32, #tpu.memory_space<smem>>
    %c3_181 = arith.constant 3 : index
    %c2_182 = arith.constant 2 : index
    %248 = memref.load %arg2[%c3_181, %c2_182] : memref<9x4xf32, #tpu.memory_space<smem>>
    %c3_183 = arith.constant 3 : index
    %c3_184 = arith.constant 3 : index
    %249 = memref.load %arg2[%c3_183, %c3_184] : memref<9x4xf32, #tpu.memory_space<smem>>
    %250 = arith.subf %248, %246 : f32
    %cst_185 = arith.constant 1.000000e+00 : f32
    %251 = arith.addf %250, %cst_185 : f32
    %252 = arith.subf %249, %247 : f32
    %cst_186 = arith.constant 1.000000e+00 : f32
    %253 = arith.addf %252, %cst_186 : f32
    %cst_187 = arith.constant 5.000000e-01 : f32
    %254 = arith.mulf %cst_187, %251 : f32
    %255 = arith.addf %246, %254 : f32
    %256 = vector.broadcast %255 : f32 to vector<8x128xf32>
    %257 = arith.addf %1, %256 : vector<8x128xf32>
    %cst_188 = arith.constant 5.000000e-01 : f32
    %258 = arith.mulf %cst_188, %253 : f32
    %259 = arith.addf %247, %258 : f32
    %260 = vector.broadcast %259 : f32 to vector<8x128xf32>
    %261 = arith.addf %3, %260 : vector<8x128xf32>
    %262 = vector.broadcast %251 : f32 to vector<8x128xf32>
    %263 = arith.mulf %239, %262 : vector<8x128xf32>
    %264 = arith.addf %263, %257 : vector<8x128xf32>
    %265 = vector.broadcast %253 : f32 to vector<8x128xf32>
    %266 = arith.mulf %241, %265 : vector<8x128xf32>
    %267 = arith.addf %266, %261 : vector<8x128xf32>
    %268 = math.exp %243 : vector<8x128xf32>
    %269 = vector.broadcast %251 : f32 to vector<8x128xf32>
    %270 = arith.mulf %268, %269 : vector<8x128xf32>
    %271 = math.exp %245 : vector<8x128xf32>
    %272 = vector.broadcast %253 : f32 to vector<8x128xf32>
    %273 = arith.mulf %271, %272 : vector<8x128xf32>
    %cst_189 = arith.constant 5.000000e-01 : f32
    %274 = vector.broadcast %cst_189 : f32 to vector<8x128xf32>
    %275 = arith.mulf %274, %270 : vector<8x128xf32>
    %276 = arith.subf %264, %275 : vector<8x128xf32>
    %cst_190 = arith.constant 0.000000e+00 : f32
    %277 = vector.broadcast %cst_190 : f32 to vector<8x128xf32>
    %278 = arith.maximumf %276, %277 : vector<8x128xf32>
    %279 = vector.broadcast %6 : f32 to vector<8x128xf32>
    %280 = arith.minimumf %278, %279 : vector<8x128xf32>
    %c0_191 = arith.constant 0 : index
    %c0_192 = arith.constant 0 : index
    %c3_193 = arith.constant 3 : index
    %c0_194 = arith.constant 0 : index
    %c0_195 = arith.constant 0 : index
    %281 = vector.load %arg6[%c0_191, %c0_192, %c3_193, %c0_194, %c0_195] : memref<1x4x9x8x128xf32, #tpu.memory_space<vmem>>, vector<1x1x1x8x128xf32>
    %282 = vector.shape_cast %281 : vector<1x1x1x8x128xf32> to vector<8x128xf32>
    %283 = vector.shape_cast %280 : vector<8x128xf32> to vector<1x1x1x8x128xf32>
    tpu.vector_store %arg6[%c0_191, %c0_192, %c3_193, %c0_194, %c0_195], %283 {strides = array<i32>} : memref<1x4x9x8x128xf32, #tpu.memory_space<vmem>>, vector<1x1x1x8x128xf32>,
    %cst_196 = arith.constant 5.000000e-01 : f32
    %284 = vector.broadcast %cst_196 : f32 to vector<8x128xf32>
    %285 = arith.mulf %284, %273 : vector<8x128xf32>
    %286 = arith.subf %267, %285 : vector<8x128xf32>
    %cst_197 = arith.constant 0.000000e+00 : f32
    %287 = vector.broadcast %cst_197 : f32 to vector<8x128xf32>
    %288 = arith.maximumf %286, %287 : vector<8x128xf32>
    %289 = vector.broadcast %9 : f32 to vector<8x128xf32>
    %290 = arith.minimumf %288, %289 : vector<8x128xf32>
    %c0_198 = arith.constant 0 : index
    %c1_199 = arith.constant 1 : index
    %c3_200 = arith.constant 3 : index
    %c0_201 = arith.constant 0 : index
    %c0_202 = arith.constant 0 : index
    %291 = vector.load %arg6[%c0_198, %c1_199, %c3_200, %c0_201, %c0_202] : memref<1x4x9x8x128xf32, #tpu.memory_space<vmem>>, vector<1x1x1x8x128xf32>
    %292 = vector.shape_cast %291 : vector<1x1x1x8x128xf32> to vector<8x128xf32>
    %293 = vector.shape_cast %290 : vector<8x128xf32> to vector<1x1x1x8x128xf32>
    tpu.vector_store %arg6[%c0_198, %c1_199, %c3_200, %c0_201, %c0_202], %293 {strides = array<i32>} : memref<1x4x9x8x128xf32, #tpu.memory_space<vmem>>, vector<1x1x1x8x128xf32>,
    %cst_203 = arith.constant 5.000000e-01 : f32
    %294 = vector.broadcast %cst_203 : f32 to vector<8x128xf32>
    %295 = arith.mulf %294, %270 : vector<8x128xf32>
    %296 = arith.addf %264, %295 : vector<8x128xf32>
    %cst_204 = arith.constant 0.000000e+00 : f32
    %297 = vector.broadcast %cst_204 : f32 to vector<8x128xf32>
    %298 = arith.maximumf %296, %297 : vector<8x128xf32>
    %299 = vector.broadcast %6 : f32 to vector<8x128xf32>
    %300 = arith.minimumf %298, %299 : vector<8x128xf32>
    %c0_205 = arith.constant 0 : index
    %c2_206 = arith.constant 2 : index
    %c3_207 = arith.constant 3 : index
    %c0_208 = arith.constant 0 : index
    %c0_209 = arith.constant 0 : index
    %301 = vector.load %arg6[%c0_205, %c2_206, %c3_207, %c0_208, %c0_209] : memref<1x4x9x8x128xf32, #tpu.memory_space<vmem>>, vector<1x1x1x8x128xf32>
    %302 = vector.shape_cast %301 : vector<1x1x1x8x128xf32> to vector<8x128xf32>
    %303 = vector.shape_cast %300 : vector<8x128xf32> to vector<1x1x1x8x128xf32>
    tpu.vector_store %arg6[%c0_205, %c2_206, %c3_207, %c0_208, %c0_209], %303 {strides = array<i32>} : memref<1x4x9x8x128xf32, #tpu.memory_space<vmem>>, vector<1x1x1x8x128xf32>,
    %cst_210 = arith.constant 5.000000e-01 : f32
    %304 = vector.broadcast %cst_210 : f32 to vector<8x128xf32>
    %305 = arith.mulf %304, %273 : vector<8x128xf32>
    %306 = arith.addf %267, %305 : vector<8x128xf32>
    %cst_211 = arith.constant 0.000000e+00 : f32
    %307 = vector.broadcast %cst_211 : f32 to vector<8x128xf32>
    %308 = arith.maximumf %306, %307 : vector<8x128xf32>
    %309 = vector.broadcast %9 : f32 to vector<8x128xf32>
    %310 = arith.minimumf %308, %309 : vector<8x128xf32>
    %c0_212 = arith.constant 0 : index
    %c3_213 = arith.constant 3 : index
    %c3_214 = arith.constant 3 : index
    %c0_215 = arith.constant 0 : index
    %c0_216 = arith.constant 0 : index
    %311 = vector.load %arg6[%c0_212, %c3_213, %c3_214, %c0_215, %c0_216] : memref<1x4x9x8x128xf32, #tpu.memory_space<vmem>>, vector<1x1x1x8x128xf32>
    %312 = vector.shape_cast %311 : vector<1x1x1x8x128xf32> to vector<8x128xf32>
    %313 = vector.shape_cast %310 : vector<8x128xf32> to vector<1x1x1x8x128xf32>
    tpu.vector_store %arg6[%c0_212, %c3_213, %c3_214, %c0_215, %c0_216], %313 {strides = array<i32>} : memref<1x4x9x8x128xf32, #tpu.memory_space<vmem>>, vector<1x1x1x8x128xf32>,
    %c0_217 = arith.constant 0 : index
    %c16 = arith.constant 16 : index
    %c0_218 = arith.constant 0 : index
    %c0_219 = arith.constant 0 : index
    %314 = vector.load %arg5[%c0_217, %c16, %c0_218, %c0_219] : memref<1x36x8x128xf32, #tpu.memory_space<vmem>>, vector<1x1x8x128xf32>
    %315 = vector.shape_cast %314 : vector<1x1x8x128xf32> to vector<8x128xf32>
    %c0_220 = arith.constant 0 : index
    %c17 = arith.constant 17 : index
    %c0_221 = arith.constant 0 : index
    %c0_222 = arith.constant 0 : index
    %316 = vector.load %arg5[%c0_220, %c17, %c0_221, %c0_222] : memref<1x36x8x128xf32, #tpu.memory_space<vmem>>, vector<1x1x8x128xf32>
    %317 = vector.shape_cast %316 : vector<1x1x8x128xf32> to vector<8x128xf32>
    %c0_223 = arith.constant 0 : index
    %c18 = arith.constant 18 : index
    %c0_224 = arith.constant 0 : index
    %c0_225 = arith.constant 0 : index
    %318 = vector.load %arg5[%c0_223, %c18, %c0_224, %c0_225] : memref<1x36x8x128xf32, #tpu.memory_space<vmem>>, vector<1x1x8x128xf32>
    %319 = vector.shape_cast %318 : vector<1x1x8x128xf32> to vector<8x128xf32>
    %c0_226 = arith.constant 0 : index
    %c19 = arith.constant 19 : index
    %c0_227 = arith.constant 0 : index
    %c0_228 = arith.constant 0 : index
    %320 = vector.load %arg5[%c0_226, %c19, %c0_227, %c0_228] : memref<1x36x8x128xf32, #tpu.memory_space<vmem>>, vector<1x1x8x128xf32>
    %321 = vector.shape_cast %320 : vector<1x1x8x128xf32> to vector<8x128xf32>
    %c4_229 = arith.constant 4 : index
    %c0_230 = arith.constant 0 : index
    %322 = memref.load %arg2[%c4_229, %c0_230] : memref<9x4xf32, #tpu.memory_space<smem>>
    %c4_231 = arith.constant 4 : index
    %c1_232 = arith.constant 1 : index
    %323 = memref.load %arg2[%c4_231, %c1_232] : memref<9x4xf32, #tpu.memory_space<smem>>
    %c4_233 = arith.constant 4 : index
    %c2_234 = arith.constant 2 : index
    %324 = memref.load %arg2[%c4_233, %c2_234] : memref<9x4xf32, #tpu.memory_space<smem>>
    %c4_235 = arith.constant 4 : index
    %c3_236 = arith.constant 3 : index
    %325 = memref.load %arg2[%c4_235, %c3_236] : memref<9x4xf32, #tpu.memory_space<smem>>
    %326 = arith.subf %324, %322 : f32
    %cst_237 = arith.constant 1.000000e+00 : f32
    %327 = arith.addf %326, %cst_237 : f32
    %328 = arith.subf %325, %323 : f32
    %cst_238 = arith.constant 1.000000e+00 : f32
    %329 = arith.addf %328, %cst_238 : f32
    %cst_239 = arith.constant 5.000000e-01 : f32
    %330 = arith.mulf %cst_239, %327 : f32
    %331 = arith.addf %322, %330 : f32
    %332 = vector.broadcast %331 : f32 to vector<8x128xf32>
    %333 = arith.addf %1, %332 : vector<8x128xf32>
    %cst_240 = arith.constant 5.000000e-01 : f32
    %334 = arith.mulf %cst_240, %329 : f32
    %335 = arith.addf %323, %334 : f32
    %336 = vector.broadcast %335 : f32 to vector<8x128xf32>
    %337 = arith.addf %3, %336 : vector<8x128xf32>
    %338 = vector.broadcast %327 : f32 to vector<8x128xf32>
    %339 = arith.mulf %315, %338 : vector<8x128xf32>
    %340 = arith.addf %339, %333 : vector<8x128xf32>
    %341 = vector.broadcast %329 : f32 to vector<8x128xf32>
    %342 = arith.mulf %317, %341 : vector<8x128xf32>
    %343 = arith.addf %342, %337 : vector<8x128xf32>
    %344 = math.exp %319 : vector<8x128xf32>
    %345 = vector.broadcast %327 : f32 to vector<8x128xf32>
    %346 = arith.mulf %344, %345 : vector<8x128xf32>
    %347 = math.exp %321 : vector<8x128xf32>
    %348 = vector.broadcast %329 : f32 to vector<8x128xf32>
    %349 = arith.mulf %347, %348 : vector<8x128xf32>
    %cst_241 = arith.constant 5.000000e-01 : f32
    %350 = vector.broadcast %cst_241 : f32 to vector<8x128xf32>
    %351 = arith.mulf %350, %346 : vector<8x128xf32>
    %352 = arith.subf %340, %351 : vector<8x128xf32>
    %cst_242 = arith.constant 0.000000e+00 : f32
    %353 = vector.broadcast %cst_242 : f32 to vector<8x128xf32>
    %354 = arith.maximumf %352, %353 : vector<8x128xf32>
    %355 = vector.broadcast %6 : f32 to vector<8x128xf32>
    %356 = arith.minimumf %354, %355 : vector<8x128xf32>
    %c0_243 = arith.constant 0 : index
    %c0_244 = arith.constant 0 : index
    %c4_245 = arith.constant 4 : index
    %c0_246 = arith.constant 0 : index
    %c0_247 = arith.constant 0 : index
    %357 = vector.load %arg6[%c0_243, %c0_244, %c4_245, %c0_246, %c0_247] : memref<1x4x9x8x128xf32, #tpu.memory_space<vmem>>, vector<1x1x1x8x128xf32>
    %358 = vector.shape_cast %357 : vector<1x1x1x8x128xf32> to vector<8x128xf32>
    %359 = vector.shape_cast %356 : vector<8x128xf32> to vector<1x1x1x8x128xf32>
    tpu.vector_store %arg6[%c0_243, %c0_244, %c4_245, %c0_246, %c0_247], %359 {strides = array<i32>} : memref<1x4x9x8x128xf32, #tpu.memory_space<vmem>>, vector<1x1x1x8x128xf32>,
    %cst_248 = arith.constant 5.000000e-01 : f32
    %360 = vector.broadcast %cst_248 : f32 to vector<8x128xf32>
    %361 = arith.mulf %360, %349 : vector<8x128xf32>
    %362 = arith.subf %343, %361 : vector<8x128xf32>
    %cst_249 = arith.constant 0.000000e+00 : f32
    %363 = vector.broadcast %cst_249 : f32 to vector<8x128xf32>
    %364 = arith.maximumf %362, %363 : vector<8x128xf32>
    %365 = vector.broadcast %9 : f32 to vector<8x128xf32>
    %366 = arith.minimumf %364, %365 : vector<8x128xf32>
    %c0_250 = arith.constant 0 : index
    %c1_251 = arith.constant 1 : index
    %c4_252 = arith.constant 4 : index
    %c0_253 = arith.constant 0 : index
    %c0_254 = arith.constant 0 : index
    %367 = vector.load %arg6[%c0_250, %c1_251, %c4_252, %c0_253, %c0_254] : memref<1x4x9x8x128xf32, #tpu.memory_space<vmem>>, vector<1x1x1x8x128xf32>
    %368 = vector.shape_cast %367 : vector<1x1x1x8x128xf32> to vector<8x128xf32>
    %369 = vector.shape_cast %366 : vector<8x128xf32> to vector<1x1x1x8x128xf32>
    tpu.vector_store %arg6[%c0_250, %c1_251, %c4_252, %c0_253, %c0_254], %369 {strides = array<i32>} : memref<1x4x9x8x128xf32, #tpu.memory_space<vmem>>, vector<1x1x1x8x128xf32>,
    %cst_255 = arith.constant 5.000000e-01 : f32
    %370 = vector.broadcast %cst_255 : f32 to vector<8x128xf32>
    %371 = arith.mulf %370, %346 : vector<8x128xf32>
    %372 = arith.addf %340, %371 : vector<8x128xf32>
    %cst_256 = arith.constant 0.000000e+00 : f32
    %373 = vector.broadcast %cst_256 : f32 to vector<8x128xf32>
    %374 = arith.maximumf %372, %373 : vector<8x128xf32>
    %375 = vector.broadcast %6 : f32 to vector<8x128xf32>
    %376 = arith.minimumf %374, %375 : vector<8x128xf32>
    %c0_257 = arith.constant 0 : index
    %c2_258 = arith.constant 2 : index
    %c4_259 = arith.constant 4 : index
    %c0_260 = arith.constant 0 : index
    %c0_261 = arith.constant 0 : index
    %377 = vector.load %arg6[%c0_257, %c2_258, %c4_259, %c0_260, %c0_261] : memref<1x4x9x8x128xf32, #tpu.memory_space<vmem>>, vector<1x1x1x8x128xf32>
    %378 = vector.shape_cast %377 : vector<1x1x1x8x128xf32> to vector<8x128xf32>
    %379 = vector.shape_cast %376 : vector<8x128xf32> to vector<1x1x1x8x128xf32>
    tpu.vector_store %arg6[%c0_257, %c2_258, %c4_259, %c0_260, %c0_261], %379 {strides = array<i32>} : memref<1x4x9x8x128xf32, #tpu.memory_space<vmem>>, vector<1x1x1x8x128xf32>,
    %cst_262 = arith.constant 5.000000e-01 : f32
    %380 = vector.broadcast %cst_262 : f32 to vector<8x128xf32>
    %381 = arith.mulf %380, %349 : vector<8x128xf32>
    %382 = arith.addf %343, %381 : vector<8x128xf32>
    %cst_263 = arith.constant 0.000000e+00 : f32
    %383 = vector.broadcast %cst_263 : f32 to vector<8x128xf32>
    %384 = arith.maximumf %382, %383 : vector<8x128xf32>
    %385 = vector.broadcast %9 : f32 to vector<8x128xf32>
    %386 = arith.minimumf %384, %385 : vector<8x128xf32>
    %c0_264 = arith.constant 0 : index
    %c3_265 = arith.constant 3 : index
    %c4_266 = arith.constant 4 : index
    %c0_267 = arith.constant 0 : index
    %c0_268 = arith.constant 0 : index
    %387 = vector.load %arg6[%c0_264, %c3_265, %c4_266, %c0_267, %c0_268] : memref<1x4x9x8x128xf32, #tpu.memory_space<vmem>>, vector<1x1x1x8x128xf32>
    %388 = vector.shape_cast %387 : vector<1x1x1x8x128xf32> to vector<8x128xf32>
    %389 = vector.shape_cast %386 : vector<8x128xf32> to vector<1x1x1x8x128xf32>
    tpu.vector_store %arg6[%c0_264, %c3_265, %c4_266, %c0_267, %c0_268], %389 {strides = array<i32>} : memref<1x4x9x8x128xf32, #tpu.memory_space<vmem>>, vector<1x1x1x8x128xf32>,
    %c0_269 = arith.constant 0 : index
    %c20 = arith.constant 20 : index
    %c0_270 = arith.constant 0 : index
    %c0_271 = arith.constant 0 : index
    %390 = vector.load %arg5[%c0_269, %c20, %c0_270, %c0_271] : memref<1x36x8x128xf32, #tpu.memory_space<vmem>>, vector<1x1x8x128xf32>
    %391 = vector.shape_cast %390 : vector<1x1x8x128xf32> to vector<8x128xf32>
    %c0_272 = arith.constant 0 : index
    %c21 = arith.constant 21 : index
    %c0_273 = arith.constant 0 : index
    %c0_274 = arith.constant 0 : index
    %392 = vector.load %arg5[%c0_272, %c21, %c0_273, %c0_274] : memref<1x36x8x128xf32, #tpu.memory_space<vmem>>, vector<1x1x8x128xf32>
    %393 = vector.shape_cast %392 : vector<1x1x8x128xf32> to vector<8x128xf32>
    %c0_275 = arith.constant 0 : index
    %c22 = arith.constant 22 : index
    %c0_276 = arith.constant 0 : index
    %c0_277 = arith.constant 0 : index
    %394 = vector.load %arg5[%c0_275, %c22, %c0_276, %c0_277] : memref<1x36x8x128xf32, #tpu.memory_space<vmem>>, vector<1x1x8x128xf32>
    %395 = vector.shape_cast %394 : vector<1x1x8x128xf32> to vector<8x128xf32>
    %c0_278 = arith.constant 0 : index
    %c23 = arith.constant 23 : index
    %c0_279 = arith.constant 0 : index
    %c0_280 = arith.constant 0 : index
    %396 = vector.load %arg5[%c0_278, %c23, %c0_279, %c0_280] : memref<1x36x8x128xf32, #tpu.memory_space<vmem>>, vector<1x1x8x128xf32>
    %397 = vector.shape_cast %396 : vector<1x1x8x128xf32> to vector<8x128xf32>
    %c5_281 = arith.constant 5 : index
    %c0_282 = arith.constant 0 : index
    %398 = memref.load %arg2[%c5_281, %c0_282] : memref<9x4xf32, #tpu.memory_space<smem>>
    %c5_283 = arith.constant 5 : index
    %c1_284 = arith.constant 1 : index
    %399 = memref.load %arg2[%c5_283, %c1_284] : memref<9x4xf32, #tpu.memory_space<smem>>
    %c5_285 = arith.constant 5 : index
    %c2_286 = arith.constant 2 : index
    %400 = memref.load %arg2[%c5_285, %c2_286] : memref<9x4xf32, #tpu.memory_space<smem>>
    %c5_287 = arith.constant 5 : index
    %c3_288 = arith.constant 3 : index
    %401 = memref.load %arg2[%c5_287, %c3_288] : memref<9x4xf32, #tpu.memory_space<smem>>
    %402 = arith.subf %400, %398 : f32
    %cst_289 = arith.constant 1.000000e+00 : f32
    %403 = arith.addf %402, %cst_289 : f32
    %404 = arith.subf %401, %399 : f32
    %cst_290 = arith.constant 1.000000e+00 : f32
    %405 = arith.addf %404, %cst_290 : f32
    %cst_291 = arith.constant 5.000000e-01 : f32
    %406 = arith.mulf %cst_291, %403 : f32
    %407 = arith.addf %398, %406 : f32
    %408 = vector.broadcast %407 : f32 to vector<8x128xf32>
    %409 = arith.addf %1, %408 : vector<8x128xf32>
    %cst_292 = arith.constant 5.000000e-01 : f32
    %410 = arith.mulf %cst_292, %405 : f32
    %411 = arith.addf %399, %410 : f32
    %412 = vector.broadcast %411 : f32 to vector<8x128xf32>
    %413 = arith.addf %3, %412 : vector<8x128xf32>
    %414 = vector.broadcast %403 : f32 to vector<8x128xf32>
    %415 = arith.mulf %391, %414 : vector<8x128xf32>
    %416 = arith.addf %415, %409 : vector<8x128xf32>
    %417 = vector.broadcast %405 : f32 to vector<8x128xf32>
    %418 = arith.mulf %393, %417 : vector<8x128xf32>
    %419 = arith.addf %418, %413 : vector<8x128xf32>
    %420 = math.exp %395 : vector<8x128xf32>
    %421 = vector.broadcast %403 : f32 to vector<8x128xf32>
    %422 = arith.mulf %420, %421 : vector<8x128xf32>
    %423 = math.exp %397 : vector<8x128xf32>
    %424 = vector.broadcast %405 : f32 to vector<8x128xf32>
    %425 = arith.mulf %423, %424 : vector<8x128xf32>
    %cst_293 = arith.constant 5.000000e-01 : f32
    %426 = vector.broadcast %cst_293 : f32 to vector<8x128xf32>
    %427 = arith.mulf %426, %422 : vector<8x128xf32>
    %428 = arith.subf %416, %427 : vector<8x128xf32>
    %cst_294 = arith.constant 0.000000e+00 : f32
    %429 = vector.broadcast %cst_294 : f32 to vector<8x128xf32>
    %430 = arith.maximumf %428, %429 : vector<8x128xf32>
    %431 = vector.broadcast %6 : f32 to vector<8x128xf32>
    %432 = arith.minimumf %430, %431 : vector<8x128xf32>
    %c0_295 = arith.constant 0 : index
    %c0_296 = arith.constant 0 : index
    %c5_297 = arith.constant 5 : index
    %c0_298 = arith.constant 0 : index
    %c0_299 = arith.constant 0 : index
    %433 = vector.load %arg6[%c0_295, %c0_296, %c5_297, %c0_298, %c0_299] : memref<1x4x9x8x128xf32, #tpu.memory_space<vmem>>, vector<1x1x1x8x128xf32>
    %434 = vector.shape_cast %433 : vector<1x1x1x8x128xf32> to vector<8x128xf32>
    %435 = vector.shape_cast %432 : vector<8x128xf32> to vector<1x1x1x8x128xf32>
    tpu.vector_store %arg6[%c0_295, %c0_296, %c5_297, %c0_298, %c0_299], %435 {strides = array<i32>} : memref<1x4x9x8x128xf32, #tpu.memory_space<vmem>>, vector<1x1x1x8x128xf32>,
    %cst_300 = arith.constant 5.000000e-01 : f32
    %436 = vector.broadcast %cst_300 : f32 to vector<8x128xf32>
    %437 = arith.mulf %436, %425 : vector<8x128xf32>
    %438 = arith.subf %419, %437 : vector<8x128xf32>
    %cst_301 = arith.constant 0.000000e+00 : f32
    %439 = vector.broadcast %cst_301 : f32 to vector<8x128xf32>
    %440 = arith.maximumf %438, %439 : vector<8x128xf32>
    %441 = vector.broadcast %9 : f32 to vector<8x128xf32>
    %442 = arith.minimumf %440, %441 : vector<8x128xf32>
    %c0_302 = arith.constant 0 : index
    %c1_303 = arith.constant 1 : index
    %c5_304 = arith.constant 5 : index
    %c0_305 = arith.constant 0 : index
    %c0_306 = arith.constant 0 : index
    %443 = vector.load %arg6[%c0_302, %c1_303, %c5_304, %c0_305, %c0_306] : memref<1x4x9x8x128xf32, #tpu.memory_space<vmem>>, vector<1x1x1x8x128xf32>
    %444 = vector.shape_cast %443 : vector<1x1x1x8x128xf32> to vector<8x128xf32>
    %445 = vector.shape_cast %442 : vector<8x128xf32> to vector<1x1x1x8x128xf32>
    tpu.vector_store %arg6[%c0_302, %c1_303, %c5_304, %c0_305, %c0_306], %445 {strides = array<i32>} : memref<1x4x9x8x128xf32, #tpu.memory_space<vmem>>, vector<1x1x1x8x128xf32>,
    %cst_307 = arith.constant 5.000000e-01 : f32
    %446 = vector.broadcast %cst_307 : f32 to vector<8x128xf32>
    %447 = arith.mulf %446, %422 : vector<8x128xf32>
    %448 = arith.addf %416, %447 : vector<8x128xf32>
    %cst_308 = arith.constant 0.000000e+00 : f32
    %449 = vector.broadcast %cst_308 : f32 to vector<8x128xf32>
    %450 = arith.maximumf %448, %449 : vector<8x128xf32>
    %451 = vector.broadcast %6 : f32 to vector<8x128xf32>
    %452 = arith.minimumf %450, %451 : vector<8x128xf32>
    %c0_309 = arith.constant 0 : index
    %c2_310 = arith.constant 2 : index
    %c5_311 = arith.constant 5 : index
    %c0_312 = arith.constant 0 : index
    %c0_313 = arith.constant 0 : index
    %453 = vector.load %arg6[%c0_309, %c2_310, %c5_311, %c0_312, %c0_313] : memref<1x4x9x8x128xf32, #tpu.memory_space<vmem>>, vector<1x1x1x8x128xf32>
    %454 = vector.shape_cast %453 : vector<1x1x1x8x128xf32> to vector<8x128xf32>
    %455 = vector.shape_cast %452 : vector<8x128xf32> to vector<1x1x1x8x128xf32>
    tpu.vector_store %arg6[%c0_309, %c2_310, %c5_311, %c0_312, %c0_313], %455 {strides = array<i32>} : memref<1x4x9x8x128xf32, #tpu.memory_space<vmem>>, vector<1x1x1x8x128xf32>,
    %cst_314 = arith.constant 5.000000e-01 : f32
    %456 = vector.broadcast %cst_314 : f32 to vector<8x128xf32>
    %457 = arith.mulf %456, %425 : vector<8x128xf32>
    %458 = arith.addf %419, %457 : vector<8x128xf32>
    %cst_315 = arith.constant 0.000000e+00 : f32
    %459 = vector.broadcast %cst_315 : f32 to vector<8x128xf32>
    %460 = arith.maximumf %458, %459 : vector<8x128xf32>
    %461 = vector.broadcast %9 : f32 to vector<8x128xf32>
    %462 = arith.minimumf %460, %461 : vector<8x128xf32>
    %c0_316 = arith.constant 0 : index
    %c3_317 = arith.constant 3 : index
    %c5_318 = arith.constant 5 : index
    %c0_319 = arith.constant 0 : index
    %c0_320 = arith.constant 0 : index
    %463 = vector.load %arg6[%c0_316, %c3_317, %c5_318, %c0_319, %c0_320] : memref<1x4x9x8x128xf32, #tpu.memory_space<vmem>>, vector<1x1x1x8x128xf32>
    %464 = vector.shape_cast %463 : vector<1x1x1x8x128xf32> to vector<8x128xf32>
    %465 = vector.shape_cast %462 : vector<8x128xf32> to vector<1x1x1x8x128xf32>
    tpu.vector_store %arg6[%c0_316, %c3_317, %c5_318, %c0_319, %c0_320], %465 {strides = array<i32>} : memref<1x4x9x8x128xf32, #tpu.memory_space<vmem>>, vector<1x1x1x8x128xf32>,
    %c0_321 = arith.constant 0 : index
    %c24 = arith.constant 24 : index
    %c0_322 = arith.constant 0 : index
    %c0_323 = arith.constant 0 : index
    %466 = vector.load %arg5[%c0_321, %c24, %c0_322, %c0_323] : memref<1x36x8x128xf32, #tpu.memory_space<vmem>>, vector<1x1x8x128xf32>
    %467 = vector.shape_cast %466 : vector<1x1x8x128xf32> to vector<8x128xf32>
    %c0_324 = arith.constant 0 : index
    %c25 = arith.constant 25 : index
    %c0_325 = arith.constant 0 : index
    %c0_326 = arith.constant 0 : index
    %468 = vector.load %arg5[%c0_324, %c25, %c0_325, %c0_326] : memref<1x36x8x128xf32, #tpu.memory_space<vmem>>, vector<1x1x8x128xf32>
    %469 = vector.shape_cast %468 : vector<1x1x8x128xf32> to vector<8x128xf32>
    %c0_327 = arith.constant 0 : index
    %c26 = arith.constant 26 : index
    %c0_328 = arith.constant 0 : index
    %c0_329 = arith.constant 0 : index
    %470 = vector.load %arg5[%c0_327, %c26, %c0_328, %c0_329] : memref<1x36x8x128xf32, #tpu.memory_space<vmem>>, vector<1x1x8x128xf32>
    %471 = vector.shape_cast %470 : vector<1x1x8x128xf32> to vector<8x128xf32>
    %c0_330 = arith.constant 0 : index
    %c27 = arith.constant 27 : index
    %c0_331 = arith.constant 0 : index
    %c0_332 = arith.constant 0 : index
    %472 = vector.load %arg5[%c0_330, %c27, %c0_331, %c0_332] : memref<1x36x8x128xf32, #tpu.memory_space<vmem>>, vector<1x1x8x128xf32>
    %473 = vector.shape_cast %472 : vector<1x1x8x128xf32> to vector<8x128xf32>
    %c6_333 = arith.constant 6 : index
    %c0_334 = arith.constant 0 : index
    %474 = memref.load %arg2[%c6_333, %c0_334] : memref<9x4xf32, #tpu.memory_space<smem>>
    %c6_335 = arith.constant 6 : index
    %c1_336 = arith.constant 1 : index
    %475 = memref.load %arg2[%c6_335, %c1_336] : memref<9x4xf32, #tpu.memory_space<smem>>
    %c6_337 = arith.constant 6 : index
    %c2_338 = arith.constant 2 : index
    %476 = memref.load %arg2[%c6_337, %c2_338] : memref<9x4xf32, #tpu.memory_space<smem>>
    %c6_339 = arith.constant 6 : index
    %c3_340 = arith.constant 3 : index
    %477 = memref.load %arg2[%c6_339, %c3_340] : memref<9x4xf32, #tpu.memory_space<smem>>
    %478 = arith.subf %476, %474 : f32
    %cst_341 = arith.constant 1.000000e+00 : f32
    %479 = arith.addf %478, %cst_341 : f32
    %480 = arith.subf %477, %475 : f32
    %cst_342 = arith.constant 1.000000e+00 : f32
    %481 = arith.addf %480, %cst_342 : f32
    %cst_343 = arith.constant 5.000000e-01 : f32
    %482 = arith.mulf %cst_343, %479 : f32
    %483 = arith.addf %474, %482 : f32
    %484 = vector.broadcast %483 : f32 to vector<8x128xf32>
    %485 = arith.addf %1, %484 : vector<8x128xf32>
    %cst_344 = arith.constant 5.000000e-01 : f32
    %486 = arith.mulf %cst_344, %481 : f32
    %487 = arith.addf %475, %486 : f32
    %488 = vector.broadcast %487 : f32 to vector<8x128xf32>
    %489 = arith.addf %3, %488 : vector<8x128xf32>
    %490 = vector.broadcast %479 : f32 to vector<8x128xf32>
    %491 = arith.mulf %467, %490 : vector<8x128xf32>
    %492 = arith.addf %491, %485 : vector<8x128xf32>
    %493 = vector.broadcast %481 : f32 to vector<8x128xf32>
    %494 = arith.mulf %469, %493 : vector<8x128xf32>
    %495 = arith.addf %494, %489 : vector<8x128xf32>
    %496 = math.exp %471 : vector<8x128xf32>
    %497 = vector.broadcast %479 : f32 to vector<8x128xf32>
    %498 = arith.mulf %496, %497 : vector<8x128xf32>
    %499 = math.exp %473 : vector<8x128xf32>
    %500 = vector.broadcast %481 : f32 to vector<8x128xf32>
    %501 = arith.mulf %499, %500 : vector<8x128xf32>
    %cst_345 = arith.constant 5.000000e-01 : f32
    %502 = vector.broadcast %cst_345 : f32 to vector<8x128xf32>
    %503 = arith.mulf %502, %498 : vector<8x128xf32>
    %504 = arith.subf %492, %503 : vector<8x128xf32>
    %cst_346 = arith.constant 0.000000e+00 : f32
    %505 = vector.broadcast %cst_346 : f32 to vector<8x128xf32>
    %506 = arith.maximumf %504, %505 : vector<8x128xf32>
    %507 = vector.broadcast %6 : f32 to vector<8x128xf32>
    %508 = arith.minimumf %506, %507 : vector<8x128xf32>
    %c0_347 = arith.constant 0 : index
    %c0_348 = arith.constant 0 : index
    %c6_349 = arith.constant 6 : index
    %c0_350 = arith.constant 0 : index
    %c0_351 = arith.constant 0 : index
    %509 = vector.load %arg6[%c0_347, %c0_348, %c6_349, %c0_350, %c0_351] : memref<1x4x9x8x128xf32, #tpu.memory_space<vmem>>, vector<1x1x1x8x128xf32>
    %510 = vector.shape_cast %509 : vector<1x1x1x8x128xf32> to vector<8x128xf32>
    %511 = vector.shape_cast %508 : vector<8x128xf32> to vector<1x1x1x8x128xf32>
    tpu.vector_store %arg6[%c0_347, %c0_348, %c6_349, %c0_350, %c0_351], %511 {strides = array<i32>} : memref<1x4x9x8x128xf32, #tpu.memory_space<vmem>>, vector<1x1x1x8x128xf32>,
    %cst_352 = arith.constant 5.000000e-01 : f32
    %512 = vector.broadcast %cst_352 : f32 to vector<8x128xf32>
    %513 = arith.mulf %512, %501 : vector<8x128xf32>
    %514 = arith.subf %495, %513 : vector<8x128xf32>
    %cst_353 = arith.constant 0.000000e+00 : f32
    %515 = vector.broadcast %cst_353 : f32 to vector<8x128xf32>
    %516 = arith.maximumf %514, %515 : vector<8x128xf32>
    %517 = vector.broadcast %9 : f32 to vector<8x128xf32>
    %518 = arith.minimumf %516, %517 : vector<8x128xf32>
    %c0_354 = arith.constant 0 : index
    %c1_355 = arith.constant 1 : index
    %c6_356 = arith.constant 6 : index
    %c0_357 = arith.constant 0 : index
    %c0_358 = arith.constant 0 : index
    %519 = vector.load %arg6[%c0_354, %c1_355, %c6_356, %c0_357, %c0_358] : memref<1x4x9x8x128xf32, #tpu.memory_space<vmem>>, vector<1x1x1x8x128xf32>
    %520 = vector.shape_cast %519 : vector<1x1x1x8x128xf32> to vector<8x128xf32>
    %521 = vector.shape_cast %518 : vector<8x128xf32> to vector<1x1x1x8x128xf32>
    tpu.vector_store %arg6[%c0_354, %c1_355, %c6_356, %c0_357, %c0_358], %521 {strides = array<i32>} : memref<1x4x9x8x128xf32, #tpu.memory_space<vmem>>, vector<1x1x1x8x128xf32>,
    %cst_359 = arith.constant 5.000000e-01 : f32
    %522 = vector.broadcast %cst_359 : f32 to vector<8x128xf32>
    %523 = arith.mulf %522, %498 : vector<8x128xf32>
    %524 = arith.addf %492, %523 : vector<8x128xf32>
    %cst_360 = arith.constant 0.000000e+00 : f32
    %525 = vector.broadcast %cst_360 : f32 to vector<8x128xf32>
    %526 = arith.maximumf %524, %525 : vector<8x128xf32>
    %527 = vector.broadcast %6 : f32 to vector<8x128xf32>
    %528 = arith.minimumf %526, %527 : vector<8x128xf32>
    %c0_361 = arith.constant 0 : index
    %c2_362 = arith.constant 2 : index
    %c6_363 = arith.constant 6 : index
    %c0_364 = arith.constant 0 : index
    %c0_365 = arith.constant 0 : index
    %529 = vector.load %arg6[%c0_361, %c2_362, %c6_363, %c0_364, %c0_365] : memref<1x4x9x8x128xf32, #tpu.memory_space<vmem>>, vector<1x1x1x8x128xf32>
    %530 = vector.shape_cast %529 : vector<1x1x1x8x128xf32> to vector<8x128xf32>
    %531 = vector.shape_cast %528 : vector<8x128xf32> to vector<1x1x1x8x128xf32>
    tpu.vector_store %arg6[%c0_361, %c2_362, %c6_363, %c0_364, %c0_365], %531 {strides = array<i32>} : memref<1x4x9x8x128xf32, #tpu.memory_space<vmem>>, vector<1x1x1x8x128xf32>,
    %cst_366 = arith.constant 5.000000e-01 : f32
    %532 = vector.broadcast %cst_366 : f32 to vector<8x128xf32>
    %533 = arith.mulf %532, %501 : vector<8x128xf32>
    %534 = arith.addf %495, %533 : vector<8x128xf32>
    %cst_367 = arith.constant 0.000000e+00 : f32
    %535 = vector.broadcast %cst_367 : f32 to vector<8x128xf32>
    %536 = arith.maximumf %534, %535 : vector<8x128xf32>
    %537 = vector.broadcast %9 : f32 to vector<8x128xf32>
    %538 = arith.minimumf %536, %537 : vector<8x128xf32>
    %c0_368 = arith.constant 0 : index
    %c3_369 = arith.constant 3 : index
    %c6_370 = arith.constant 6 : index
    %c0_371 = arith.constant 0 : index
    %c0_372 = arith.constant 0 : index
    %539 = vector.load %arg6[%c0_368, %c3_369, %c6_370, %c0_371, %c0_372] : memref<1x4x9x8x128xf32, #tpu.memory_space<vmem>>, vector<1x1x1x8x128xf32>
    %540 = vector.shape_cast %539 : vector<1x1x1x8x128xf32> to vector<8x128xf32>
    %541 = vector.shape_cast %538 : vector<8x128xf32> to vector<1x1x1x8x128xf32>
    tpu.vector_store %arg6[%c0_368, %c3_369, %c6_370, %c0_371, %c0_372], %541 {strides = array<i32>} : memref<1x4x9x8x128xf32, #tpu.memory_space<vmem>>, vector<1x1x1x8x128xf32>,
    %c0_373 = arith.constant 0 : index
    %c28 = arith.constant 28 : index
    %c0_374 = arith.constant 0 : index
    %c0_375 = arith.constant 0 : index
    %542 = vector.load %arg5[%c0_373, %c28, %c0_374, %c0_375] : memref<1x36x8x128xf32, #tpu.memory_space<vmem>>, vector<1x1x8x128xf32>
    %543 = vector.shape_cast %542 : vector<1x1x8x128xf32> to vector<8x128xf32>
    %c0_376 = arith.constant 0 : index
    %c29 = arith.constant 29 : index
    %c0_377 = arith.constant 0 : index
    %c0_378 = arith.constant 0 : index
    %544 = vector.load %arg5[%c0_376, %c29, %c0_377, %c0_378] : memref<1x36x8x128xf32, #tpu.memory_space<vmem>>, vector<1x1x8x128xf32>
    %545 = vector.shape_cast %544 : vector<1x1x8x128xf32> to vector<8x128xf32>
    %c0_379 = arith.constant 0 : index
    %c30 = arith.constant 30 : index
    %c0_380 = arith.constant 0 : index
    %c0_381 = arith.constant 0 : index
    %546 = vector.load %arg5[%c0_379, %c30, %c0_380, %c0_381] : memref<1x36x8x128xf32, #tpu.memory_space<vmem>>, vector<1x1x8x128xf32>
    %547 = vector.shape_cast %546 : vector<1x1x8x128xf32> to vector<8x128xf32>
    %c0_382 = arith.constant 0 : index
    %c31 = arith.constant 31 : index
    %c0_383 = arith.constant 0 : index
    %c0_384 = arith.constant 0 : index
    %548 = vector.load %arg5[%c0_382, %c31, %c0_383, %c0_384] : memref<1x36x8x128xf32, #tpu.memory_space<vmem>>, vector<1x1x8x128xf32>
    %549 = vector.shape_cast %548 : vector<1x1x8x128xf32> to vector<8x128xf32>
    %c7_385 = arith.constant 7 : index
    %c0_386 = arith.constant 0 : index
    %550 = memref.load %arg2[%c7_385, %c0_386] : memref<9x4xf32, #tpu.memory_space<smem>>
    %c7_387 = arith.constant 7 : index
    %c1_388 = arith.constant 1 : index
    %551 = memref.load %arg2[%c7_387, %c1_388] : memref<9x4xf32, #tpu.memory_space<smem>>
    %c7_389 = arith.constant 7 : index
    %c2_390 = arith.constant 2 : index
    %552 = memref.load %arg2[%c7_389, %c2_390] : memref<9x4xf32, #tpu.memory_space<smem>>
    %c7_391 = arith.constant 7 : index
    %c3_392 = arith.constant 3 : index
    %553 = memref.load %arg2[%c7_391, %c3_392] : memref<9x4xf32, #tpu.memory_space<smem>>
    %554 = arith.subf %552, %550 : f32
    %cst_393 = arith.constant 1.000000e+00 : f32
    %555 = arith.addf %554, %cst_393 : f32
    %556 = arith.subf %553, %551 : f32
    %cst_394 = arith.constant 1.000000e+00 : f32
    %557 = arith.addf %556, %cst_394 : f32
    %cst_395 = arith.constant 5.000000e-01 : f32
    %558 = arith.mulf %cst_395, %555 : f32
    %559 = arith.addf %550, %558 : f32
    %560 = vector.broadcast %559 : f32 to vector<8x128xf32>
    %561 = arith.addf %1, %560 : vector<8x128xf32>
    %cst_396 = arith.constant 5.000000e-01 : f32
    %562 = arith.mulf %cst_396, %557 : f32
    %563 = arith.addf %551, %562 : f32
    %564 = vector.broadcast %563 : f32 to vector<8x128xf32>
    %565 = arith.addf %3, %564 : vector<8x128xf32>
    %566 = vector.broadcast %555 : f32 to vector<8x128xf32>
    %567 = arith.mulf %543, %566 : vector<8x128xf32>
    %568 = arith.addf %567, %561 : vector<8x128xf32>
    %569 = vector.broadcast %557 : f32 to vector<8x128xf32>
    %570 = arith.mulf %545, %569 : vector<8x128xf32>
    %571 = arith.addf %570, %565 : vector<8x128xf32>
    %572 = math.exp %547 : vector<8x128xf32>
    %573 = vector.broadcast %555 : f32 to vector<8x128xf32>
    %574 = arith.mulf %572, %573 : vector<8x128xf32>
    %575 = math.exp %549 : vector<8x128xf32>
    %576 = vector.broadcast %557 : f32 to vector<8x128xf32>
    %577 = arith.mulf %575, %576 : vector<8x128xf32>
    %cst_397 = arith.constant 5.000000e-01 : f32
    %578 = vector.broadcast %cst_397 : f32 to vector<8x128xf32>
    %579 = arith.mulf %578, %574 : vector<8x128xf32>
    %580 = arith.subf %568, %579 : vector<8x128xf32>
    %cst_398 = arith.constant 0.000000e+00 : f32
    %581 = vector.broadcast %cst_398 : f32 to vector<8x128xf32>
    %582 = arith.maximumf %580, %581 : vector<8x128xf32>
    %583 = vector.broadcast %6 : f32 to vector<8x128xf32>
    %584 = arith.minimumf %582, %583 : vector<8x128xf32>
    %c0_399 = arith.constant 0 : index
    %c0_400 = arith.constant 0 : index
    %c7_401 = arith.constant 7 : index
    %c0_402 = arith.constant 0 : index
    %c0_403 = arith.constant 0 : index
    %585 = vector.load %arg6[%c0_399, %c0_400, %c7_401, %c0_402, %c0_403] : memref<1x4x9x8x128xf32, #tpu.memory_space<vmem>>, vector<1x1x1x8x128xf32>
    %586 = vector.shape_cast %585 : vector<1x1x1x8x128xf32> to vector<8x128xf32>
    %587 = vector.shape_cast %584 : vector<8x128xf32> to vector<1x1x1x8x128xf32>
    tpu.vector_store %arg6[%c0_399, %c0_400, %c7_401, %c0_402, %c0_403], %587 {strides = array<i32>} : memref<1x4x9x8x128xf32, #tpu.memory_space<vmem>>, vector<1x1x1x8x128xf32>,
    %cst_404 = arith.constant 5.000000e-01 : f32
    %588 = vector.broadcast %cst_404 : f32 to vector<8x128xf32>
    %589 = arith.mulf %588, %577 : vector<8x128xf32>
    %590 = arith.subf %571, %589 : vector<8x128xf32>
    %cst_405 = arith.constant 0.000000e+00 : f32
    %591 = vector.broadcast %cst_405 : f32 to vector<8x128xf32>
    %592 = arith.maximumf %590, %591 : vector<8x128xf32>
    %593 = vector.broadcast %9 : f32 to vector<8x128xf32>
    %594 = arith.minimumf %592, %593 : vector<8x128xf32>
    %c0_406 = arith.constant 0 : index
    %c1_407 = arith.constant 1 : index
    %c7_408 = arith.constant 7 : index
    %c0_409 = arith.constant 0 : index
    %c0_410 = arith.constant 0 : index
    %595 = vector.load %arg6[%c0_406, %c1_407, %c7_408, %c0_409, %c0_410] : memref<1x4x9x8x128xf32, #tpu.memory_space<vmem>>, vector<1x1x1x8x128xf32>
    %596 = vector.shape_cast %595 : vector<1x1x1x8x128xf32> to vector<8x128xf32>
    %597 = vector.shape_cast %594 : vector<8x128xf32> to vector<1x1x1x8x128xf32>
    tpu.vector_store %arg6[%c0_406, %c1_407, %c7_408, %c0_409, %c0_410], %597 {strides = array<i32>} : memref<1x4x9x8x128xf32, #tpu.memory_space<vmem>>, vector<1x1x1x8x128xf32>,
    %cst_411 = arith.constant 5.000000e-01 : f32
    %598 = vector.broadcast %cst_411 : f32 to vector<8x128xf32>
    %599 = arith.mulf %598, %574 : vector<8x128xf32>
    %600 = arith.addf %568, %599 : vector<8x128xf32>
    %cst_412 = arith.constant 0.000000e+00 : f32
    %601 = vector.broadcast %cst_412 : f32 to vector<8x128xf32>
    %602 = arith.maximumf %600, %601 : vector<8x128xf32>
    %603 = vector.broadcast %6 : f32 to vector<8x128xf32>
    %604 = arith.minimumf %602, %603 : vector<8x128xf32>
    %c0_413 = arith.constant 0 : index
    %c2_414 = arith.constant 2 : index
    %c7_415 = arith.constant 7 : index
    %c0_416 = arith.constant 0 : index
    %c0_417 = arith.constant 0 : index
    %605 = vector.load %arg6[%c0_413, %c2_414, %c7_415, %c0_416, %c0_417] : memref<1x4x9x8x128xf32, #tpu.memory_space<vmem>>, vector<1x1x1x8x128xf32>
    %606 = vector.shape_cast %605 : vector<1x1x1x8x128xf32> to vector<8x128xf32>
    %607 = vector.shape_cast %604 : vector<8x128xf32> to vector<1x1x1x8x128xf32>
    tpu.vector_store %arg6[%c0_413, %c2_414, %c7_415, %c0_416, %c0_417], %607 {strides = array<i32>} : memref<1x4x9x8x128xf32, #tpu.memory_space<vmem>>, vector<1x1x1x8x128xf32>,
    %cst_418 = arith.constant 5.000000e-01 : f32
    %608 = vector.broadcast %cst_418 : f32 to vector<8x128xf32>
    %609 = arith.mulf %608, %577 : vector<8x128xf32>
    %610 = arith.addf %571, %609 : vector<8x128xf32>
    %cst_419 = arith.constant 0.000000e+00 : f32
    %611 = vector.broadcast %cst_419 : f32 to vector<8x128xf32>
    %612 = arith.maximumf %610, %611 : vector<8x128xf32>
    %613 = vector.broadcast %9 : f32 to vector<8x128xf32>
    %614 = arith.minimumf %612, %613 : vector<8x128xf32>
    %c0_420 = arith.constant 0 : index
    %c3_421 = arith.constant 3 : index
    %c7_422 = arith.constant 7 : index
    %c0_423 = arith.constant 0 : index
    %c0_424 = arith.constant 0 : index
    %615 = vector.load %arg6[%c0_420, %c3_421, %c7_422, %c0_423, %c0_424] : memref<1x4x9x8x128xf32, #tpu.memory_space<vmem>>, vector<1x1x1x8x128xf32>
    %616 = vector.shape_cast %615 : vector<1x1x1x8x128xf32> to vector<8x128xf32>
    %617 = vector.shape_cast %614 : vector<8x128xf32> to vector<1x1x1x8x128xf32>
    tpu.vector_store %arg6[%c0_420, %c3_421, %c7_422, %c0_423, %c0_424], %617 {strides = array<i32>} : memref<1x4x9x8x128xf32, #tpu.memory_space<vmem>>, vector<1x1x1x8x128xf32>,
    %c0_425 = arith.constant 0 : index
    %c32 = arith.constant 32 : index
    %c0_426 = arith.constant 0 : index
    %c0_427 = arith.constant 0 : index
    %618 = vector.load %arg5[%c0_425, %c32, %c0_426, %c0_427] : memref<1x36x8x128xf32, #tpu.memory_space<vmem>>, vector<1x1x8x128xf32>
    %619 = vector.shape_cast %618 : vector<1x1x8x128xf32> to vector<8x128xf32>
    %c0_428 = arith.constant 0 : index
    %c33 = arith.constant 33 : index
    %c0_429 = arith.constant 0 : index
    %c0_430 = arith.constant 0 : index
    %620 = vector.load %arg5[%c0_428, %c33, %c0_429, %c0_430] : memref<1x36x8x128xf32, #tpu.memory_space<vmem>>, vector<1x1x8x128xf32>
    %621 = vector.shape_cast %620 : vector<1x1x8x128xf32> to vector<8x128xf32>
    %c0_431 = arith.constant 0 : index
    %c34 = arith.constant 34 : index
    %c0_432 = arith.constant 0 : index
    %c0_433 = arith.constant 0 : index
    %622 = vector.load %arg5[%c0_431, %c34, %c0_432, %c0_433] : memref<1x36x8x128xf32, #tpu.memory_space<vmem>>, vector<1x1x8x128xf32>
    %623 = vector.shape_cast %622 : vector<1x1x8x128xf32> to vector<8x128xf32>
    %c0_434 = arith.constant 0 : index
    %c35 = arith.constant 35 : index
    %c0_435 = arith.constant 0 : index
    %c0_436 = arith.constant 0 : index
    %624 = vector.load %arg5[%c0_434, %c35, %c0_435, %c0_436] : memref<1x36x8x128xf32, #tpu.memory_space<vmem>>, vector<1x1x8x128xf32>
    %625 = vector.shape_cast %624 : vector<1x1x8x128xf32> to vector<8x128xf32>
    %c8_437 = arith.constant 8 : index
    %c0_438 = arith.constant 0 : index
    %626 = memref.load %arg2[%c8_437, %c0_438] : memref<9x4xf32, #tpu.memory_space<smem>>
    %c8_439 = arith.constant 8 : index
    %c1_440 = arith.constant 1 : index
    %627 = memref.load %arg2[%c8_439, %c1_440] : memref<9x4xf32, #tpu.memory_space<smem>>
    %c8_441 = arith.constant 8 : index
    %c2_442 = arith.constant 2 : index
    %628 = memref.load %arg2[%c8_441, %c2_442] : memref<9x4xf32, #tpu.memory_space<smem>>
    %c8_443 = arith.constant 8 : index
    %c3_444 = arith.constant 3 : index
    %629 = memref.load %arg2[%c8_443, %c3_444] : memref<9x4xf32, #tpu.memory_space<smem>>
    %630 = arith.subf %628, %626 : f32
    %cst_445 = arith.constant 1.000000e+00 : f32
    %631 = arith.addf %630, %cst_445 : f32
    %632 = arith.subf %629, %627 : f32
    %cst_446 = arith.constant 1.000000e+00 : f32
    %633 = arith.addf %632, %cst_446 : f32
    %cst_447 = arith.constant 5.000000e-01 : f32
    %634 = arith.mulf %cst_447, %631 : f32
    %635 = arith.addf %626, %634 : f32
    %636 = vector.broadcast %635 : f32 to vector<8x128xf32>
    %637 = arith.addf %1, %636 : vector<8x128xf32>
    %cst_448 = arith.constant 5.000000e-01 : f32
    %638 = arith.mulf %cst_448, %633 : f32
    %639 = arith.addf %627, %638 : f32
    %640 = vector.broadcast %639 : f32 to vector<8x128xf32>
    %641 = arith.addf %3, %640 : vector<8x128xf32>
    %642 = vector.broadcast %631 : f32 to vector<8x128xf32>
    %643 = arith.mulf %619, %642 : vector<8x128xf32>
    %644 = arith.addf %643, %637 : vector<8x128xf32>
    %645 = vector.broadcast %633 : f32 to vector<8x128xf32>
    %646 = arith.mulf %621, %645 : vector<8x128xf32>
    %647 = arith.addf %646, %641 : vector<8x128xf32>
    %648 = math.exp %623 : vector<8x128xf32>
    %649 = vector.broadcast %631 : f32 to vector<8x128xf32>
    %650 = arith.mulf %648, %649 : vector<8x128xf32>
    %651 = math.exp %625 : vector<8x128xf32>
    %652 = vector.broadcast %633 : f32 to vector<8x128xf32>
    %653 = arith.mulf %651, %652 : vector<8x128xf32>
    %cst_449 = arith.constant 5.000000e-01 : f32
    %654 = vector.broadcast %cst_449 : f32 to vector<8x128xf32>
    %655 = arith.mulf %654, %650 : vector<8x128xf32>
    %656 = arith.subf %644, %655 : vector<8x128xf32>
    %cst_450 = arith.constant 0.000000e+00 : f32
    %657 = vector.broadcast %cst_450 : f32 to vector<8x128xf32>
    %658 = arith.maximumf %656, %657 : vector<8x128xf32>
    %659 = vector.broadcast %6 : f32 to vector<8x128xf32>
    %660 = arith.minimumf %658, %659 : vector<8x128xf32>
    %c0_451 = arith.constant 0 : index
    %c0_452 = arith.constant 0 : index
    %c8_453 = arith.constant 8 : index
    %c0_454 = arith.constant 0 : index
    %c0_455 = arith.constant 0 : index
    %661 = vector.load %arg6[%c0_451, %c0_452, %c8_453, %c0_454, %c0_455] : memref<1x4x9x8x128xf32, #tpu.memory_space<vmem>>, vector<1x1x1x8x128xf32>
    %662 = vector.shape_cast %661 : vector<1x1x1x8x128xf32> to vector<8x128xf32>
    %663 = vector.shape_cast %660 : vector<8x128xf32> to vector<1x1x1x8x128xf32>
    tpu.vector_store %arg6[%c0_451, %c0_452, %c8_453, %c0_454, %c0_455], %663 {strides = array<i32>} : memref<1x4x9x8x128xf32, #tpu.memory_space<vmem>>, vector<1x1x1x8x128xf32>,
    %cst_456 = arith.constant 5.000000e-01 : f32
    %664 = vector.broadcast %cst_456 : f32 to vector<8x128xf32>
    %665 = arith.mulf %664, %653 : vector<8x128xf32>
    %666 = arith.subf %647, %665 : vector<8x128xf32>
    %cst_457 = arith.constant 0.000000e+00 : f32
    %667 = vector.broadcast %cst_457 : f32 to vector<8x128xf32>
    %668 = arith.maximumf %666, %667 : vector<8x128xf32>
    %669 = vector.broadcast %9 : f32 to vector<8x128xf32>
    %670 = arith.minimumf %668, %669 : vector<8x128xf32>
    %c0_458 = arith.constant 0 : index
    %c1_459 = arith.constant 1 : index
    %c8_460 = arith.constant 8 : index
    %c0_461 = arith.constant 0 : index
    %c0_462 = arith.constant 0 : index
    %671 = vector.load %arg6[%c0_458, %c1_459, %c8_460, %c0_461, %c0_462] : memref<1x4x9x8x128xf32, #tpu.memory_space<vmem>>, vector<1x1x1x8x128xf32>
    %672 = vector.shape_cast %671 : vector<1x1x1x8x128xf32> to vector<8x128xf32>
    %673 = vector.shape_cast %670 : vector<8x128xf32> to vector<1x1x1x8x128xf32>
    tpu.vector_store %arg6[%c0_458, %c1_459, %c8_460, %c0_461, %c0_462], %673 {strides = array<i32>} : memref<1x4x9x8x128xf32, #tpu.memory_space<vmem>>, vector<1x1x1x8x128xf32>,
    %cst_463 = arith.constant 5.000000e-01 : f32
    %674 = vector.broadcast %cst_463 : f32 to vector<8x128xf32>
    %675 = arith.mulf %674, %650 : vector<8x128xf32>
    %676 = arith.addf %644, %675 : vector<8x128xf32>
    %cst_464 = arith.constant 0.000000e+00 : f32
    %677 = vector.broadcast %cst_464 : f32 to vector<8x128xf32>
    %678 = arith.maximumf %676, %677 : vector<8x128xf32>
    %679 = vector.broadcast %6 : f32 to vector<8x128xf32>
    %680 = arith.minimumf %678, %679 : vector<8x128xf32>
    %c0_465 = arith.constant 0 : index
    %c2_466 = arith.constant 2 : index
    %c8_467 = arith.constant 8 : index
    %c0_468 = arith.constant 0 : index
    %c0_469 = arith.constant 0 : index
    %681 = vector.load %arg6[%c0_465, %c2_466, %c8_467, %c0_468, %c0_469] : memref<1x4x9x8x128xf32, #tpu.memory_space<vmem>>, vector<1x1x1x8x128xf32>
    %682 = vector.shape_cast %681 : vector<1x1x1x8x128xf32> to vector<8x128xf32>
    %683 = vector.shape_cast %680 : vector<8x128xf32> to vector<1x1x1x8x128xf32>
    tpu.vector_store %arg6[%c0_465, %c2_466, %c8_467, %c0_468, %c0_469], %683 {strides = array<i32>} : memref<1x4x9x8x128xf32, #tpu.memory_space<vmem>>, vector<1x1x1x8x128xf32>,
    %cst_470 = arith.constant 5.000000e-01 : f32
    %684 = vector.broadcast %cst_470 : f32 to vector<8x128xf32>
    %685 = arith.mulf %684, %653 : vector<8x128xf32>
    %686 = arith.addf %647, %685 : vector<8x128xf32>
    %cst_471 = arith.constant 0.000000e+00 : f32
    %687 = vector.broadcast %cst_471 : f32 to vector<8x128xf32>
    %688 = arith.maximumf %686, %687 : vector<8x128xf32>
    %689 = vector.broadcast %9 : f32 to vector<8x128xf32>
    %690 = arith.minimumf %688, %689 : vector<8x128xf32>
    %c0_472 = arith.constant 0 : index
    %c3_473 = arith.constant 3 : index
    %c8_474 = arith.constant 8 : index
    %c0_475 = arith.constant 0 : index
    %c0_476 = arith.constant 0 : index
    %691 = vector.load %arg6[%c0_472, %c3_473, %c8_474, %c0_475, %c0_476] : memref<1x4x9x8x128xf32, #tpu.memory_space<vmem>>, vector<1x1x1x8x128xf32>
    %692 = vector.shape_cast %691 : vector<1x1x1x8x128xf32> to vector<8x128xf32>
    %693 = vector.shape_cast %690 : vector<8x128xf32> to vector<1x1x1x8x128xf32>
    tpu.vector_store %arg6[%c0_472, %c3_473, %c8_474, %c0_475, %c0_476], %693 {strides = array<i32>} : memref<1x4x9x8x128xf32, #tpu.memory_space<vmem>>, vector<1x1x1x8x128xf32>,
    return
  }
  func.func @transform_0(%arg0: i32, %arg1: i32) -> (i32, i32) {
    %c0_i32 = arith.constant 0 : i32
    %c0_i32_0 = arith.constant 0 : i32
    %c0_i32_1 = arith.constant 0 : i32
    return %c0_i32, %c0_i32_0 : i32, i32
  }
  func.func @transform_1(%arg0: i32, %arg1: i32) -> (i32, i32) {
    %c0_i32 = arith.constant 0 : i32
    %c0_i32_0 = arith.constant 0 : i32
    %c0_i32_1 = arith.constant 0 : i32
    return %c0_i32, %c0_i32_0 : i32, i32
  }
  func.func @transform_2(%arg0: i32, %arg1: i32) -> (i32, i32, i32) {
    %c0_i32 = arith.constant 0 : i32
    %c0_i32_0 = arith.constant 0 : i32
    %c0_i32_1 = arith.constant 0 : i32
    return %c0_i32, %arg1, %c0_i32_0 : i32, i32, i32
  }
  func.func @transform_3(%arg0: i32, %arg1: i32) -> (i32, i32, i32, i32) {
    %c0_i32 = arith.constant 0 : i32
    %c0_i32_0 = arith.constant 0 : i32
    %c0_i32_1 = arith.constant 0 : i32
    return %arg0, %c0_i32, %arg1, %c0_i32_0 : i32, i32, i32, i32
  }
  func.func @transform_4(%arg0: i32, %arg1: i32) -> (i32, i32, i32, i32, i32) {
    %c0_i32 = arith.constant 0 : i32
    %c0_i32_0 = arith.constant 0 : i32
    %c0_i32_1 = arith.constant 0 : i32
    %c0_i32_2 = arith.constant 0 : i32
    return %arg0, %c0_i32, %c0_i32_0, %arg1, %c0_i32_1 : i32, i32, i32, i32, i32
  }
}

module attributes {stable_mosaic.version = 11 : i64} {
  func.func @kernel(%arg0: i32, %arg1: memref<1x4x256xf32, #tpu.memory_space<vmem>>, %arg2: memref<1x256x4xf32, #tpu.memory_space<vmem>>, %arg3: memref<1x1x256xf32, #tpu.memory_space<vmem>>, %arg4: memref<256x256xf32, #tpu.memory_space<vmem>>) attributes {dimension_semantics = [#tpu.dimension_semantics<parallel>], iteration_bounds = array<i64: 2>, scalar_prefetch = 0 : i64, scratch_operands = 1 : i64, tpu.core_type = #tpu.core_type<tc>, window_params = [{transform_indices = @transform_0, window_bounds = array<i64: 1, 4, 256>}, {transform_indices = @transform_1, window_bounds = array<i64: 1, 256, 4>}, {transform_indices = @transform_2, window_bounds = array<i64: 1, 1, 256>}]} {
    %c0 = arith.constant 0 : index
    %c0_0 = arith.constant 0 : index
    %c0_1 = arith.constant 0 : index
    %0 = vector.load %arg1[%c0, %c0_0, %c0_1] : memref<1x4x256xf32, #tpu.memory_space<vmem>>, vector<1x4x256xf32>
    %1 = vector.shape_cast %0 : vector<1x4x256xf32> to vector<4x256xf32>
    %c0_2 = arith.constant 0 : index
    %c0_3 = arith.constant 0 : index
    %c0_4 = arith.constant 0 : index
    %2 = vector.load %arg2[%c0_2, %c0_3, %c0_4] : memref<1x256x4xf32, #tpu.memory_space<vmem>>, vector<1x256x4xf32>
    %3 = vector.shape_cast %2 : vector<1x256x4xf32> to vector<256x4xf32>
    %4 = vector.extract_strided_slice %1 {offsets = [0, 0], sizes = [1, 256], strides = [1, 1]} : vector<4x256xf32> to vector<1x256xf32>
    %5 = vector.extract_strided_slice %1 {offsets = [1, 0], sizes = [1, 256], strides = [1, 1]} : vector<4x256xf32> to vector<1x256xf32>
    %6 = vector.extract_strided_slice %1 {offsets = [2, 0], sizes = [1, 256], strides = [1, 1]} : vector<4x256xf32> to vector<1x256xf32>
    %7 = vector.extract_strided_slice %1 {offsets = [3, 0], sizes = [1, 256], strides = [1, 1]} : vector<4x256xf32> to vector<1x256xf32>
    %8 = vector.extract_strided_slice %3 {offsets = [0, 0], sizes = [256, 1], strides = [1, 1]} : vector<256x4xf32> to vector<256x1xf32>
    %9 = vector.extract_strided_slice %3 {offsets = [0, 1], sizes = [256, 1], strides = [1, 1]} : vector<256x4xf32> to vector<256x1xf32>
    %10 = vector.extract_strided_slice %3 {offsets = [0, 2], sizes = [256, 1], strides = [1, 1]} : vector<256x4xf32> to vector<256x1xf32>
    %11 = vector.extract_strided_slice %3 {offsets = [0, 3], sizes = [256, 1], strides = [1, 1]} : vector<256x4xf32> to vector<256x1xf32>
    %12 = arith.subf %6, %4 : vector<1x256xf32>
    %cst = arith.constant 1.000000e+00 : f32
    %13 = vector.broadcast %cst : f32 to vector<1x256xf32>
    %14 = arith.addf %12, %13 : vector<1x256xf32>
    %15 = arith.subf %7, %5 : vector<1x256xf32>
    %cst_5 = arith.constant 1.000000e+00 : f32
    %16 = vector.broadcast %cst_5 : f32 to vector<1x256xf32>
    %17 = arith.addf %15, %16 : vector<1x256xf32>
    %18 = arith.mulf %14, %17 : vector<1x256xf32>
    %19 = arith.subf %10, %8 : vector<256x1xf32>
    %cst_6 = arith.constant 1.000000e+00 : f32
    %20 = vector.broadcast %cst_6 : f32 to vector<256x1xf32>
    %21 = arith.addf %19, %20 : vector<256x1xf32>
    %22 = arith.subf %11, %9 : vector<256x1xf32>
    %cst_7 = arith.constant 1.000000e+00 : f32
    %23 = vector.broadcast %cst_7 : f32 to vector<256x1xf32>
    %24 = arith.addf %22, %23 : vector<256x1xf32>
    %25 = arith.mulf %21, %24 : vector<256x1xf32>
    %26 = vector.broadcast %8 : vector<256x1xf32> to vector<256x256xf32>
    %27 = vector.broadcast %4 : vector<1x256xf32> to vector<256x256xf32>
    %28 = arith.maximumf %26, %27 : vector<256x256xf32>
    %29 = vector.broadcast %9 : vector<256x1xf32> to vector<256x256xf32>
    %30 = vector.broadcast %5 : vector<1x256xf32> to vector<256x256xf32>
    %31 = arith.maximumf %29, %30 : vector<256x256xf32>
    %32 = vector.broadcast %10 : vector<256x1xf32> to vector<256x256xf32>
    %33 = vector.broadcast %6 : vector<1x256xf32> to vector<256x256xf32>
    %34 = arith.minimumf %32, %33 : vector<256x256xf32>
    %35 = vector.broadcast %11 : vector<256x1xf32> to vector<256x256xf32>
    %36 = vector.broadcast %7 : vector<1x256xf32> to vector<256x256xf32>
    %37 = arith.minimumf %35, %36 : vector<256x256xf32>
    %38 = arith.subf %34, %28 : vector<256x256xf32>
    %cst_8 = arith.constant 1.000000e+00 : f32
    %39 = vector.broadcast %cst_8 : f32 to vector<256x256xf32>
    %40 = arith.addf %38, %39 : vector<256x256xf32>
    %cst_9 = arith.constant 0.000000e+00 : f32
    %41 = vector.broadcast %cst_9 : f32 to vector<256x256xf32>
    %42 = arith.maximumf %40, %41 : vector<256x256xf32>
    %43 = arith.subf %37, %31 : vector<256x256xf32>
    %cst_10 = arith.constant 1.000000e+00 : f32
    %44 = vector.broadcast %cst_10 : f32 to vector<256x256xf32>
    %45 = arith.addf %43, %44 : vector<256x256xf32>
    %cst_11 = arith.constant 0.000000e+00 : f32
    %46 = vector.broadcast %cst_11 : f32 to vector<256x256xf32>
    %47 = arith.maximumf %45, %46 : vector<256x256xf32>
    %48 = arith.mulf %42, %47 : vector<256x256xf32>
    %49 = vector.broadcast %25 : vector<256x1xf32> to vector<256x256xf32>
    %50 = vector.broadcast %18 : vector<1x256xf32> to vector<256x256xf32>
    %51 = arith.addf %49, %50 : vector<256x256xf32>
    %52 = arith.subf %51, %48 : vector<256x256xf32>
    %53 = tpu.iota {dimensions = array<i32: 0>} : vector<256x256xi32>
    %54 = tpu.iota {dimensions = array<i32: 1>} : vector<256x256xi32>
    %cst_12 = arith.constant 0.699999988 : f32
    %55 = vector.broadcast %cst_12 : f32 to vector<256x256xf32>
    %56 = arith.mulf %55, %52 : vector<256x256xf32>
    %57 = arith.cmpf ogt, %48, %56 : vector<256x256xf32>
    %58 = arith.cmpi sgt, %54, %53 : vector<256x256xi32>
    %59 = arith.andi %57, %58 : vector<256x256xi1>
    %cst_13 = arith.constant 1.000000e+00 : f32
    %cst_14 = arith.constant 0.000000e+00 : f32
    %60 = vector.broadcast %cst_13 : f32 to vector<256x256xf32>
    %61 = vector.broadcast %cst_14 : f32 to vector<256x256xf32>
    %62 = arith.select %59, %60, %61 : vector<256x256xi1>, vector<256x256xf32>
    %c0_15 = arith.constant 0 : index
    %c0_16 = arith.constant 0 : index
    %63 = vector.load %arg4[%c0_15, %c0_16] : memref<256x256xf32, #tpu.memory_space<vmem>>, vector<256x256xf32>
    tpu.vector_store %arg4[%c0_15, %c0_16], %62 {strides = array<i32>} : memref<256x256xf32, #tpu.memory_space<vmem>>, vector<256x256xf32>,
    %64 = tpu.iota {dimensions = array<i32: 1>} : vector<1x256xi32>
    %cst_17 = arith.constant 1.000000e+00 : f32
    %65 = vector.broadcast %cst_17 : f32 to vector<1x256xf32>
    %c0_i32 = arith.constant 0 : i32
    %c32_i32 = arith.constant 32 : i32
    %66 = arith.addi %c0_i32, %c32_i32 : i32
    %c1_i32 = arith.constant 1 : i32
    %67 = scf.for %arg5 = %c0_i32 to %66 step %c1_i32 iter_args(%arg6 = %65) -> (vector<1x256xf32>)  : i32 {
      %c8_i32 = arith.constant 8 : i32
      %71 = arith.muli %arg5, %c8_i32 : i32
      %c0_i32_22 = arith.constant 0 : i32
      %72 = arith.addi %71, %c0_i32_22 : i32
      %73 = vector.broadcast %72 : i32 to vector<1x256xi32>
      %74 = arith.cmpi eq, %64, %73 : vector<1x256xi32>
      %cst_23 = arith.constant 0.000000e+00 : f32
      %75 = vector.broadcast %cst_23 : f32 to vector<1x256xf32>
      %76 = arith.select %74, %arg6, %75 : vector<1x256xi1>, vector<1x256xf32>
      %77 = vector.shape_cast %76 : vector<1x256xf32> to vector<1x1x256xf32>
      %cst_24 = arith.constant dense<0xFF800000> : vector<1xf32>
      %78 = vector.multi_reduction <maximumf>, %77, %cst_24 [1, 2] : vector<1x1x256xf32> to vector<1xf32>
      %79 = vector.shape_cast %78 : vector<1xf32> to vector<1x1x1xf32>
      %80 = vector.extract %79[0, 0, 0] : f32 from vector<1x1x1xf32>
      %81 = arith.index_cast %72 : i32 to index
      %c0_25 = arith.constant 0 : index
      %82 = vector.load %arg4[%81, %c0_25] : memref<256x256xf32, #tpu.memory_space<vmem>>, vector<1x256xf32>
      %83 = vector.broadcast %80 : f32 to vector<1x256xf32>
      %84 = arith.mulf %83, %82 : vector<1x256xf32>
      %cst_26 = arith.constant 1.000000e+00 : f32
      %85 = vector.broadcast %cst_26 : f32 to vector<1x256xf32>
      %86 = arith.subf %85, %84 : vector<1x256xf32>
      %87 = arith.mulf %arg6, %86 : vector<1x256xf32>
      %c8_i32_27 = arith.constant 8 : i32
      %88 = arith.muli %arg5, %c8_i32_27 : i32
      %c1_i32_28 = arith.constant 1 : i32
      %89 = arith.addi %88, %c1_i32_28 : i32
      %90 = vector.broadcast %89 : i32 to vector<1x256xi32>
      %91 = arith.cmpi eq, %64, %90 : vector<1x256xi32>
      %cst_29 = arith.constant 0.000000e+00 : f32
      %92 = vector.broadcast %cst_29 : f32 to vector<1x256xf32>
      %93 = arith.select %91, %87, %92 : vector<1x256xi1>, vector<1x256xf32>
      %94 = vector.shape_cast %93 : vector<1x256xf32> to vector<1x1x256xf32>
      %cst_30 = arith.constant dense<0xFF800000> : vector<1xf32>
      %95 = vector.multi_reduction <maximumf>, %94, %cst_30 [1, 2] : vector<1x1x256xf32> to vector<1xf32>
      %96 = vector.shape_cast %95 : vector<1xf32> to vector<1x1x1xf32>
      %97 = vector.extract %96[0, 0, 0] : f32 from vector<1x1x1xf32>
      %98 = arith.index_cast %89 : i32 to index
      %c0_31 = arith.constant 0 : index
      %99 = vector.load %arg4[%98, %c0_31] : memref<256x256xf32, #tpu.memory_space<vmem>>, vector<1x256xf32>
      %100 = vector.broadcast %97 : f32 to vector<1x256xf32>
      %101 = arith.mulf %100, %99 : vector<1x256xf32>
      %cst_32 = arith.constant 1.000000e+00 : f32
      %102 = vector.broadcast %cst_32 : f32 to vector<1x256xf32>
      %103 = arith.subf %102, %101 : vector<1x256xf32>
      %104 = arith.mulf %87, %103 : vector<1x256xf32>
      %c8_i32_33 = arith.constant 8 : i32
      %105 = arith.muli %arg5, %c8_i32_33 : i32
      %c2_i32 = arith.constant 2 : i32
      %106 = arith.addi %105, %c2_i32 : i32
      %107 = vector.broadcast %106 : i32 to vector<1x256xi32>
      %108 = arith.cmpi eq, %64, %107 : vector<1x256xi32>
      %cst_34 = arith.constant 0.000000e+00 : f32
      %109 = vector.broadcast %cst_34 : f32 to vector<1x256xf32>
      %110 = arith.select %108, %104, %109 : vector<1x256xi1>, vector<1x256xf32>
      %111 = vector.shape_cast %110 : vector<1x256xf32> to vector<1x1x256xf32>
      %cst_35 = arith.constant dense<0xFF800000> : vector<1xf32>
      %112 = vector.multi_reduction <maximumf>, %111, %cst_35 [1, 2] : vector<1x1x256xf32> to vector<1xf32>
      %113 = vector.shape_cast %112 : vector<1xf32> to vector<1x1x1xf32>
      %114 = vector.extract %113[0, 0, 0] : f32 from vector<1x1x1xf32>
      %115 = arith.index_cast %106 : i32 to index
      %c0_36 = arith.constant 0 : index
      %116 = vector.load %arg4[%115, %c0_36] : memref<256x256xf32, #tpu.memory_space<vmem>>, vector<1x256xf32>
      %117 = vector.broadcast %114 : f32 to vector<1x256xf32>
      %118 = arith.mulf %117, %116 : vector<1x256xf32>
      %cst_37 = arith.constant 1.000000e+00 : f32
      %119 = vector.broadcast %cst_37 : f32 to vector<1x256xf32>
      %120 = arith.subf %119, %118 : vector<1x256xf32>
      %121 = arith.mulf %104, %120 : vector<1x256xf32>
      %c8_i32_38 = arith.constant 8 : i32
      %122 = arith.muli %arg5, %c8_i32_38 : i32
      %c3_i32 = arith.constant 3 : i32
      %123 = arith.addi %122, %c3_i32 : i32
      %124 = vector.broadcast %123 : i32 to vector<1x256xi32>
      %125 = arith.cmpi eq, %64, %124 : vector<1x256xi32>
      %cst_39 = arith.constant 0.000000e+00 : f32
      %126 = vector.broadcast %cst_39 : f32 to vector<1x256xf32>
      %127 = arith.select %125, %121, %126 : vector<1x256xi1>, vector<1x256xf32>
      %128 = vector.shape_cast %127 : vector<1x256xf32> to vector<1x1x256xf32>
      %cst_40 = arith.constant dense<0xFF800000> : vector<1xf32>
      %129 = vector.multi_reduction <maximumf>, %128, %cst_40 [1, 2] : vector<1x1x256xf32> to vector<1xf32>
      %130 = vector.shape_cast %129 : vector<1xf32> to vector<1x1x1xf32>
      %131 = vector.extract %130[0, 0, 0] : f32 from vector<1x1x1xf32>
      %132 = arith.index_cast %123 : i32 to index
      %c0_41 = arith.constant 0 : index
      %133 = vector.load %arg4[%132, %c0_41] : memref<256x256xf32, #tpu.memory_space<vmem>>, vector<1x256xf32>
      %134 = vector.broadcast %131 : f32 to vector<1x256xf32>
      %135 = arith.mulf %134, %133 : vector<1x256xf32>
      %cst_42 = arith.constant 1.000000e+00 : f32
      %136 = vector.broadcast %cst_42 : f32 to vector<1x256xf32>
      %137 = arith.subf %136, %135 : vector<1x256xf32>
      %138 = arith.mulf %121, %137 : vector<1x256xf32>
      %c8_i32_43 = arith.constant 8 : i32
      %139 = arith.muli %arg5, %c8_i32_43 : i32
      %c4_i32 = arith.constant 4 : i32
      %140 = arith.addi %139, %c4_i32 : i32
      %141 = vector.broadcast %140 : i32 to vector<1x256xi32>
      %142 = arith.cmpi eq, %64, %141 : vector<1x256xi32>
      %cst_44 = arith.constant 0.000000e+00 : f32
      %143 = vector.broadcast %cst_44 : f32 to vector<1x256xf32>
      %144 = arith.select %142, %138, %143 : vector<1x256xi1>, vector<1x256xf32>
      %145 = vector.shape_cast %144 : vector<1x256xf32> to vector<1x1x256xf32>
      %cst_45 = arith.constant dense<0xFF800000> : vector<1xf32>
      %146 = vector.multi_reduction <maximumf>, %145, %cst_45 [1, 2] : vector<1x1x256xf32> to vector<1xf32>
      %147 = vector.shape_cast %146 : vector<1xf32> to vector<1x1x1xf32>
      %148 = vector.extract %147[0, 0, 0] : f32 from vector<1x1x1xf32>
      %149 = arith.index_cast %140 : i32 to index
      %c0_46 = arith.constant 0 : index
      %150 = vector.load %arg4[%149, %c0_46] : memref<256x256xf32, #tpu.memory_space<vmem>>, vector<1x256xf32>
      %151 = vector.broadcast %148 : f32 to vector<1x256xf32>
      %152 = arith.mulf %151, %150 : vector<1x256xf32>
      %cst_47 = arith.constant 1.000000e+00 : f32
      %153 = vector.broadcast %cst_47 : f32 to vector<1x256xf32>
      %154 = arith.subf %153, %152 : vector<1x256xf32>
      %155 = arith.mulf %138, %154 : vector<1x256xf32>
      %c8_i32_48 = arith.constant 8 : i32
      %156 = arith.muli %arg5, %c8_i32_48 : i32
      %c5_i32 = arith.constant 5 : i32
      %157 = arith.addi %156, %c5_i32 : i32
      %158 = vector.broadcast %157 : i32 to vector<1x256xi32>
      %159 = arith.cmpi eq, %64, %158 : vector<1x256xi32>
      %cst_49 = arith.constant 0.000000e+00 : f32
      %160 = vector.broadcast %cst_49 : f32 to vector<1x256xf32>
      %161 = arith.select %159, %155, %160 : vector<1x256xi1>, vector<1x256xf32>
      %162 = vector.shape_cast %161 : vector<1x256xf32> to vector<1x1x256xf32>
      %cst_50 = arith.constant dense<0xFF800000> : vector<1xf32>
      %163 = vector.multi_reduction <maximumf>, %162, %cst_50 [1, 2] : vector<1x1x256xf32> to vector<1xf32>
      %164 = vector.shape_cast %163 : vector<1xf32> to vector<1x1x1xf32>
      %165 = vector.extract %164[0, 0, 0] : f32 from vector<1x1x1xf32>
      %166 = arith.index_cast %157 : i32 to index
      %c0_51 = arith.constant 0 : index
      %167 = vector.load %arg4[%166, %c0_51] : memref<256x256xf32, #tpu.memory_space<vmem>>, vector<1x256xf32>
      %168 = vector.broadcast %165 : f32 to vector<1x256xf32>
      %169 = arith.mulf %168, %167 : vector<1x256xf32>
      %cst_52 = arith.constant 1.000000e+00 : f32
      %170 = vector.broadcast %cst_52 : f32 to vector<1x256xf32>
      %171 = arith.subf %170, %169 : vector<1x256xf32>
      %172 = arith.mulf %155, %171 : vector<1x256xf32>
      %c8_i32_53 = arith.constant 8 : i32
      %173 = arith.muli %arg5, %c8_i32_53 : i32
      %c6_i32 = arith.constant 6 : i32
      %174 = arith.addi %173, %c6_i32 : i32
      %175 = vector.broadcast %174 : i32 to vector<1x256xi32>
      %176 = arith.cmpi eq, %64, %175 : vector<1x256xi32>
      %cst_54 = arith.constant 0.000000e+00 : f32
      %177 = vector.broadcast %cst_54 : f32 to vector<1x256xf32>
      %178 = arith.select %176, %172, %177 : vector<1x256xi1>, vector<1x256xf32>
      %179 = vector.shape_cast %178 : vector<1x256xf32> to vector<1x1x256xf32>
      %cst_55 = arith.constant dense<0xFF800000> : vector<1xf32>
      %180 = vector.multi_reduction <maximumf>, %179, %cst_55 [1, 2] : vector<1x1x256xf32> to vector<1xf32>
      %181 = vector.shape_cast %180 : vector<1xf32> to vector<1x1x1xf32>
      %182 = vector.extract %181[0, 0, 0] : f32 from vector<1x1x1xf32>
      %183 = arith.index_cast %174 : i32 to index
      %c0_56 = arith.constant 0 : index
      %184 = vector.load %arg4[%183, %c0_56] : memref<256x256xf32, #tpu.memory_space<vmem>>, vector<1x256xf32>
      %185 = vector.broadcast %182 : f32 to vector<1x256xf32>
      %186 = arith.mulf %185, %184 : vector<1x256xf32>
      %cst_57 = arith.constant 1.000000e+00 : f32
      %187 = vector.broadcast %cst_57 : f32 to vector<1x256xf32>
      %188 = arith.subf %187, %186 : vector<1x256xf32>
      %189 = arith.mulf %172, %188 : vector<1x256xf32>
      %c8_i32_58 = arith.constant 8 : i32
      %190 = arith.muli %arg5, %c8_i32_58 : i32
      %c7_i32 = arith.constant 7 : i32
      %191 = arith.addi %190, %c7_i32 : i32
      %192 = vector.broadcast %191 : i32 to vector<1x256xi32>
      %193 = arith.cmpi eq, %64, %192 : vector<1x256xi32>
      %cst_59 = arith.constant 0.000000e+00 : f32
      %194 = vector.broadcast %cst_59 : f32 to vector<1x256xf32>
      %195 = arith.select %193, %189, %194 : vector<1x256xi1>, vector<1x256xf32>
      %196 = vector.shape_cast %195 : vector<1x256xf32> to vector<1x1x256xf32>
      %cst_60 = arith.constant dense<0xFF800000> : vector<1xf32>
      %197 = vector.multi_reduction <maximumf>, %196, %cst_60 [1, 2] : vector<1x1x256xf32> to vector<1xf32>
      %198 = vector.shape_cast %197 : vector<1xf32> to vector<1x1x1xf32>
      %199 = vector.extract %198[0, 0, 0] : f32 from vector<1x1x1xf32>
      %200 = arith.index_cast %191 : i32 to index
      %c0_61 = arith.constant 0 : index
      %201 = vector.load %arg4[%200, %c0_61] : memref<256x256xf32, #tpu.memory_space<vmem>>, vector<1x256xf32>
      %202 = vector.broadcast %199 : f32 to vector<1x256xf32>
      %203 = arith.mulf %202, %201 : vector<1x256xf32>
      %cst_62 = arith.constant 1.000000e+00 : f32
      %204 = vector.broadcast %cst_62 : f32 to vector<1x256xf32>
      %205 = arith.subf %204, %203 : vector<1x256xf32>
      %206 = arith.mulf %189, %205 : vector<1x256xf32>
      scf.yield %206 : vector<1x256xf32>
    }
    %c32_i32_18 = arith.constant 32 : i32
    %c0_19 = arith.constant 0 : index
    %c0_20 = arith.constant 0 : index
    %c0_21 = arith.constant 0 : index
    %68 = vector.load %arg3[%c0_19, %c0_20, %c0_21] : memref<1x1x256xf32, #tpu.memory_space<vmem>>, vector<1x1x256xf32>
    %69 = vector.shape_cast %68 : vector<1x1x256xf32> to vector<1x256xf32>
    %70 = vector.shape_cast %67 : vector<1x256xf32> to vector<1x1x256xf32>
    tpu.vector_store %arg3[%c0_19, %c0_20, %c0_21], %70 {strides = array<i32>} : memref<1x1x256xf32, #tpu.memory_space<vmem>>, vector<1x1x256xf32>,
    return
  }
  func.func @transform_0(%arg0: i32) -> (i32, i32, i32) {
    %c0_i32 = arith.constant 0 : i32
    %c0_i32_0 = arith.constant 0 : i32
    %c0_i32_1 = arith.constant 0 : i32
    return %arg0, %c0_i32, %c0_i32_0 : i32, i32, i32
  }
  func.func @transform_1(%arg0: i32) -> (i32, i32, i32) {
    %c0_i32 = arith.constant 0 : i32
    %c0_i32_0 = arith.constant 0 : i32
    %c0_i32_1 = arith.constant 0 : i32
    return %arg0, %c0_i32, %c0_i32_0 : i32, i32, i32
  }
  func.func @transform_2(%arg0: i32) -> (i32, i32, i32) {
    %c0_i32 = arith.constant 0 : i32
    %c0_i32_0 = arith.constant 0 : i32
    %c0_i32_1 = arith.constant 0 : i32
    return %arg0, %c0_i32, %c0_i32_0 : i32, i32, i32
  }
}

</mosaic_0001>

<bundles_post_ra>
// kernel: proposal_forward.2
= control target key start
LH: loop header
LB: loop body
LE: loop exit
PB: predicated region body
PF: predicated region fallthrough
CT: control target
= control target key end

     0   :  { %9 = vsyncpa [#allocation4], 0  ;;  %s1709_s0 = inlined_call_operand.vmem [shape: f32[9,4], index: 0, kind: input, shape index: {}]   ;;  %s1710_s1 = inlined_call_operand.hbm [shape: f32[2,3], index: 1, kind: input, shape index: {}]   ;;  %s1711_s2 = inlined_call_operand.vmem [shape: f32[2,8,128], index: 2, kind: input, shape index: {}]   ;;  %s1712_s3 = inlined_call_operand.vmem [shape: f32[2,36,8,128], index: 3, kind: input, shape index: {}]   ;;  %s1713_s4 = inlined_call_operand.vmem [shape: f32[2,4,9,8,128], index: 4, kind: output, shape index: {}]  }
   0x1   :  { %10 = vsyncpa [#allocation3], 0  ;;  %s1223_s15 = smov 0   ;;  %s1225_s16 = smov 0  }
   0x2   :  { %s1227_s17 = smov 0  }
   0x3 LB: > { %s927_s18 = sadd.s32 4294967295, %s1192_s17   ;;  %s28_s19 = sadd.s32 1, %s1188_s16  ;;  %s1192_s17 = sphi %s1227_s17, %s16_s17   ;;  %s1188_s16 = sphi %s1225_s16, %s1720_s16   ;;  %s1184_s15 = sphi %s1223_s15, %s1719_s15  }
   0x4   : > { %p30_p0 = scmp.ge.s32.totalorder %s28_s19, 2  ;;  %p929_p1 = scmp.ge.s32.totalorder %s1192_s17, 1 }
   0x5   : > { %p157_p2 = scmp.lt.s32.totalorder %s1192_s17, 3  ;;  %p1248_p4 = scmp.eq.s32.totalorder %s927_s18, 0 }
   0x6   : > { %s1722_s19 = smov (%p30_p0, %s28_s19), 0  ;;  %s169_s24 = sshll.u32 %s1709_s0, 4  ;;  %s170_s24 = int_to_ptr.vmem [resolvable:$true] %s169_s24 }
   0x7   : > { %p1244_p3 = pnand %p929_p1, %p157_p2  ;;  %s1134_s26 = scalar_lea.vmem %s170_s24, 256 }
   0x8   : > { %p1135_p7 = scmp.ne.s32.totalorder %s170_s24, %s1134_s26  ;;  %p1142_p11 = scmp.lt.s32.totalorder %s170_s24, %s170_s24 }
   0x9   : > { %p1059_p5 = pneg %p1244_p3  ;;  %p1143_p12 = scmp.lt.s32.totalorder %s1134_s26, %s1134_s26 }
   0xb   : > { %p1259_p6 = pnand %p1248_p4, %p1059_p5  ;;  %p1144_p13 = por %p1143_p12, %p1142_p11 }
   0xd   : > { %p1136_p8 = pneg %p1259_p6 }
   0xf   : > { %p1137_p9 = pnand %p1136_p8, %p1135_p7 }
  0x11   : > { %p1138_p10 = pneg %p1137_p9 }
  0x13   : > { %p1145_p0 = pnand %p1144_p13, %p1138_p10 }
  0x15   : > { %1148 = shalt.err (!%p1145_p0)
}
  0x16   : > { %s1194_s27 = smov [#allocation2]   ;;  %s1195_s28 = smov 128  }
  0x17   : > { %s1196_s29 = smov 8   ;;  %s1149_s6 = scalar_lea.hbm %s1710_s1, 32 }
  0x18   : > { %1062 = dma.vmem_to_smem (!%p1259_p6), %s170_s24, 256, %s1194_s27, [#allocation4], %s1195_s28, %s1195_s28, %s1196_s29  }
  0x19   : > { %p1150_p1 = scmp.ne.s32.totalorder %s1710_s1, %s1149_s6  ;;  %p1156_p7 = scmp.lt.u32.totalorder %s1149_s6, %s1710_s1 }
  0x1b   : > { %p1152_p2 = pnand %p1150_p1, %p1136_p8 }
  0x1d   : > { %p1153_p5 = pneg %p1152_p2 }
  0x1f   : > { %p1158_p9 = pnand %p1156_p7, %p1153_p5 }
  0x21   : > { %1161 = shalt.err (!%p1158_p9)
}
  0x22   : > { %s1197_s11 = smov [#allocation5]   ;;  %212 = sbr.rel (%p1244_p3) target bundleno = 137 (0x89), region = 36 }
  0x23   : > { %1065 = dma.hbm_to_smem (!%p1259_p6), %s1710_s1, 32, %s1197_s11, [#allocation3]  }
  0x29   : > { %1175 = dma.done.wait (%p1248_p4), [#allocation4], 256  }
  0x2a   : > { %1177 = vsyncadd (%p1248_p4), [#allocation4], 4294967040 }
  0x2b   : > { %1179 = dma.done.wait (%p1248_p4), [#allocation3], 32  }
  0x2c   : > { %1181 = vsyncadd (%p1248_p4), [#allocation3], 4294967264 }
  0x2d   : > { %222 = sfence }
  0x2e   : > { %p257_p6 = scmp.lt.s32.totalorder %s1184_s15, 1  ;;  %s940_s14 = sshll.u32 %s1184_s15, 7  ;;  %v1366_v17 = vld [vmem:[%s1711_s2] sm:$0xff]  ;;  %v1389_v30 = vld [vmem:[%s1711_s2 + $0x8] sm:$0xff] }
  0x2f   : > { %s277_s18 = sadd.s32 1, %s940_s14  ;;  %s1299_s20 = sld [smem:[#allocation2]] }
  0x30   : > { %s1724_s15 = smov (!%p257_p6, %s1184_s15), 1  ;;  %s1304_s22 = sld [smem:[#allocation5 + %s277_s18]] }
  0x31   : > { %s947_s23 = sld [smem:[#allocation2 + $0x2]]  ;;  %s1050_s21 = smul.u32 288, %s1724_s15 }
  0x32   : > { %s1307_s24 = sld [smem:[#allocation5 + %s940_s14]] }
  0x33   : > { %s1309_s25 = sld [smem:[#allocation2 + $0x1]]  ;;  %s1311_s26 = sld [smem:[#allocation2 + $0x3]] }
  0x34   : > { %s1318_s29 = scalar_lea.vmem %s1712_s3, %s1050_s21  ;;  %s1323_s30 = sld [smem:[#allocation2 + $0x80]] }
  0x35   : > { %v944_v0 = vld [vmem:[%s1318_s29 + $0x10] sm:$0xff]  ;;  %v945_v2 = vld [vmem:[%s1318_s29 + $0x18] sm:$0xff]  ;;  %s1326_s6 = sld [smem:[#allocation2 + $0x82]]  ;;  %s1330_s8 = sld [smem:[#allocation2 + $0x81]]  ;;  %v282_v12 = vld [vmem:[%s1318_s29] sm:$0xff] }
  0x36   : > { %v311_v1 = vmul.f32 1.442695, %v944_v0  ;;  %v954_v3 = vld [vmem:[%s1318_s29 + $0x30] sm:$0xff]  ;;  %v314_v4 = vmul.f32 1.442695, %v945_v2  ;;  %v955_v6 = vld [vmem:[%s1318_s29 + $0x38] sm:$0xff] }
  0x37   : > { %s293_s7 = ssub.f32 %s947_s23, %s1299_s20  ;;  %v370_v5 = vmul.f32 1.442695, %v954_v3  ;;  %s1333_s10 = sld [smem:[#allocation2 + $0x83]]  ;;  %v373_v7 = vmul.f32 1.442695, %v955_v6  ;;  %v966_v8 = vld [vmem:[%s1318_s29 + $0x50] sm:$0xff] }
  0x38   : > { %1098 = vpow2.f32 %v311_v1  ;;  %s1338_s12 = sld [smem:[#allocation2 + $0x100]]  ;;  %v428_v9 = vmul.f32 1.442695, %v966_v8  ;;  %s1342_s14 = sld [smem:[#allocation2 + $0x102]]  ;;  %v967_v10 = vld [vmem:[%s1318_s29 + $0x58] sm:$0xff]  ;;  %v978_v11 = vld [vmem:[%s1318_s29 + $0x70] sm:$0xff] }
  0x39   : > { %1100 = vpow2.f32 %v314_v4  ;;  %s1336_s11 = sadd.f32 1.0, %s293_s7  ;;  %s1349_s23 = sld [smem:[#allocation2 + $0x101]]  ;;  %v431_v14 = vmul.f32 1.442695, %v967_v10  ;;  %v486_v15 = vmul.f32 1.442695, %v978_v11 }
  0x3a   : > { %1102 = vpow2.f32 %v370_v5  ;;  %s295_s13 = ssub.f32 %s1311_s26, %s1309_s25  ;;  %s1353_s26 = sld [smem:[#allocation2 + $0x103]]  ;;  %v979_v16 = vld [vmem:[%s1318_s29 + $0x78] sm:$0xff]  ;;  %v990_v19 = vld [vmem:[%s1318_s29 + $0x90] sm:$0xff]  ;;  %v943_v21 = vld [vmem:[%s1318_s29 + $0x8] sm:$0xff] }
  0x3b   : > { %1104 = vpow2.f32 %v373_v7  ;;  %s297_s18 = smul.f32 0.5, %s1336_s11  ;;  %v305_v13 = vstv %s1336_s11  ;;  %s1361_s11 = scalar_lea.vmem %s1713_s4, %s1050_s21  ;;  %v489_v18 = vmul.f32 1.442695, %v979_v16  ;;  %v544_v23 = vmul.f32 1.442695, %v990_v19  ;;  %v991_v24 = vld [vmem:[%s1318_s29 + $0x98] sm:$0xff] }
  0x3c   : > { %s1351_s27 = sadd.f32 1.0, %s295_s13  ;;  %1106 = vpow2.f32 %v428_v9  ;;  %v306_v20 = vmul.f32 %v305_v13, %v282_v12  ;;  %s1378_s5 = sld [smem:[#allocation2 + $0x180]]  ;;  %v547_v26 = vmul.f32 1.442695, %v991_v24  ;;  %v1002_v27 = vld [vmem:[%s1318_s29 + $0xb0] sm:$0xff]  ;;  %v1003_v32 = vld [vmem:[%s1318_s29 + $0xb8] sm:$0xff] }
  0x3d   : > { %s298_s13 = sadd.f32 %s297_s18, %s1299_s20  ;;  %1108 = vpow2.f32 %v431_v14  ;;  %v602_v31 = vmul.f32 1.442695, %v1002_v27  ;;  %s1401_s7 = sld [smem:[#allocation2 + $0x181]]  ;;  %v605_v36 = vmul.f32 1.442695, %v1003_v32  ;;  %v952_v41 = vld [vmem:[%s1318_s29 + $0x20] sm:$0xff] }
  0x3e   : > { %s301_s15 = smul.f32 0.5, %s1351_s27  ;;  %v308_v22 = vstv %s1351_s27  ;;  %s352_s28 = ssub.f32 %s1326_s6, %s1323_s30  ;;  %1110 = vpow2.f32 %v486_v15  ;;  %v953_v46 = vld [vmem:[%s1318_s29 + $0x28] sm:$0xff]  ;;  %v1014_v0 = vld [vmem:[%s1318_s29 + $0xd0] sm:$0xff]  ;;  %v964_v10 = vld [vmem:[%s1318_s29 + $0x40] sm:$0xff] }
  0x3f   : > { %v299_v25 = vstv %s298_s13  ;;  %s354_s21 = ssub.f32 %s1333_s10, %s1330_s8  ;;  %s1392_s27 = sld [smem:[#allocation2 + $0x182]]  ;;  %1112 = vpow2.f32 %v489_v18  ;;  %v309_v34 = vmul.f32 %v943_v21, %v308_v22  ;;  %v660_v16 = vmul.f32 1.442695, %v1014_v0  ;;  %v965_v27 = vld [vmem:[%s1318_s29 + $0x48] sm:$0xff] }
  0x40   : > { %v300_v28 = vadd.f32 %v299_v25, %v1366_v17  ;;  %s1717_s20 = sadd.f32 -1.0, %s1304_s22  ;;  %1114 = vpow2.f32 %v544_v23  ;;  %s1415_s9 = sld [smem:[#allocation2 + $0x200]] }
  0x41   : > { %s302_s6 = sadd.f32 %s1309_s25, %s301_s15  ;;  %1116 = vpow2.f32 %v547_v26  ;;  %s1418_s18 = sld [smem:[#allocation2 + $0x202]] }
  0x42   : > { %v1384_v29 = vstv %s1717_s20  ;;  %v1099_v33 = vpop.eup %1098  ;;  %s1718_s10 = sadd.f32 -1.0, %s1307_s24  ;;  %v307_v38 = vadd.f32 %v306_v20, %v300_v28  ;;  %s1404_s24 = sld [smem:[#allocation2 + $0x183]]  ;;  %1118 = vpow2.f32 %v602_v31 }
  0x43   : > { %s1399_s22 = sadd.f32 1.0, %s352_s28  ;;  %v1101_v37 = vpop.eup %1100  ;;  %v313_v39 = vmul.f32 %v1099_v33, %v305_v13  ;;  %v303_v40 = vstv %s302_s6  ;;  %1120 = vpow2.f32 %v605_v36  ;;  %s1430_s6 = sld [smem:[#allocation2 + $0x203]] }
  0x44   : > { %v1397_v35 = vstv %s1718_s10  ;;  %s355_s25 = sadd.f32 1.0, %s354_s21  ;;  %v1103_v42 = vpop.eup %1102  ;;  %v304_v43 = vadd.f32 %v1389_v30, %v303_v40  ;;  %v316_v44 = vmul.f32 %v1101_v37, %v308_v22  ;;  %1122 = vpow2.f32 %v660_v16 }
  0x45   : > { %s356_s13 = smul.f32 0.5, %s1399_s22  ;;  %v364_v45 = vstv %s1399_s22  ;;  %s410_s15 = ssub.f32 %s1342_s14, %s1338_s12  ;;  %v1105_v47 = vpop.eup %1104  ;;  %v317_v48 = vmul.f32 0.5, %v313_v39 }
  0x46   : > { %v372_v49 = vmul.f32 %v1103_v42, %v364_v45  ;;  %s360_s28 = smul.f32 0.5, %s355_s25  ;;  %v367_v50 = vstv %s355_s25  ;;  %s412_s21 = ssub.f32 %s1353_s26, %s1349_s23  ;;  %v310_v51 = vadd.f32 %v309_v34, %v304_v43  ;;  %v323_v52 = vmul.f32 0.5, %v316_v44  ;;  %v1107_v59 = vpop.eup %1106 }
  0x47   : > { %s357_s20 = sadd.f32 %s1323_s30, %s356_s13  ;;  %v365_v53 = vmul.f32 %v952_v41, %v364_v45  ;;  %v375_v54 = vmul.f32 %v1105_v47, %v367_v50  ;;  %v318_v55 = vsub.f32 %v307_v38, %v317_v48  ;;  %v330_v56 = vadd.f32 %v317_v48, %v307_v38  ;;  %s1422_s30 = sld [smem:[#allocation2 + $0x201]]  ;;  %v1425_v1 = vpop.eup %1108 }
  0x48   : > { %v376_v57 = vmul.f32 0.5, %v372_v49  ;;  %s361_s14 = sadd.f32 %s1330_s8, %s360_s28  ;;  %v368_v58 = vmul.f32 %v953_v46, %v367_v50  ;;  %v324_v60 = vsub.f32 %v310_v51, %v323_v52  ;;  %v335_v61 = vadd.f32 %v323_v52, %v310_v51  ;;  %v1432_v6 = vpop.eup %1110  ;;  %s1452_s28 = sld [smem:[#allocation2 + $0x280]]  ;;  %v976_v50 = vld [vmem:[%s1318_s29 + $0x60] sm:$0xff] }
  0x49   : > { %v358_v62 = vstv %s357_s20  ;;  %v382_v63 = vmul.f32 0.5, %v375_v54  ;;  %s1420_s26 = sadd.f32 1.0, %s410_s15  ;;  %v319_v2 = vmax.f32 %v318_v55, 0.0  ;;  %v331_v3 = vmax.f32 %v330_v56, 0.0  ;;  %v1440_v12 = vpop.eup %1112  ;;  %s1461_s20 = sld [smem:[#allocation2 + $0x282]] }
  0x4a   : > { %v359_v4 = vadd.f32 %v358_v62, %v1366_v17  ;;  %v362_v5 = vstv %s361_s14  ;;  %s1428_s8 = sadd.f32 1.0, %s412_s21  ;;  %v325_v7 = vmax.f32 %v324_v60, 0.0  ;;  %v336_v8 = vmax.f32 %v335_v61, 0.0  ;;  %v1447_v18 = vpop.eup %1114 }
  0x4b   : > { %v363_v9 = vadd.f32 %v1389_v30, %v362_v5  ;;  %s414_s10 = smul.f32 0.5, %s1420_s26  ;;  %v422_v11 = vstv %s1420_s26  ;;  %s468_s22 = ssub.f32 %s1392_s27, %s1378_s5  ;;  %v321_v13 = vmin.f32 %v319_v2, %v1384_v29  ;;  %v332_v14 = vmin.f32 %v331_v3, %v1384_v29  ;;  %v1454_v23 = vpop.eup %1116 }
  0x4c   : > { %v366_v15 = vadd.f32 %v365_v53, %v359_v4  ;;  %s418_s25 = smul.f32 0.5, %s1428_s8  ;;  %s470_s13 = ssub.f32 %s1404_s24, %s1401_s7  ;;  %v327_v19 = vmin.f32 %v325_v7, %v1397_v35  ;;  %v337_v20 = vmin.f32 %v336_v8, %v1397_v35  ;;  %v430_v22 = vmul.f32 %v1107_v59, %v422_v11  ;;  %v1463_v31 = vpop.eup %1118  ;;  %v988_v7 = vld [vmem:[%s1318_s29 + $0x80] sm:$0xff] }
  0x4d   : > { %v369_v21 = vadd.f32 %v368_v58, %v363_v9  ;;  %s415_s15 = sadd.f32 %s1338_s12, %s414_s10  ;;  %322 = vst [vmem:[%s1361_s11] sm:$0xff] %v321_v13  ;;  %950 = vst [vmem:[%s1361_s11 + $0x90] sm:$0xff] %v332_v14  ;;  %v423_v26 = vmul.f32 %v964_v10, %v422_v11  ;;  %v425_v28 = vstv %s1428_s8  ;;  %v1474_v37 = vpop.eup %1120  ;;  %s1482_s27 = sld [smem:[#allocation2 + $0x283]]  ;;  %v977_v58 = vld [vmem:[%s1318_s29 + $0x68] sm:$0xff] }
  0x4e   : > { %v377_v24 = vsub.f32 %v366_v15, %v376_v57  ;;  %v388_v25 = vadd.f32 %v376_v57, %v366_v15  ;;  %s419_s21 = sadd.f32 %s1349_s23, %s418_s25  ;;  %949 = vst [vmem:[%s1361_s11 + $0x48] sm:$0xff] %v327_v19  ;;  %951 = vst [vmem:[%s1361_s11 + $0xd8] sm:$0xff] %v337_v20  ;;  %v434_v36 = vmul.f32 0.5, %v430_v22  ;;  %s1472_s23 = sld [smem:[#allocation2 + $0x281]]  ;;  %v426_v45 = vmul.f32 %v965_v27, %v425_v28  ;;  %v989_v27 = vld [vmem:[%s1318_s29 + $0x88] sm:$0xff] }
  0x4f   : > { %v383_v32 = vsub.f32 %v369_v21, %v382_v63  ;;  %v393_v33 = vadd.f32 %v382_v63, %v369_v21  ;;  %v416_v34 = vstv %s415_s15  ;;  %s1470_s12 = sadd.f32 1.0, %s468_s22  ;;  %v433_v49 = vmul.f32 %v1425_v1, %v425_v28  ;;  %s1499_s22 = sld [smem:[#allocation2 + $0x300]] }
  0x50   : > { %v378_v38 = vmax.f32 %v377_v24, 0.0  ;;  %v389_v39 = vmax.f32 %v388_v25, 0.0  ;;  %v417_v40 = vadd.f32 %v416_v34, %v1366_v17  ;;  %v420_v41 = vstv %s419_s21  ;;  %s1480_s14 = sadd.f32 1.0, %s470_s13  ;;  %s1515_s13 = sld [smem:[#allocation2 + $0x301]] }
  0x51   : > { %v384_v42 = vmax.f32 %v383_v32, 0.0  ;;  %v394_v43 = vmax.f32 %v393_v33, 0.0  ;;  %v421_v44 = vadd.f32 %v1389_v30, %v420_v41  ;;  %s472_s26 = smul.f32 0.5, %s1470_s12  ;;  %s526_s8 = ssub.f32 %s1418_s18, %s1415_s9  ;;  %v480_v54 = vstv %s1470_s12 }
  0x52   : > { %v379_v46 = vmin.f32 %v378_v38, %v1384_v29  ;;  %v390_v47 = vmin.f32 %v389_v39, %v1384_v29  ;;  %v424_v48 = vadd.f32 %v423_v26, %v417_v40  ;;  %s476_s24 = smul.f32 0.5, %s1480_s14  ;;  %s528_s10 = ssub.f32 %s1430_s6, %s1422_s30  ;;  %v440_v56 = vmul.f32 0.5, %v433_v49  ;;  %v1562_v40 = vpop.eup %1122 }
  0x53   : > { %v385_v51 = vmin.f32 %v384_v42, %v1397_v35  ;;  %v395_v52 = vmin.f32 %v394_v43, %v1397_v35  ;;  %v427_v53 = vadd.f32 %v426_v45, %v421_v44  ;;  %s473_s18 = sadd.f32 %s1378_s5, %s472_s26  ;;  %s1507_s6 = sld [smem:[#allocation2 + $0x302]]  ;;  %v481_v60 = vmul.f32 %v976_v50, %v480_v54  ;;  %v1000_v45 = vld [vmem:[%s1318_s29 + $0xa0] sm:$0xff] }
  0x54   : > { %960 = vst [vmem:[%s1361_s11 + $0x8] sm:$0xff] %v379_v46  ;;  %962 = vst [vmem:[%s1361_s11 + $0x98] sm:$0xff] %v390_v47  ;;  %v435_v55 = vsub.f32 %v424_v48, %v434_v36  ;;  %v446_v57 = vadd.f32 %v434_v36, %v424_v48  ;;  %s1505_s25 = sadd.f32 %s1401_s7, %s476_s24  ;;  %v488_v61 = vmul.f32 %v1432_v6, %v480_v54  ;;  %v483_v62 = vstv %s1480_s14  ;;  %s1519_s15 = sld [smem:[#allocation2 + $0x303]] }
  0x55   : > { %961 = vst [vmem:[%s1361_s11 + $0x50] sm:$0xff] %v385_v51  ;;  %963 = vst [vmem:[%s1361_s11 + $0xe0] sm:$0xff] %v395_v52  ;;  %v474_v59 = vstv %s473_s18  ;;  %s1513_s5 = sadd.f32 1.0, %s526_s8  ;;  %v441_v0 = vsub.f32 %v427_v53, %v440_v56  ;;  %v451_v2 = vadd.f32 %v440_v56, %v427_v53  ;;  %v484_v6 = vmul.f32 %v977_v58, %v483_v62  ;;  %s1549_s24 = sld [smem:[#allocation2 + $0x382]] }
  0x56   : > { %v436_v63 = vmax.f32 %v435_v55, 0.0  ;;  %v447_v1 = vmax.f32 %v446_v57, 0.0  ;;  %s1517_s7 = sadd.f32 1.0, %s528_s10  ;;  %v475_v3 = vadd.f32 %v474_v59, %v1366_v17  ;;  %v492_v4 = vmul.f32 0.5, %v488_v61  ;;  %s1557_s10 = sld [smem:[#allocation2 + $0x381]]  ;;  %v1001_v61 = vld [vmem:[%s1318_s29 + $0xa8] sm:$0xff] }
  0x57   : > { %v478_v5 = vstv %s1505_s25  ;;  %s530_s21 = smul.f32 0.5, %s1513_s5  ;;  %s584_s12 = ssub.f32 %s1461_s20, %s1452_s28  ;;  %v442_v9 = vmax.f32 %v441_v0, 0.0  ;;  %v452_v11 = vmax.f32 %v451_v2, 0.0  ;;  %v491_v15 = vmul.f32 %v1440_v12, %v483_v62 }
  0x58   : > { %v437_v8 = vmin.f32 %v436_v63, %v1384_v29  ;;  %v448_v10 = vmin.f32 %v447_v1, %v1384_v29  ;;  %s534_s14 = smul.f32 0.5, %s1517_s7  ;;  %s586_s26 = ssub.f32 %s1482_s27, %s1472_s23  ;;  %v482_v13 = vadd.f32 %v481_v60, %v475_v3  ;;  %v479_v14 = vadd.f32 %v1389_v30, %v478_v5 }
  0x59   : > { %s1535_s8 = sadd.f32 %s1415_s9, %s530_s21  ;;  %v538_v16 = vstv %s1513_s5  ;;  %v443_v19 = vmin.f32 %v442_v9, %v1397_v35  ;;  %v453_v20 = vmin.f32 %v452_v11, %v1397_v35  ;;  %s1544_s27 = sld [smem:[#allocation2 + $0x380]]  ;;  %v498_v25 = vmul.f32 0.5, %v491_v15  ;;  %v1015_v9 = vld [vmem:[%s1318_s29 + $0xd8] sm:$0xff] }
  0x5a   : > { %972 = vst [vmem:[%s1361_s11 + $0x10] sm:$0xff] %v437_v8  ;;  %974 = vst [vmem:[%s1361_s11 + $0xa0] sm:$0xff] %v448_v10  ;;  %v539_v21 = vmul.f32 %v988_v7, %v538_v16  ;;  %v546_v22 = vmul.f32 %v1447_v18, %v538_v16  ;;  %s535_s20 = sadd.f32 %s1422_s30, %s534_s14  ;;  %v493_v12 = vsub.f32 %v482_v13, %v492_v4  ;;  %v541_v33 = vstv %s1517_s7  ;;  %s1574_s21 = sld [smem:[#allocation2 + $0x383]] }
  0x5b   : > { %v485_v24 = vadd.f32 %v484_v6, %v479_v14  ;;  %v504_v26 = vadd.f32 %v492_v4, %v482_v13  ;;  %s1547_s9 = sadd.f32 1.0, %s584_s12  ;;  %973 = vst [vmem:[%s1361_s11 + $0x58] sm:$0xff] %v443_v19  ;;  %975 = vst [vmem:[%s1361_s11 + $0xe8] sm:$0xff] %v453_v20  ;;  %v532_v28 = vstv %s1535_s8  ;;  %v542_v43 = vmul.f32 %v989_v27, %v541_v33  ;;  %s1580_s14 = sld [smem:[#allocation2 + $0x400]] }
  0x5c   : > { %v550_v32 = vmul.f32 0.5, %v546_v22  ;;  %v536_v18 = vstv %s535_s20  ;;  %s1555_s30 = sadd.f32 1.0, %s586_s26  ;;  %v494_v34 = vmax.f32 %v493_v12, 0.0  ;;  %v533_v41 = vadd.f32 %v532_v28, %v1366_v17  ;;  %s1593_s26 = sld [smem:[#allocation2 + $0x401]] }
  0x5d   : > { %v499_v36 = vsub.f32 %v485_v24, %v498_v25  ;;  %v505_v38 = vmax.f32 %v504_v26, 0.0  ;;  %v509_v39 = vadd.f32 %v498_v25, %v485_v24  ;;  %s588_s18 = smul.f32 0.5, %s1547_s9  ;;  %s642_s25 = ssub.f32 %s1507_s6, %s1499_s22  ;;  %v537_v42 = vadd.f32 %v1389_v30, %v536_v18 }
  0x5e   : > { %v549_v44 = vmul.f32 %v1454_v23, %v541_v33  ;;  %s592_s5 = smul.f32 0.5, %s1555_s30  ;;  %s644_s7 = ssub.f32 %s1519_s15, %s1515_s13  ;;  %v495_v46 = vmin.f32 %v494_v34, %v1384_v29  ;;  %v540_v50 = vadd.f32 %v539_v21, %v533_v41  ;;  %v596_v53 = vstv %s1547_s9  ;;  %v1012_v21 = vld [vmem:[%s1318_s29 + $0xc0] sm:$0xff]  ;;  %v1026_v41 = vld [vmem:[%s1318_s29 + $0xf0] sm:$0xff] }
  0x5f   : > { %v500_v47 = vmax.f32 %v499_v36, 0.0  ;;  %v506_v48 = vmin.f32 %v505_v38, %v1384_v29  ;;  %v510_v49 = vmax.f32 %v509_v39, 0.0  ;;  %s589_s6 = sadd.f32 %s1452_s28, %s588_s18  ;;  %v543_v51 = vadd.f32 %v542_v43, %v537_v42  ;;  %s1588_s15 = sld [smem:[#allocation2 + $0x402]] }
  0x60   : > { %v556_v52 = vmul.f32 0.5, %v549_v44  ;;  %s1578_s12 = sadd.f32 %s1472_s23, %s592_s5  ;;  %984 = vst [vmem:[%s1361_s11 + $0x18] sm:$0xff] %v495_v46  ;;  %v597_v56 = vmul.f32 %v1000_v45, %v596_v53  ;;  %v551_v57 = vsub.f32 %v540_v50, %v550_v32  ;;  %v562_v59 = vadd.f32 %v550_v32, %v540_v50  ;;  %s1602_s20 = sld [smem:[#allocation2 + $0x403]]  ;;  %v1027_v46 = vld [vmem:[%s1318_s29 + $0xf8] sm:$0xff] }
  0x61   : > { %v501_v23 = vmin.f32 %v500_v47, %v1397_v35  ;;  %986 = vst [vmem:[%s1361_s11 + $0xa8] sm:$0xff] %v506_v48  ;;  %v511_v54 = vmin.f32 %v510_v49, %v1397_v35  ;;  %v590_v55 = vstv %s589_s6  ;;  %s1586_s28 = sadd.f32 1.0, %s642_s25  ;;  %v604_v63 = vmul.f32 %v1463_v31, %v596_v53  ;;  %v1013_v49 = vld [vmem:[%s1318_s29 + $0xc8] sm:$0xff] }
  0x62   : > { %v557_v58 = vsub.f32 %v543_v51, %v556_v52  ;;  %v567_v60 = vadd.f32 %v556_v52, %v543_v51  ;;  %s1591_s23 = sadd.f32 1.0, %s644_s7  ;;  %v591_v62 = vadd.f32 %v590_v55, %v1366_v17  ;;  %v594_v0 = vstv %s1578_s12 }
  0x63   : > { %985 = vst [vmem:[%s1361_s11 + $0x60] sm:$0xff] %v501_v23  ;;  %987 = vst [vmem:[%s1361_s11 + $0xf0] sm:$0xff] %v511_v54  ;;  %v599_v1 = vstv %s1555_s30  ;;  %s646_s8 = smul.f32 0.5, %s1586_s28  ;;  %v552_v2 = vmax.f32 %v551_v57, 0.0  ;;  %v563_v4 = vmax.f32 %v562_v59, 0.0  ;;  %s700_s18 = ssub.f32 %s1549_s24, %s1544_s27  ;;  %v608_v7 = vmul.f32 0.5, %v604_v63 }
  0x64   : > { %v558_v3 = vmax.f32 %v557_v58, 0.0  ;;  %v568_v5 = vmax.f32 %v567_v60, 0.0  ;;  %s650_s9 = smul.f32 0.5, %s1591_s23  ;;  %v598_v6 = vadd.f32 %v597_v56, %v591_v62  ;;  %v595_v31 = vadd.f32 %v1389_v30, %v594_v0  ;;  %s702_s24 = ssub.f32 %s1574_s21, %s1557_s10  ;;  %v1038_v23 = vld [vmem:[%s1318_s29 + $0x110] sm:$0xff]  ;;  %v1039_v59 = vld [vmem:[%s1318_s29 + $0x118] sm:$0xff] }
  0x65   : > { %v600_v8 = vmul.f32 %v1001_v61, %v599_v1  ;;  %s647_s30 = sadd.f32 %s1499_s22, %s646_s8  ;;  %v553_v10 = vmin.f32 %v552_v2, %v1384_v29  ;;  %v564_v13 = vmin.f32 %v563_v4, %v1384_v29  ;;  %v607_v19 = vmul.f32 %v1474_v37, %v599_v1  ;;  %v1024_v61 = vld [vmem:[%s1318_s29 + $0xe0] sm:$0xff]  ;;  %v1025_v4 = vld [vmem:[%s1318_s29 + $0xe8] sm:$0xff] }
  0x66   : > { %v559_v11 = vmin.f32 %v558_v3, %v1397_v35  ;;  %v569_v14 = vmin.f32 %v568_v5, %v1397_v35  ;;  %v609_v15 = vsub.f32 %v598_v6, %v608_v7  ;;  %v620_v20 = vadd.f32 %v608_v7, %v598_v6  ;;  %s1624_s22 = sadd.f32 %s1515_s13, %s650_s9 }
  0x67   : > { %v601_v16 = vadd.f32 %v600_v8, %v595_v31  ;;  %996 = vst [vmem:[%s1361_s11 + $0x20] sm:$0xff] %v553_v10  ;;  %998 = vst [vmem:[%s1361_s11 + $0xb0] sm:$0xff] %v564_v13  ;;  %v648_v22 = vstv %s647_s30  ;;  %v654_v12 = vstv %s1586_s28  ;;  %v663_v24 = vmul.f32 1.442695, %v1015_v9  ;;  %s1627_s25 = sadd.f32 1.0, %s700_s18 }
  0x68   : > { %997 = vst [vmem:[%s1361_s11 + $0x68] sm:$0xff] %v559_v11  ;;  %999 = vst [vmem:[%s1361_s11 + $0xf8] sm:$0xff] %v569_v14  ;;  %v610_v25 = vmax.f32 %v609_v15, 0.0  ;;  %v614_v26 = vmul.f32 0.5, %v607_v19  ;;  %v621_v37 = vmax.f32 %v620_v20, 0.0  ;;  %v649_v27 = vadd.f32 %v648_v22, %v1366_v17  ;;  %s758_s5 = ssub.f32 %s1588_s15, %s1580_s14  ;;  %v1036_v11 = vld [vmem:[%s1318_s29 + $0x100] sm:$0xff] }
  0x69   : > { %v655_v28 = vmul.f32 %v1012_v21, %v654_v12  ;;  %v662_v32 = vmul.f32 %v1562_v40, %v654_v12  ;;  %s1634_s13 = sadd.f32 1.0, %s702_s24  ;;  %1124 = vpow2.f32 %v663_v24  ;;  %s704_s6 = smul.f32 0.5, %s1627_s25  ;;  %v652_v44 = vstv %s1624_s22  ;;  %v1037_v22 = vld [vmem:[%s1318_s29 + $0x108] sm:$0xff] }
  0x6a   : > { %v611_v18 = vmin.f32 %v610_v25, %v1384_v29  ;;  %v615_v33 = vsub.f32 %v601_v16, %v614_v26  ;;  %v622_v34 = vmin.f32 %v621_v37, %v1384_v29  ;;  %v625_v36 = vadd.f32 %v614_v26, %v601_v16  ;;  %s760_s7 = ssub.f32 %s1602_s20, %s1593_s26 }
  0x6b   : > { %v656_v38 = vadd.f32 %v655_v28, %v649_v27  ;;  %v666_v39 = vmul.f32 0.5, %v662_v32  ;;  %s1644_s21 = sadd.f32 1.0, %s758_s5  ;;  %v657_v50 = vstv %s1591_s23  ;;  %v718_v51 = vmul.f32 1.442695, %v1026_v41  ;;  %s708_s12 = smul.f32 0.5, %s1634_s13 }
  0x6c   : > { %1008 = vst [vmem:[%s1361_s11 + $0x28] sm:$0xff] %v611_v18  ;;  %v616_v40 = vmax.f32 %v615_v33, 0.0  ;;  %1010 = vst [vmem:[%s1361_s11 + $0xb8] sm:$0xff] %v622_v34  ;;  %v626_v42 = vmax.f32 %v625_v36, 0.0  ;;  %s1652_s28 = sadd.f32 1.0, %s760_s7  ;;  %v653_v56 = vadd.f32 %v1389_v30, %v652_v44  ;;  %v658_v57 = vmul.f32 %v1013_v49, %v657_v50 }
  0x6d   : > { %v667_v43 = vsub.f32 %v656_v38, %v666_v39  ;;  %v678_v45 = vadd.f32 %v666_v39, %v656_v38  ;;  %s705_s15 = sadd.f32 %s1544_s27, %s704_s6  ;;  %1126 = vpow2.f32 %v718_v51  ;;  %v721_v54 = vmul.f32 1.442695, %v1027_v46  ;;  %s762_s23 = smul.f32 0.5, %s1644_s21 }
  0x6e   : > { %v617_v47 = vmin.f32 %v616_v40, %v1397_v35  ;;  %v627_v48 = vmin.f32 %v626_v42, %v1397_v35  ;;  %s709_s8 = sadd.f32 %s1557_s10, %s708_s12  ;;  %v776_v60 = vmul.f32 1.442695, %v1038_v23  ;;  %s766_s27 = smul.f32 0.5, %s1652_s28  ;;  %v712_v63 = vstv %s1627_s25 }
  0x6f   : > { %v668_v52 = vmax.f32 %v667_v43, 0.0  ;;  %v679_v53 = vmax.f32 %v678_v45, 0.0  ;;  %1128 = vpow2.f32 %v721_v54  ;;  %v706_v62 = vstv %s705_s15  ;;  %s763_s20 = sadd.f32 %s1580_s14, %s762_s23 }
  0x70   : > { %1009 = vst [vmem:[%s1361_s11 + $0x70] sm:$0xff] %v617_v47  ;;  %1011 = vst [vmem:[%s1361_s11 + $0x100] sm:$0xff] %v627_v48  ;;  %1130 = vpow2.f32 %v776_v60  ;;  %v779_v0 = vmul.f32 1.442695, %v1039_v59  ;;  %v659_v2 = vadd.f32 %v658_v57, %v653_v56  ;;  %v710_v5 = vstv %s709_s8  ;;  %s767_s10 = sadd.f32 %s1593_s26, %s766_s27 }
  0x71   : > { %v669_v55 = vmin.f32 %v668_v52, %v1384_v29  ;;  %v680_v58 = vmin.f32 %v679_v53, %v1384_v29  ;;  %v715_v6 = vstv %s1634_s13  ;;  %v707_v7 = vadd.f32 %v706_v62, %v1366_v17 }
  0x72   : > { %1132 = vpow2.f32 %v779_v0  ;;  %v713_v31 = vmul.f32 %v1024_v61, %v712_v63  ;;  %v711_v9 = vadd.f32 %v1389_v30, %v710_v5  ;;  %v716_v10 = vmul.f32 %v1025_v4, %v715_v6 }
  0x73   : > { %1020 = vst [vmem:[%s1361_s11 + $0x30] sm:$0xff] %v669_v55  ;;  %1022 = vst [vmem:[%s1361_s11 + $0xc0] sm:$0xff] %v680_v58  ;;  %v1125_v1 = vpop.eup %1124  ;;  %v764_v13 = vstv %s763_s20  ;;  %v770_v14 = vstv %s1644_s21 }
  0x74   : > { %v665_v3 = vmul.f32 %v1125_v1, %v657_v50  ;;  %v714_v20 = vadd.f32 %v713_v31, %v707_v7  ;;  %v768_v12 = vstv %s767_s10  ;;  %v773_v24 = vstv %s1652_s28 }
  0x75   : > { %v765_v27 = vadd.f32 %v764_v13, %v1366_v17  ;;  %v771_v28 = vmul.f32 %v1036_v11, %v770_v14  ;;  %v717_v18 = vadd.f32 %v716_v10, %v711_v9  ;;  %v769_v39 = vadd.f32 %v1389_v30, %v768_v12 }
  0x76   : > { %v672_v8 = vmul.f32 0.5, %v665_v3  ;;  %v774_v41 = vmul.f32 %v1037_v22, %v773_v24 }
  0x77   : > { %v1127_v15 = vpop.eup %1126  ;;  %v772_v17 = vadd.f32 %v771_v28, %v765_v27 }
  0x78   : > { %v673_v16 = vsub.f32 %v659_v2, %v672_v8  ;;  %v683_v19 = vadd.f32 %v672_v8, %v659_v2  ;;  %v720_v21 = vmul.f32 %v1127_v15, %v712_v63  ;;  %v775_v51 = vadd.f32 %v774_v41, %v769_v39 }
  0x79   : > { %v1129_v25 = vpop.eup %1128 }
  0x7a   : > { %v674_v26 = vmax.f32 %v673_v16, 0.0  ;;  %v684_v37 = vmax.f32 %v683_v19, 0.0  ;;  %v724_v32 = vmul.f32 0.5, %v720_v21  ;;  %v723_v33 = vmul.f32 %v1129_v25, %v715_v6  ;;  %v1131_v34 = vpop.eup %1130 }
  0x7b   : > { %v778_v44 = vmul.f32 %v1131_v34, %v770_v14 }
  0x7c   : > { %v675_v36 = vmin.f32 %v674_v26, %v1397_v35  ;;  %v685_v38 = vmin.f32 %v684_v37, %v1397_v35  ;;  %v725_v40 = vsub.f32 %v714_v20, %v724_v32  ;;  %v730_v42 = vmul.f32 0.5, %v723_v33  ;;  %v1133_v45 = vpop.eup %1132 }
  0x7d   : > { %v736_v43 = vadd.f32 %v724_v32, %v714_v20  ;;  %v782_v50 = vmul.f32 0.5, %v778_v44  ;;  %v781_v52 = vmul.f32 %v1133_v45, %v773_v24 }
  0x7e   : > { %1021 = vst [vmem:[%s1361_s11 + $0x78] sm:$0xff] %v675_v36  ;;  %1023 = vst [vmem:[%s1361_s11 + $0x108] sm:$0xff] %v685_v38  ;;  %v726_v46 = vmax.f32 %v725_v40, 0.0  ;;  %v731_v47 = vsub.f32 %v717_v18, %v730_v42  ;;  %v741_v49 = vadd.f32 %v730_v42, %v717_v18 }
  0x7f   : > { %v737_v48 = vmax.f32 %v736_v43, 0.0  ;;  %v783_v55 = vsub.f32 %v772_v17, %v782_v50  ;;  %v788_v56 = vmul.f32 0.5, %v781_v52  ;;  %v794_v57 = vadd.f32 %v782_v50, %v772_v17 }
  0x80   : > { %v727_v30 = vmin.f32 %v726_v46, %v1384_v29  ;;  %v732_v53 = vmax.f32 %v731_v47, 0.0  ;;  %v742_v54 = vmax.f32 %v741_v49, 0.0 }
  0x81   : > { %v738_v23 = vmin.f32 %v737_v48, %v1384_v29  ;;  %v784_v60 = vmax.f32 %v783_v55, 0.0  ;;  %v789_v61 = vsub.f32 %v775_v51, %v788_v56  ;;  %v795_v62 = vmax.f32 %v794_v57, 0.0 }
  0x82   : > { %1032 = vst [vmem:[%s1361_s11 + $0x38] sm:$0xff] %v727_v30  ;;  %v733_v58 = vmin.f32 %v732_v53, %v1397_v35  ;;  %v743_v59 = vmin.f32 %v742_v54, %v1397_v35  ;;  %v799_v63 = vadd.f32 %v788_v56, %v775_v51 }
  0x83   : > { %1034 = vst [vmem:[%s1361_s11 + $0xc8] sm:$0xff] %v738_v23  ;;  %v785_v0 = vmin.f32 %v784_v60, %v1384_v29  ;;  %v790_v1 = vmax.f32 %v789_v61, 0.0  ;;  %v796_v2 = vmin.f32 %v795_v62, %v1384_v29 }
  0x84   : > { %1033 = vst [vmem:[%s1361_s11 + $0x80] sm:$0xff] %v733_v58  ;;  %1035 = vst [vmem:[%s1361_s11 + $0x110] sm:$0xff] %v743_v59  ;;  %v800_v3 = vmax.f32 %v799_v63, 0.0 }
  0x85   : > { %1044 = vst [vmem:[%s1361_s11 + $0x40] sm:$0xff] %v785_v0  ;;  %v791_v4 = vmin.f32 %v790_v1, %v1397_v35  ;;  %1046 = vst [vmem:[%s1361_s11 + $0xd0] sm:$0xff] %v796_v2 }
  0x86   : > { %v801_v5 = vmin.f32 %v800_v3, %v1397_v35 }
  0x87   : > { %1045 = vst [vmem:[%s1361_s11 + $0x88] sm:$0xff] %v791_v4 }
  0x88   : > { %1047 = vst [vmem:[%s1361_s11 + $0x118] sm:$0xff] %v801_v5 }
  0x89 PF: > { %s16_s17 = sadd.s32 1, %s1192_s17   ;;  %s1719_s15 = smov %s1188_s16 }
  0x8a   : > { %p13_p3 = scmp.ge.s32.totalorder %s16_s17, 4   ;;  %s1720_s16 = smov %s1722_s19 }
  0x8c   :  { %15 = sbr.rel (!%p13_p3) target bundleno = 3 (0x3), region = 150 }
  0x93   :  { %831 = vsyncpa [#allocation3], 1 }
  0x94   :  { %833 = vsyncpa [#allocation3 + $0x1], 1 }
  0x95   :  { %834 = vsyncpa [#allocation4], 1 }
  0x96   :  { %836 = vsyncpa [#allocation4 + $0x1], 1 }

// kernel: proposal_forward.3
= control target key start
LH: loop header
LB: loop body
LE: loop exit
PB: predicated region body
PF: predicated region fallthrough
CT: control target
= control target key end

     0   :  { %s3159_s9 = smov 0   ;;  %s5537_s0 = inlined_call_operand.vmem [shape: f32[2,4,256], index: 0, kind: input, shape index: {}]   ;;  %s5538_s1 = inlined_call_operand.vmem [shape: f32[2,256,4], index: 1, kind: input, shape index: {}]   ;;  %s5539_s2 = inlined_call_operand.vmem [shape: f32[2,1,256], index: 2, kind: output, shape index: {}]  }
   0x1 LB: > { %s3014_s10 = sadd.s32 4294967295, %s3127_s9   ;;  %p3018_p0 = scmp.ge.s32.totalorder %s3127_s9, 1  ;;  %s3127_s9 = sphi %s3159_s9, %s12_s9  }
   0x2   : > { %p122_p1 = scmp.lt.s32.totalorder %s3127_s9, 3 }
   0x4   : > { %p123_p2 = pnand %p3018_p0, %p122_p1 }
   0x6   : > { %126 = sbr.rel (%p123_p2) target bundleno = 2433 (0x981), region = 28 }
   0xd   : > { %p148_p3 = scmp.lt.s32.totalorder %s3014_s10, 1  ;;  %s3137_s19 = smov 2   ;;  %v3138_v30 = vmov 0  }
   0xe   : > { %3101 = vset.pattern.permute.xlu0 %v3138_v30  ;;  %3102 = vset.pattern.permute.xlu1 %v3138_v30  ;;  %s3139_s20 = smov 127   ;;  %s5461_s25 = smov 0  }
   0xf   : > { %s6183_s10 = smov (!%p148_p3, %s3014_s10), 1 }
  0x10   : > { %s3045_s11 = sshll.u32 %s6183_s10, 8  ;;  %s3023_s12 = sshll.u32 %s6183_s10, 1 }
  0x11   : > { %s3174_s15 = scalar_lea.vmem %s5538_s1, %s3045_s11  ;;  %s3179_s18 = scalar_lea.vmem %s5539_s2, %s3023_s12 }
  0x12   : > { %v3182_v0 = vld [vmem:[%s3174_s15] sm:$0xff]  ;;  %v3185_v1 = vld [vmem:[%s3174_s15 + $0x10] sm:$0xff]  ;;  %v3192_v2 = vld [vmem:[%s3174_s15 + $0x8] sm:$0xff]  ;;  %s3044_s21 = sshll.u32 %s6183_s10, 3 }
  0x13   : > { %237 = vrot.lane.b32.xlu0 %v3182_v0, %s3137_s19  ;;  %241 = vrot.lane.b32.xlu1 %v3185_v1, %s3137_s19  ;;  %v3195_v3 = vld [vmem:[%s3174_s15 + $0x18] sm:$0xff]  ;;  %v3202_v4 = vld [vmem:[%s3174_s15 + $0x20] sm:$0xff]  ;;  %s152_s24 = scalar_lea.vmem %s5537_s0, %s3044_s21 }
  0x14   : > { %v3205_v5 = vld [vmem:[%s3174_s15 + $0x28] sm:$0xff]  ;;  %v3212_v6 = vld [vmem:[%s3174_s15 + $0x30] sm:$0xff]  ;;  %v3215_v7 = vld [vmem:[%s3174_s15 + $0x38] sm:$0xff] }
  0x15   : > { %v3222_v8 = vld [vmem:[%s3174_s15 + $0x40] sm:$0xff]  ;;  %v3225_v9 = vld [vmem:[%s3174_s15 + $0x48] sm:$0xff]  ;;  %v3232_v10 = vld [vmem:[%s3174_s15 + $0x50] sm:$0xff] }
  0x16   : > { %v3235_v11 = vld [vmem:[%s3174_s15 + $0x58] sm:$0xff]  ;;  %v3242_v12 = vld [vmem:[%s3174_s15 + $0x60] sm:$0xff]  ;;  %v3245_v13 = vld [vmem:[%s3174_s15 + $0x68] sm:$0xff] }
  0x17   : > { %239 = vrot.lane.b32.xlu0 %v3192_v2, %s3137_s19  ;;  %243 = vrot.lane.b32.xlu1 %v3195_v3, %s3137_s19  ;;  %v3252_v14 = vld [vmem:[%s3174_s15 + $0x70] sm:$0xff]  ;;  %v3255_v15 = vld [vmem:[%s3174_s15 + $0x78] sm:$0xff] }
  0x18   : > { %v3262_v16 = vld [vmem:[%s3174_s15 + $0x80] sm:$0xff]  ;;  %v3265_v17 = vld [vmem:[%s3174_s15 + $0x88] sm:$0xff]  ;;  %v3272_v18 = vld [vmem:[%s3174_s15 + $0x90] sm:$0xff] }
  0x19   : > { %v3275_v19 = vld [vmem:[%s3174_s15 + $0x98] sm:$0xff]  ;;  %v3282_v20 = vld [vmem:[%s3174_s15 + $0xa0] sm:$0xff]  ;;  %v3285_v21 = vld [vmem:[%s3174_s15 + $0xa8] sm:$0xff] }
  0x1a   : > { %v3292_v22 = vld [vmem:[%s3174_s15 + $0xb0] sm:$0xff]  ;;  %v3295_v23 = vld [vmem:[%s3174_s15 + $0xb8] sm:$0xff]  ;;  %v3302_v24 = vld [vmem:[%s3174_s15 + $0xc0] sm:$0xff] }
  0x1b   : > { %245 = vrot.lane.b32.xlu0 %v3202_v4, %s3137_s19  ;;  %247 = vrot.lane.b32.xlu1 %v3205_v5, %s3137_s19  ;;  %v3305_v25 = vld [vmem:[%s3174_s15 + $0xc8] sm:$0xff]  ;;  %v3312_v26 = vld [vmem:[%s3174_s15 + $0xd0] sm:$0xff] }
  0x1c   : > { %v3315_v27 = vld [vmem:[%s3174_s15 + $0xd8] sm:$0xff]  ;;  %v3322_v28 = vld [vmem:[%s3174_s15 + $0xe0] sm:$0xff]  ;;  %v3325_v29 = vld [vmem:[%s3174_s15 + $0xe8] sm:$0xff] }
  0x1d   : > { %5693 = vst [vmem:[#allocation3_spill] sm:$0xff] %v3315_v27  ;;  %v3332_v31 = vld [vmem:[%s3174_s15 + $0xf0] sm:$0xff]  ;;  %v3335_v32 = vld [vmem:[%s3174_s15 + $0xf8] sm:$0xff] }
  0x1e   : > { %5694 = vst [vmem:[#allocation4_spill] sm:$0xff] %v3335_v32 }
  0x1f   : > { %249 = vrot.lane.b32.xlu0 %v3212_v6, %s3137_s19  ;;  %251 = vrot.lane.b32.xlu1 %v3215_v7, %s3137_s19 }
  0x23   : > { %253 = vrot.lane.b32.xlu0 %v3222_v8, %s3137_s19  ;;  %255 = vrot.lane.b32.xlu1 %v3225_v9, %s3137_s19 }
  0x27   : > { %257 = vrot.lane.b32.xlu0 %v3232_v10, %s3137_s19  ;;  %259 = vrot.lane.b32.xlu1 %v3235_v11, %s3137_s19 }
  0x2b   : > { %261 = vrot.lane.b32.xlu0 %v3242_v12, %s3137_s19  ;;  %263 = vrot.lane.b32.xlu1 %v3245_v13, %s3137_s19 }
  0x2f   : > { %265 = vrot.lane.b32.xlu0 %v3252_v14, %s3137_s19  ;;  %267 = vrot.lane.b32.xlu1 %v3255_v15, %s3137_s19 }
  0x33   : > { %269 = vrot.lane.b32.xlu0 %v3262_v16, %s3137_s19  ;;  %271 = vrot.lane.b32.xlu1 %v3265_v17, %s3137_s19 }
  0x37   : > { %273 = vrot.lane.b32.xlu0 %v3272_v18, %s3137_s19  ;;  %275 = vrot.lane.b32.xlu1 %v3275_v19, %s3137_s19 }
  0x3b   : > { %277 = vrot.lane.b32.xlu0 %v3282_v20, %s3137_s19  ;;  %279 = vrot.lane.b32.xlu1 %v3285_v21, %s3137_s19 }
  0x3f   : > { %281 = vrot.lane.b32.xlu0 %v3292_v22, %s3137_s19  ;;  %283 = vrot.lane.b32.xlu1 %v3295_v23, %s3137_s19 }
  0x43   : > { %285 = vrot.lane.b32.xlu0 %v3302_v24, %s3137_s19  ;;  %287 = vrot.lane.b32.xlu1 %v3305_v25, %s3137_s19 }
  0x47   : > { %289 = vrot.lane.b32.xlu0 %v3312_v26, %s3137_s19  ;;  %291 = vrot.lane.b32.xlu1 %v3315_v27, %s3137_s19 }
  0x4b   : > { %293 = vrot.lane.b32.xlu0 %v3322_v28, %s3137_s19  ;;  %295 = vrot.lane.b32.xlu1 %v3325_v29, %s3137_s19 }
  0x4f   : > { %297 = vrot.lane.b32.xlu0 %v3332_v31, %s3137_s19  ;;  %299 = vrot.lane.b32.xlu1 %v3335_v32, %s3137_s19 }
  0x85   : > { %v238_v33 = vpop.permute.xlu0 %237  ;;  %v242_v34 = vpop.permute.xlu1 %241 }
  0x86   : > { %v333_v35 = vsub.f32 %v3182_v0, %v238_v33  ;;  %v335_v36 = vsub.f32 %v3185_v1, %v242_v34 }
  0x88   : > { %v3343_v37 = vadd.f32 1.0, %v333_v35  ;;  %v3345_v40 = vadd.f32 1.0, %v335_v36 }
  0x89   : > { %v240_v38 = vpop.permute.xlu0 %239  ;;  %v244_v39 = vpop.permute.xlu1 %243 }
  0x8a   : > { %v334_v41 = vsub.f32 %v3192_v2, %v240_v38  ;;  %429 = vrot.lane.b32.xlu0 %v3343_v37, %s3139_s20  ;;  %v336_v42 = vsub.f32 %v3195_v3, %v244_v39 }
  0x8c   : > { %v3351_v43 = vadd.f32 1.0, %v334_v41  ;;  %v3353_v46 = vadd.f32 1.0, %v336_v42 }
  0x8d   : > { %v246_v44 = vpop.permute.xlu0 %245  ;;  %v248_v45 = vpop.permute.xlu1 %247 }
  0x8e   : > { %v337_v47 = vsub.f32 %v3202_v4, %v246_v44  ;;  %433 = vrot.lane.b32.xlu0 %v3345_v40, %s3139_s20  ;;  %431 = vrot.lane.b32.xlu1 %v3351_v43, %s3139_s20  ;;  %v338_v48 = vsub.f32 %v3205_v5, %v248_v45 }
  0x90   : > { %v3361_v49 = vadd.f32 1.0, %v337_v47  ;;  %v3363_v52 = vadd.f32 1.0, %v338_v48 }
  0x91   : > { %v250_v50 = vpop.permute.xlu0 %249  ;;  %v252_v51 = vpop.permute.xlu1 %251 }
  0x92   : > { %v339_v53 = vsub.f32 %v3212_v6, %v250_v50  ;;  %435 = vrot.lane.b32.xlu1 %v3353_v46, %s3139_s20  ;;  %437 = vrot.lane.b32.xlu0 %v3361_v49, %s3139_s20  ;;  %v340_v54 = vsub.f32 %v3215_v7, %v252_v51 }
  0x94   : > { %v3371_v55 = vadd.f32 1.0, %v339_v53  ;;  %v3373_v58 = vadd.f32 1.0, %v340_v54 }
  0x95   : > { %v254_v56 = vpop.permute.xlu0 %253  ;;  %v256_v57 = vpop.permute.xlu1 %255 }
  0x96   : > { %v341_v59 = vsub.f32 %v3222_v8, %v254_v56  ;;  %439 = vrot.lane.b32.xlu1 %v3363_v52, %s3139_s20  ;;  %441 = vrot.lane.b32.xlu0 %v3371_v55, %s3139_s20  ;;  %v342_v60 = vsub.f32 %v3225_v9, %v256_v57 }
  0x98   : > { %v3381_v61 = vadd.f32 1.0, %v341_v59  ;;  %v3383_v30 = vadd.f32 1.0, %v342_v60 }
  0x99   : > { %v258_v62 = vpop.permute.xlu0 %257  ;;  %v260_v63 = vpop.permute.xlu1 %259 }
  0x9a   : > { %v343_v33 = vsub.f32 %v3232_v10, %v258_v62  ;;  %443 = vrot.lane.b32.xlu1 %v3373_v58, %s3139_s20  ;;  %445 = vrot.lane.b32.xlu0 %v3381_v61, %s3139_s20  ;;  %v344_v34 = vsub.f32 %v3235_v11, %v260_v63 }
  0x9c   : > { %v3391_v35 = vadd.f32 1.0, %v343_v33  ;;  %v3393_v39 = vadd.f32 1.0, %v344_v34 }
  0x9d   : > { %v262_v36 = vpop.permute.xlu0 %261  ;;  %v264_v38 = vpop.permute.xlu1 %263 }
  0x9e   : > { %v345_v41 = vsub.f32 %v3242_v12, %v262_v36  ;;  %447 = vrot.lane.b32.xlu1 %v3383_v30, %s3139_s20  ;;  %449 = vrot.lane.b32.xlu0 %v3391_v35, %s3139_s20  ;;  %v346_v42 = vsub.f32 %v3245_v13, %v264_v38 }
  0xa0   : > { %v3401_v44 = vadd.f32 1.0, %v345_v41  ;;  %v3403_v48 = vadd.f32 1.0, %v346_v42 }
  0xa1   : > { %v266_v45 = vpop.permute.xlu0 %265  ;;  %v268_v47 = vpop.permute.xlu1 %267 }
  0xa2   : > { %5695 = vst [vmem:[#allocation5_spill] sm:$0xff] %v3403_v48  ;;  %v347_v50 = vsub.f32 %v3252_v14, %v266_v45  ;;  %451 = vrot.lane.b32.xlu1 %v3393_v39, %s3139_s20  ;;  %453 = vrot.lane.b32.xlu0 %v3401_v44, %s3139_s20  ;;  %v348_v51 = vsub.f32 %v3255_v15, %v268_v47 }
  0xa4   : > { %v3411_v53 = vadd.f32 1.0, %v347_v50  ;;  %v3413_v57 = vadd.f32 1.0, %v348_v51 }
  0xa5   : > { %v270_v54 = vpop.permute.xlu0 %269  ;;  %v272_v56 = vpop.permute.xlu1 %271 }
  0xa6   : > { %5696 = vst [vmem:[#allocation6_spill] sm:$0xff] %v3411_v53  ;;  %5697 = vst [vmem:[#allocation7_spill] sm:$0xff] %v3413_v57  ;;  %v349_v59 = vsub.f32 %v3262_v16, %v270_v54  ;;  %455 = vrot.lane.b32.xlu1 %v3403_v48, %s3139_s20  ;;  %457 = vrot.lane.b32.xlu0 %v3411_v53, %s3139_s20  ;;  %v350_v60 = vsub.f32 %v3265_v17, %v272_v56 }
  0xa8   : > { %v3421_v62 = vadd.f32 1.0, %v349_v59  ;;  %v3423_v34 = vadd.f32 1.0, %v350_v60 }
  0xa9   : > { %v274_v63 = vpop.permute.xlu0 %273  ;;  %v276_v33 = vpop.permute.xlu1 %275 }
  0xaa   : > { %5698 = vst [vmem:[#allocation8_spill] sm:$0xff] %v3421_v62  ;;  %5699 = vst [vmem:[#allocation9_spill] sm:$0xff] %v3423_v34  ;;  %v351_v36 = vsub.f32 %v3272_v18, %v274_v63  ;;  %459 = vrot.lane.b32.xlu1 %v3413_v57, %s3139_s20  ;;  %461 = vrot.lane.b32.xlu0 %v3421_v62, %s3139_s20  ;;  %v352_v38 = vsub.f32 %v3275_v19, %v276_v33 }
  0xac   : > { %v3431_v41 = vadd.f32 1.0, %v351_v36  ;;  %v3433_v47 = vadd.f32 1.0, %v352_v38 }
  0xad   : > { %v278_v42 = vpop.permute.xlu0 %277  ;;  %v280_v45 = vpop.permute.xlu1 %279 }
  0xae   : > { %5700 = vst [vmem:[#allocation10_spill] sm:$0xff] %v3431_v41  ;;  %5701 = vst [vmem:[#allocation11_spill] sm:$0xff] %v3433_v47  ;;  %v353_v50 = vsub.f32 %v3282_v20, %v278_v42  ;;  %463 = vrot.lane.b32.xlu1 %v3423_v34, %s3139_s20  ;;  %465 = vrot.lane.b32.xlu0 %v3431_v41, %s3139_s20  ;;  %v354_v51 = vsub.f32 %v3285_v21, %v280_v45 }
  0xb0   : > { %v3441_v54 = vadd.f32 1.0, %v353_v50  ;;  %v3443_v60 = vadd.f32 1.0, %v354_v51 }
  0xb1   : > { %v282_v56 = vpop.permute.xlu0 %281  ;;  %v284_v59 = vpop.permute.xlu1 %283 }
  0xb2   : > { %5702 = vst [vmem:[#allocation12_spill] sm:$0xff] %v3441_v54  ;;  %5703 = vst [vmem:[#allocation13_spill] sm:$0xff] %v3443_v60  ;;  %v355_v63 = vsub.f32 %v3292_v22, %v282_v56  ;;  %467 = vrot.lane.b32.xlu1 %v3433_v47, %s3139_s20  ;;  %469 = vrot.lane.b32.xlu0 %v3441_v54, %s3139_s20  ;;  %v356_v33 = vsub.f32 %v3295_v23, %v284_v59 }
  0xb4   : > { %v3451_v36 = vadd.f32 1.0, %v355_v63  ;;  %v3453_v45 = vadd.f32 1.0, %v356_v33 }
  0xb5   : > { %v286_v38 = vpop.permute.xlu0 %285  ;;  %v288_v42 = vpop.permute.xlu1 %287 }
  0xb6   : > { %5704 = vst [vmem:[#allocation14_spill] sm:$0xff] %v3451_v36  ;;  %5705 = vst [vmem:[#allocation15_spill] sm:$0xff] %v3453_v45  ;;  %v357_v50 = vsub.f32 %v3302_v24, %v286_v38  ;;  %471 = vrot.lane.b32.xlu1 %v3443_v60, %s3139_s20  ;;  %473 = vrot.lane.b32.xlu0 %v3451_v36, %s3139_s20  ;;  %v358_v51 = vsub.f32 %v3305_v25, %v288_v42 }
  0xb8   : > { %v3461_v56 = vadd.f32 1.0, %v357_v50  ;;  %v3463_v63 = vadd.f32 1.0, %v358_v51 }
  0xb9   : > { %v290_v54 = vpop.permute.xlu0 %289  ;;  %v292_v59 = vpop.permute.xlu1 %291 }
  0xba   : > { %5706 = vst [vmem:[#allocation16_spill] sm:$0xff] %v3461_v56  ;;  %5707 = vst [vmem:[#allocation17_spill] sm:$0xff] %v3463_v63  ;;  %v359_v47 = vsub.f32 %v3312_v26, %v290_v54  ;;  %475 = vrot.lane.b32.xlu1 %v3453_v45, %s3139_s20  ;;  %477 = vrot.lane.b32.xlu0 %v3461_v56, %s3139_s20  ;;  %v360_v33 = vsub.f32 %v3315_v27, %v292_v59 }
  0xbc   : > { %v3471_v38 = vadd.f32 1.0, %v359_v47  ;;  %v3473_v50 = vadd.f32 1.0, %v360_v33 }
  0xbd   : > { %v294_v36 = vpop.permute.xlu0 %293  ;;  %v296_v42 = vpop.permute.xlu1 %295 }
  0xbe   : > { %5708 = vst [vmem:[#allocation18_spill] sm:$0xff] %v3471_v38  ;;  %5709 = vst [vmem:[#allocation19_spill] sm:$0xff] %v3473_v50  ;;  %v361_v60 = vsub.f32 %v3322_v28, %v294_v36  ;;  %479 = vrot.lane.b32.xlu1 %v3463_v63, %s3139_s20  ;;  %481 = vrot.lane.b32.xlu0 %v3471_v38, %s3139_s20  ;;  %v362_v54 = vsub.f32 %v3325_v29, %v296_v42 }
  0xc0   : > { %v3481_v51 = vadd.f32 1.0, %v361_v60  ;;  %v3483_v47 = vadd.f32 1.0, %v362_v54 }
  0xc1   : > { %v298_v56 = vpop.permute.xlu0 %297  ;;  %v300_v59 = vpop.permute.xlu1 %299 }
  0xc2   : > { %5710 = vst [vmem:[#allocation20_spill] sm:$0xff] %v3481_v51  ;;  %5711 = vst [vmem:[#allocation21_spill] sm:$0xff] %v3483_v47  ;;  %v363_v45 = vsub.f32 %v3332_v31, %v298_v56  ;;  %483 = vrot.lane.b32.xlu1 %v3473_v50, %s3139_s20  ;;  %485 = vrot.lane.b32.xlu0 %v3481_v51, %s3139_s20  ;;  %v364_v36 = vsub.f32 %v3335_v32, %v300_v59 }
  0xc4   : > { %v3491_v33 = vadd.f32 1.0, %v363_v45  ;;  %v3493_v38 = vadd.f32 1.0, %v364_v36 }
  0xc6   : > { %5712 = vst [vmem:[#allocation22_spill] sm:$0xff] %v3491_v33  ;;  %5713 = vst [vmem:[#allocation23_spill] sm:$0xff] %v3493_v38  ;;  %487 = vrot.lane.b32.xlu1 %v3483_v47, %s3139_s20  ;;  %489 = vrot.lane.b32.xlu0 %v3491_v33, %s3139_s20 }
  0xca   : > { %491 = vrot.lane.b32.xlu1 %v3493_v38, %s3139_s20  ;;  %558 = vperm.xlu0 %3101, %v3182_v0   ;;  %v3140_v38 = vmov 1  }
  0xce   : > { %562 = vperm.xlu1 %3102, %v3192_v2   ;;  %570 = vperm.xlu0 %3101, %v3195_v3  }
  0xd2   : > { %566 = vperm.xlu1 %3102, %v3185_v1   ;;  %578 = vperm.xlu0 %3101, %v3205_v5  }
  0xd6   : > { %574 = vperm.xlu1 %3102, %v3202_v4   ;;  %586 = vperm.xlu0 %3101, %v3215_v7  }
  0xda   : > { %582 = vperm.xlu1 %3102, %v3212_v6   ;;  %594 = vperm.xlu0 %3101, %v3225_v9  }
  0xde   : > { %590 = vperm.xlu1 %3102, %v3222_v8   ;;  %602 = vperm.xlu0 %3101, %v3235_v11  }
  0xe2   : > { %598 = vperm.xlu1 %3102, %v3232_v10   ;;  %610 = vperm.xlu0 %3101, %v3245_v13  }
  0xe6   : > { %606 = vperm.xlu1 %3102, %v3242_v12   ;;  %618 = vperm.xlu0 %3101, %v3255_v15  }
  0xea   : > { %614 = vperm.xlu1 %3102, %v3252_v14   ;;  %626 = vperm.xlu0 %3101, %v3265_v17  }
  0xee   : > { %622 = vperm.xlu1 %3102, %v3262_v16   ;;  %634 = vperm.xlu0 %3101, %v3275_v19  }
  0xf2   : > { %630 = vperm.xlu1 %3102, %v3272_v18   ;;  %642 = vperm.xlu0 %3101, %v3285_v21  }
  0xf6   : > { %638 = vperm.xlu1 %3102, %v3282_v20   ;;  %650 = vperm.xlu0 %3101, %v3295_v23  }
  0xfa   : > { %646 = vperm.xlu1 %3102, %v3292_v22   ;;  %658 = vperm.xlu0 %3101, %v3305_v25  }
  0xfc   : > { %v3526_v60 = vpop.permute.xlu0 %429 }
  0xfe   : > { %654 = vperm.xlu1 %3102, %v3302_v24   ;;  %666 = vperm.xlu0 %3101, %v3315_v27  }
 0x100   : > { %v3530_v45 = vpop.permute.xlu1 %431  ;;  %v3532_v56 = vpop.permute.xlu0 %433 }
 0x102   : > { %662 = vperm.xlu1 %3102, %v3312_v26   ;;  %674 = vperm.xlu0 %3101, %v3325_v29  }
 0x104   : > { %v3536_v42 = vpop.permute.xlu1 %435  ;;  %v3538_v54 = vpop.permute.xlu0 %437 }
 0x106   : > { %670 = vperm.xlu1 %3102, %v3322_v28   ;;  %682 = vperm.xlu0 %3101, %v3335_v32  }
 0x108   : > { %v3542_v59 = vpop.permute.xlu1 %439  ;;  %v3544_v36 = vpop.permute.xlu0 %441 }
 0x10a   : > { %678 = vperm.xlu1 %3102, %v3332_v31   ;;  %3104 = vset.pattern.permute.xlu0 %v3140_v38 }
 0x10b   : > { %772 = vperm.xlu0 %3104, %v3192_v2  }
 0x10c   : > { %v3548_v33 = vpop.permute.xlu1 %443  ;;  %v3550_v47 = vpop.permute.xlu0 %445 }
 0x10e   : > { %3103 = vset.pattern.permute.xlu1 %v3140_v38 }
 0x10f   : > { %768 = vperm.xlu1 %3103, %v3182_v0   ;;  %784 = vperm.xlu0 %3104, %v3202_v4  }
 0x110   : > { %v3554_v51 = vpop.permute.xlu1 %447  ;;  %v3556_v50 = vpop.permute.xlu0 %449 }
 0x113   : > { %776 = vperm.xlu1 %3103, %v3185_v1   ;;  %792 = vperm.xlu0 %3104, %v3212_v6  }
 0x114   : > { %v3560_v63 = vpop.permute.xlu1 %451  ;;  %v3562_v41 = vpop.permute.xlu0 %453 }
 0x117   : > { %780 = vperm.xlu1 %3103, %v3195_v3   ;;  %800 = vperm.xlu0 %3104, %v3222_v8  }
 0x118   : > { %v3566_v38 = vpop.permute.xlu1 %455  ;;  %v3568_v34 = vpop.permute.xlu0 %457 }
 0x119   : > { %5714 = vst [vmem:[#allocation24_spill] sm:$0xff] %v3566_v38  ;;  %5715 = vst [vmem:[#allocation25_spill] sm:$0xff] %v3568_v34 }
 0x11b   : > { %788 = vperm.xlu1 %3103, %v3205_v5   ;;  %808 = vperm.xlu0 %3104, %v3232_v10  }
 0x11c   : > { %v3572_v62 = vpop.permute.xlu1 %459  ;;  %v3574_v57 = vpop.permute.xlu0 %461 }
 0x11d   : > { %5716 = vst [vmem:[#allocation26_spill] sm:$0xff] %v3572_v62  ;;  %5717 = vst [vmem:[#allocation27_spill] sm:$0xff] %v3574_v57 }
 0x11f   : > { %796 = vperm.xlu1 %3103, %v3215_v7   ;;  %816 = vperm.xlu0 %3104, %v3242_v12  }
 0x120   : > { %v3578_v53 = vpop.permute.xlu1 %463  ;;  %v3580_v48 = vpop.permute.xlu0 %465 }
 0x121   : > { %5718 = vst [vmem:[#allocation28_spill] sm:$0xff] %v3578_v53  ;;  %5719 = vst [vmem:[#allocation29_spill] sm:$0xff] %v3580_v48 }
 0x123   : > { %804 = vperm.xlu1 %3103, %v3225_v9   ;;  %824 = vperm.xlu0 %3104, %v3252_v14  }
 0x124   : > { %v3584_v34 = vpop.permute.xlu1 %467  ;;  %v3586_v38 = vpop.permute.xlu0 %469 }
 0x125   : > { %5720 = vst [vmem:[#allocation30_spill] sm:$0xff] %v3584_v34  ;;  %5721 = vst [vmem:[#allocation31_spill] sm:$0xff] %v3586_v38 }
 0x127   : > { %812 = vperm.xlu1 %3103, %v3235_v11   ;;  %832 = vperm.xlu0 %3104, %v3262_v16  }
 0x128   : > { %v3590_v57 = vpop.permute.xlu1 %471  ;;  %v3594_v53 = vpop.permute.xlu0 %473 }
 0x129   : > { %5722 = vst [vmem:[#allocation32_spill] sm:$0xff] %v3590_v57  ;;  %5723 = vst [vmem:[#allocation33_spill] sm:$0xff] %v3594_v53 }
 0x12b   : > { %820 = vperm.xlu1 %3103, %v3245_v13   ;;  %840 = vperm.xlu0 %3104, %v3272_v18  }
 0x12c   : > { %v3598_v48 = vpop.permute.xlu1 %475  ;;  %v3600_v34 = vpop.permute.xlu0 %477 }
 0x12d   : > { %5724 = vst [vmem:[#allocation34_spill] sm:$0xff] %v3598_v48  ;;  %5725 = vst [vmem:[#allocation35_spill] sm:$0xff] %v3600_v34 }
 0x12f   : > { %828 = vperm.xlu1 %3103, %v3255_v15   ;;  %848 = vperm.xlu0 %3104, %v3282_v20  }
 0x130   : > { %v3604_v38 = vpop.permute.xlu1 %479  ;;  %v3608_v57 = vpop.permute.xlu0 %481 }
 0x131   : > { %5726 = vst [vmem:[#allocation36_spill] sm:$0xff] %v3604_v38  ;;  %5727 = vst [vmem:[#allocation37_spill] sm:$0xff] %v3608_v57  ;;  %v5559_v57 = vmov 3  }
 0x133   : > { %836 = vperm.xlu1 %3103, %v3265_v17   ;;  %856 = vperm.xlu0 %3104, %v3292_v22  }
 0x134   : > { %v3612_v53 = vpop.permute.xlu1 %483  ;;  %v3614_v48 = vpop.permute.xlu0 %485 }
 0x135   : > { %5728 = vst [vmem:[#allocation38_spill] sm:$0xff] %v3612_v53  ;;  %5729 = vst [vmem:[#allocation39_spill] sm:$0xff] %v3614_v48 }
 0x137   : > { %844 = vperm.xlu1 %3103, %v3275_v19   ;;  %864 = vperm.xlu0 %3104, %v3302_v24  }
 0x138   : > { %v3618_v34 = vpop.permute.xlu1 %487  ;;  %v3622_v38 = vpop.permute.xlu0 %489 }
 0x139   : > { %5730 = vst [vmem:[#allocation40_spill] sm:$0xff] %v3618_v34  ;;  %5731 = vst [vmem:[#allocation41_spill] sm:$0xff] %v3622_v38 }
 0x13b   : > { %852 = vperm.xlu1 %3103, %v3285_v21   ;;  %872 = vperm.xlu0 %3104, %v3312_v26  }
 0x13c   : > { %v3627_v48 = vpop.permute.xlu1 %491 }
 0x13f   : > { %860 = vperm.xlu1 %3103, %v3295_v23   ;;  %880 = vperm.xlu0 %3104, %v3322_v28  }
 0x143   : > { %868 = vperm.xlu1 %3103, %v3305_v25   ;;  %888 = vperm.xlu0 %3104, %v3332_v31  }
 0x147   : > { %876 = vperm.xlu1 %3103, %v3315_v27   ;;  %3107 = vset.pattern.permute.xlu0 %v5559_v57  ;;  %v5566_v27 = vmov 2  }
 0x148   : > { %1192 = vperm.xlu0 %3107, %v3192_v2  }
 0x149   : > { %v3629_v53 = vpop.permute.xlu0 %558 }
 0x14a   : > { %5732 = vst [vmem:[#allocation42_spill] sm:$0xff] %v3629_v53 }
 0x14b   : > { %884 = vperm.xlu1 %3103, %v3325_v29  }
 0x14c   : > { %1204 = vperm.xlu0 %3107, %v3202_v4  }
 0x14d   : > { %v3633_v34 = vpop.permute.xlu1 %562  ;;  %v3635_v62 = vpop.permute.xlu0 %570 }
 0x14e   : > { %5733 = vst [vmem:[#allocation43_spill] sm:$0xff] %v3633_v34  ;;  %5734 = vst [vmem:[#allocation44_spill] sm:$0xff] %v3635_v62 }
 0x14f   : > { %892 = vperm.xlu1 %3103, %v3335_v32  }
 0x150   : > { %1212 = vperm.xlu0 %3107, %v3212_v6  }
 0x151   : > { %v3639_v38 = vpop.permute.xlu1 %566  ;;  %v3641_v57 = vpop.permute.xlu0 %578 }
 0x152   : > { %5735 = vst [vmem:[#allocation45_spill] sm:$0xff] %v3639_v38  ;;  %5736 = vst [vmem:[#allocation46_spill] sm:$0xff] %v3641_v57 }
 0x153   : > { %3105 = vset.pattern.permute.xlu1 %v5566_v27 }
 0x154   : > { %982 = vperm.xlu1 %3105, %v3192_v2   ;;  %1220 = vperm.xlu0 %3107, %v3222_v8  }
 0x155   : > { %v3646_v53 = vpop.permute.xlu1 %574  ;;  %v3648_v34 = vpop.permute.xlu0 %586 }
 0x156   : > { %5737 = vst [vmem:[#allocation47_spill] sm:$0xff] %v3646_v53  ;;  %5738 = vst [vmem:[#allocation48_spill] sm:$0xff] %v3648_v34 }
 0x158   : > { %986 = vperm.xlu1 %3105, %v3185_v1   ;;  %1228 = vperm.xlu0 %3107, %v3232_v10  }
 0x159   : > { %v3652_v32 = vpop.permute.xlu1 %582  ;;  %v3654_v38 = vpop.permute.xlu0 %594 }
 0x15a   : > { %5739 = vst [vmem:[#allocation49_spill] sm:$0xff] %v3654_v38 }
 0x15c   : > { %994 = vperm.xlu1 %3105, %v3202_v4   ;;  %1236 = vperm.xlu0 %3107, %v3242_v12  }
 0x15d   : > { %v3658_v27 = vpop.permute.xlu1 %590  ;;  %v3660_v2 = vpop.permute.xlu0 %602 }
 0x15e   : > { %5740 = vst [vmem:[#allocation50_spill] sm:$0xff] %v3660_v2 }
 0x160   : > { %1002 = vperm.xlu1 %3105, %v3212_v6   ;;  %1244 = vperm.xlu0 %3107, %v3252_v14  }
 0x161   : > { %v3664_v34 = vpop.permute.xlu1 %598  ;;  %v3666_v53 = vpop.permute.xlu0 %610 }
 0x162   : > { %5741 = vst [vmem:[#allocation51_spill] sm:$0xff] %v3666_v53 }
 0x164   : > { %1010 = vperm.xlu1 %3105, %v3222_v8   ;;  %1252 = vperm.xlu0 %3107, %v3262_v16  }
 0x165   : > { %v3670_v38 = vpop.permute.xlu1 %606  ;;  %v3672_v4 = vpop.permute.xlu0 %618 }
 0x166   : > { %5742 = vst [vmem:[#allocation52_spill] sm:$0xff] %v3672_v4 }
 0x168   : > { %1018 = vperm.xlu1 %3105, %v3232_v10   ;;  %1260 = vperm.xlu0 %3107, %v3272_v18  }
 0x169   : > { %v3676_v2 = vpop.permute.xlu1 %614  ;;  %v3678_v6 = vpop.permute.xlu0 %626 }
 0x16a   : > { %5743 = vst [vmem:[#allocation53_spill] sm:$0xff] %v3676_v2  ;;  %5744 = vst [vmem:[#allocation54_spill] sm:$0xff] %v3678_v6 }
 0x16c   : > { %1026 = vperm.xlu1 %3105, %v3242_v12   ;;  %1268 = vperm.xlu0 %3107, %v3282_v20  }
 0x16d   : > { %v3682_v53 = vpop.permute.xlu1 %622  ;;  %v3684_v8 = vpop.permute.xlu0 %634 }
 0x16e   : > { %5745 = vst [vmem:[#allocation55_spill] sm:$0xff] %v3682_v53  ;;  %5746 = vst [vmem:[#allocation56_spill] sm:$0xff] %v3684_v8 }
 0x170   : > { %1034 = vperm.xlu1 %3105, %v3252_v14   ;;  %1276 = vperm.xlu0 %3107, %v3292_v22  }
 0x171   : > { %v3688_v4 = vpop.permute.xlu1 %630  ;;  %v3690_v10 = vpop.permute.xlu0 %642 }
 0x172   : > { %5747 = vst [vmem:[#allocation57_spill] sm:$0xff] %v3688_v4  ;;  %5748 = vst [vmem:[#allocation58_spill] sm:$0xff] %v3690_v10 }
 0x174   : > { %1042 = vperm.xlu1 %3105, %v3262_v16   ;;  %1284 = vperm.xlu0 %3107, %v3302_v24  }
 0x175   : > { %v3694_v6 = vpop.permute.xlu1 %638  ;;  %v3696_v12 = vpop.permute.xlu0 %650 }
 0x176   : > { %5749 = vst [vmem:[#allocation59_spill] sm:$0xff] %v3694_v6  ;;  %5750 = vst [vmem:[#allocation60_spill] sm:$0xff] %v3696_v12 }
 0x178   : > { %1050 = vperm.xlu1 %3105, %v3272_v18   ;;  %1292 = vperm.xlu0 %3107, %v3312_v26  }
 0x179   : > { %v3700_v8 = vpop.permute.xlu1 %646  ;;  %v3702_v14 = vpop.permute.xlu0 %658 }
 0x17a   : > { %5751 = vst [vmem:[#allocation61_spill] sm:$0xff] %v3700_v8  ;;  %5752 = vst [vmem:[#allocation62_spill] sm:$0xff] %v3702_v14  ;;  %v5757_v8 = vmov 2  }
 0x17c   : > { %1058 = vperm.xlu1 %3105, %v3282_v20   ;;  %1300 = vperm.xlu0 %3107, %v3322_v28  }
 0x17d   : > { %v3706_v10 = vpop.permute.xlu1 %654  ;;  %v3708_v16 = vpop.permute.xlu0 %666 }
 0x17e   : > { %5753 = vst [vmem:[#allocation63_spill] sm:$0xff] %v3706_v10  ;;  %5754 = vst [vmem:[#allocation64_spill] sm:$0xff] %v3708_v16 }
 0x180   : > { %1066 = vperm.xlu1 %3105, %v3292_v22   ;;  %1308 = vperm.xlu0 %3107, %v3332_v31  }
 0x181   : > { %v3712_v12 = vpop.permute.xlu1 %662  ;;  %v3714_v18 = vpop.permute.xlu0 %674 }
 0x182   : > { %5755 = vst [vmem:[#allocation65_spill] sm:$0xff] %v3712_v12  ;;  %5756 = vst [vmem:[#allocation66_spill] sm:$0xff] %v3714_v18 }
 0x184   : > { %1074 = vperm.xlu1 %3105, %v3302_v24   ;;  %3108 = vset.pattern.permute.xlu0 %v5757_v8 }
 0x185   : > { %v3718_v14 = vpop.permute.xlu1 %670  ;;  %978 = vperm.xlu0 %3108, %v3182_v0   ;;  %v3721_v20 = vpop.permute.xlu0 %682 }
 0x186   : > { %5758 = vst [vmem:[#allocation67_spill] sm:$0xff] %v3718_v14  ;;  %5759 = vst [vmem:[#allocation68_spill] sm:$0xff] %v3721_v20 }
 0x188   : > { %1082 = vperm.xlu1 %3105, %v3312_v26  }
 0x189   : > { %v3724_v16 = vpop.permute.xlu1 %678  ;;  %990 = vperm.xlu0 %3108, %v3195_v3  }
 0x18a   : > { %5760 = vst [vmem:[#allocation69_spill] sm:$0xff] %v3724_v16  ;;  %v3727_v22 = vpop.permute.xlu0 %772  ;;  %v5764_v16 = vmov 3  }
 0x18c   : > { %1090 = vperm.xlu1 %3105, %v3322_v28  }
 0x18d   : > { %998 = vperm.xlu0 %3108, %v3205_v5  }
 0x18e   : > { %v3731_v24 = vpop.permute.xlu1 %768  ;;  %v3733_v8 = vpop.permute.xlu0 %784 }
 0x18f   : > { %5761 = vst [vmem:[#allocation70_spill] sm:$0xff] %v3731_v24 }
 0x190   : > { %1098 = vperm.xlu1 %3105, %v3332_v31  }
 0x191   : > { %1006 = vperm.xlu0 %3108, %v3215_v7  }
 0x192   : > { %v3737_v20 = vpop.permute.xlu1 %776  ;;  %v3739_v26 = vpop.permute.xlu0 %792 }
 0x193   : > { %5762 = vst [vmem:[#allocation71_spill] sm:$0xff] %v3737_v20  ;;  %5763 = vst [vmem:[#allocation72_spill] sm:$0xff] %v3739_v26  ;;  %v3815_v26 = vmul.f32 %v3526_v60, %v3343_v37  ;;  %v3837_v37 = vmul.f32 %v3538_v54, %v3361_v49  ;;  %v3855_v49 = vmul.f32 %v3550_v47, %v3381_v61  ;;  %v5790_v54 = vld [vmem:[#allocation6_spill] sm:$0xff] }
 0x194   : > { %3106 = vset.pattern.permute.xlu1 %v5764_v16  ;;  %v3874_v61 = vmul.f32 %v3556_v50, %v3391_v35  ;;  %v3878_v47 = vmul.f32 %v3560_v63, %v3393_v39  ;;  %v5793_v35 = vld [vmem:[#allocation7_spill] sm:$0xff]  ;;  %v5794_v50 = vld [vmem:[#allocation26_spill] sm:$0xff] }
 0x195   : > { %1188 = vperm.xlu1 %3106, %v3182_v0   ;;  %1014 = vperm.xlu0 %3108, %v3225_v9   ;;  %5784 = vst [vmem:[#allocation92_spill] sm:$0xff] %v3855_v49  ;;  %v5795_v39 = vld [vmem:[#allocation3_spill] sm:$0xff] }
 0x196   : > { %v3744_v28 = vpop.permute.xlu1 %780  ;;  %v3746_v14 = vpop.permute.xlu0 %800  ;;  %5786 = vst [vmem:[#allocation94_spill] sm:$0xff] %v3874_v61  ;;  %v5819_v61 = vld [vmem:[#allocation34_spill] sm:$0xff] }
 0x197   : > { %5765 = vst [vmem:[#allocation73_spill] sm:$0xff] %v3744_v28  ;;  %5766 = vst [vmem:[#allocation74_spill] sm:$0xff] %v3746_v14  ;;  %v5592_v28 = vlaneseq }
 0x199   : > { %1196 = vperm.xlu1 %3106, %v3185_v1   ;;  %1022 = vperm.xlu0 %3108, %v3235_v11  }
 0x19a   : > { %v3750_v31 = vpop.permute.xlu1 %788  ;;  %v3752_v20 = vpop.permute.xlu0 %808 }
 0x19b   : > { %5767 = vst [vmem:[#allocation75_spill] sm:$0xff] %v3750_v31  ;;  %5768 = vst [vmem:[#allocation76_spill] sm:$0xff] %v3752_v20 }
 0x19d   : > { %1200 = vperm.xlu1 %3106, %v3195_v3   ;;  %1030 = vperm.xlu0 %3108, %v3245_v13  }
 0x19e   : > { %v3756_v0 = vpop.permute.xlu1 %796  ;;  %v3758_v16 = vpop.permute.xlu0 %816 }
 0x19f   : > { %5769 = vst [vmem:[#allocation77_spill] sm:$0xff] %v3756_v0  ;;  %5770 = vst [vmem:[#allocation78_spill] sm:$0xff] %v3758_v16  ;;  %v3774_v16 = vshrl.u32 %v5592_v28, 7 }
 0x1a1   : > { %1208 = vperm.xlu1 %3106, %v3205_v5   ;;  %1038 = vperm.xlu0 %3108, %v3255_v15  }
 0x1a2   : > { %v3762_v1 = vpop.permute.xlu1 %804  ;;  %v3764_v14 = vpop.permute.xlu0 %824 }
 0x1a3   : > { %5771 = vst [vmem:[#allocation79_spill] sm:$0xff] %v3762_v1  ;;  %5772 = vst [vmem:[#allocation80_spill] sm:$0xff] %v3764_v14  ;;  %v3789_v14 = vld [vmem:[%s152_s24] sm:$0xff]  ;;  %v3798_v1 = vsub.s32 1, %v3774_v16 }
 0x1a5   : > { %1216 = vperm.xlu1 %3106, %v3215_v7   ;;  %1046 = vperm.xlu0 %3108, %v3265_v17   ;;  %5780 = vst [vmem:[#allocation88_spill] sm:$0xff] %v3798_v1 }
 0x1a6   : > { %v3768_v3 = vpop.permute.xlu1 %812  ;;  %v3770_v20 = vpop.permute.xlu0 %832  ;;  %v5877_v4 = vld [vmem:[#allocation78_spill] sm:$0xff] }
 0x1a7   : > { %5773 = vst [vmem:[#allocation81_spill] sm:$0xff] %v3768_v3  ;;  %5774 = vst [vmem:[#allocation82_spill] sm:$0xff] %v3770_v20  ;;  %v3786_v3 = vsub.s32 0, %v3774_v16  ;;  %v691_v20 = vsub.s32 4, %v3774_v16 }
 0x1a9   : > { %1224 = vperm.xlu1 %3106, %v3225_v9   ;;  %1054 = vperm.xlu0 %3108, %v3275_v19   ;;  %5777 = vst [vmem:[#allocation85_spill] sm:$0xff] %v3786_v3  ;;  %v692_v0 = vrot.slane %v3789_v14, %v691_v20  ;;  %v3819_v20 = vmul.f32 %v3530_v45, %v3351_v43 }
 0x1aa   : > { %v3781_v5 = vpop.permute.xlu1 %820  ;;  %v3783_v7 = vpop.permute.xlu0 %840  ;;  %v3843_v43 = vmul.f32 %v3542_v59, %v3363_v52  ;;  %v3863_v52 = vmul.f32 %v3554_v51, %v3383_v30  ;;  %v3882_v30 = vmul.f32 %v3562_v41, %v3401_v44  ;;  %v1321_v51 = vsub.s32 7, %v3774_v16  ;;  %v5791_v59 = vld [vmem:[#allocation25_spill] sm:$0xff]  ;;  %v5796_v44 = vld [vmem:[#allocation8_spill] sm:$0xff]  ;;  %v5797_v41 = vld [vmem:[#allocation27_spill] sm:$0xff] }
 0x1ab   : > { %5775 = vst [vmem:[#allocation83_spill] sm:$0xff] %v3781_v5  ;;  %5776 = vst [vmem:[#allocation84_spill] sm:$0xff] %v3783_v7  ;;  %v901_v7 = vsub.s32 5, %v3774_v16  ;;  %v688_v5 = vrot.slane %v3789_v14, %v3786_v3  ;;  %v3901_v63 = vmul.f32 %v5797_v41, %v5796_v44 }
 0x1ac   : > { %5787 = vst [vmem:[#allocation95_spill] sm:$0xff] %v3882_v30  ;;  %v5818_v30 = vld [vmem:[#allocation15_spill] sm:$0xff] }
 0x1ad   : > { %1232 = vperm.xlu1 %3106, %v3235_v11   ;;  %1062 = vperm.xlu0 %3108, %v3285_v21   ;;  %v3938_v49 = vmul.f32 %v5819_v61, %v5818_v30  ;;  %v5830_v61 = vld [vmem:[#allocation19_spill] sm:$0xff]  ;;  %v5831_v30 = vld [vmem:[#allocation38_spill] sm:$0xff] }
 0x1ae   : > { %v3793_v9 = vpop.permute.xlu1 %828  ;;  %v3795_v28 = vpop.permute.xlu0 %848 }
 0x1af   : > { %5778 = vst [vmem:[#allocation86_spill] sm:$0xff] %v3793_v9  ;;  %5779 = vst [vmem:[#allocation87_spill] sm:$0xff] %v3795_v28  ;;  %v898_v28 = vrot.slane %v3789_v14, %v3798_v1  ;;  %v902_v9 = vrot.slane %v3789_v14, %v901_v7  ;;  %v3833_v7 = vmul.f32 %v3536_v42, %v3353_v46 }
 0x1b0   : > { %v3851_v46 = vmul.f32 %v3548_v33, %v3373_v58  ;;  %v1317_v58 = vsub.s32 3, %v3774_v16  ;;  %v5788_v33 = vld [vmem:[#allocation5_spill] sm:$0xff] }
 0x1b1   : > { %1240 = vperm.xlu1 %3106, %v3245_v13   ;;  %1070 = vperm.xlu0 %3108, %v3295_v23   ;;  %v3822_v13 = vrot.slane %v688_v5, %v3786_v3  ;;  %v3866_v45 = vrot.slane %v898_v28, %v3798_v1  ;;  %v3895_v28 = vmul.f32 %v5794_v50, %v5793_v35  ;;  %v5800_v5 = vld [vmem:[#allocation28_spill] sm:$0xff] }
 0x1b2   : > { %v3806_v11 = vpop.permute.xlu1 %836  ;;  %v3808_v31 = vpop.permute.xlu0 %856  ;;  %v1318_v41 = vrot.slane %v3789_v14, %v1317_v58 }
 0x1b3   : > { %5781 = vst [vmem:[#allocation89_spill] sm:$0xff] %v3806_v11  ;;  %5782 = vst [vmem:[#allocation90_spill] sm:$0xff] %v3808_v31  ;;  %v3825_v11 = vrot.slane %v692_v0, %v3786_v3  ;;  %v3829_v31 = vmul.f32 %v3532_v56, %v3345_v40  ;;  %v3847_v40 = vmul.f32 %v3544_v36, %v3371_v55  ;;  %v5789_v56 = vld [vmem:[#allocation24_spill] sm:$0xff]  ;;  %v5799_v0 = vld [vmem:[#allocation9_spill] sm:$0xff] }
 0x1b4   : > { %5785 = vst [vmem:[#allocation93_spill] sm:$0xff] %v3866_v45  ;;  %v3869_v55 = vrot.slane %v902_v9, %v3798_v1  ;;  %v3887_v42 = vmul.f32 %v5789_v56, %v5788_v33  ;;  %v3891_v36 = vmul.f32 %v5791_v59, %v5790_v54  ;;  %5798 = vst [vmem:[#allocation24_spill] sm:$0xff] %v3901_v63  ;;  %v5802_v33 = vld [vmem:[#allocation10_spill] sm:$0xff]  ;;  %v5803_v56 = vld [vmem:[#allocation29_spill] sm:$0xff] }
 0x1b5   : > { %1248 = vperm.xlu1 %3106, %v3255_v15   ;;  %1078 = vperm.xlu0 %3108, %v3305_v25   ;;  %5783 = vst [vmem:[#allocation91_spill] sm:$0xff] %v3847_v40  ;;  %v3905_v9 = vmul.f32 %v5800_v5, %v5799_v0  ;;  %v3909_v54 = vmul.f32 %v5803_v56, %v5802_v33  ;;  %v5805_v59 = vld [vmem:[#allocation11_spill] sm:$0xff]  ;;  %v5806_v1 = vld [vmem:[#allocation30_spill] sm:$0xff]  ;;  %v5809_v3 = vld [vmem:[#allocation12_spill] sm:$0xff]  ;;  %v3925_v0 = vsub.s32 2, %v3774_v16 }
 0x1b6   : > { %v3857_v60 = vpop.permute.xlu1 %844  ;;  %v3859_v15 = vpop.permute.xlu0 %864  ;;  %5792 = vst [vmem:[#allocation5_spill] sm:$0xff] %v3891_v36  ;;  %v3913_v35 = vmul.f32 %v5806_v1, %v5805_v59  ;;  %v5810_v36 = vld [vmem:[#allocation31_spill] sm:$0xff]  ;;  %v5812_v33 = vld [vmem:[#allocation13_spill] sm:$0xff]  ;;  %v5813_v56 = vld [vmem:[#allocation32_spill] sm:$0xff] }
 0x1b7   : > { %5801 = vst [vmem:[#allocation6_spill] sm:$0xff] %v3905_v9  ;;  %5804 = vst [vmem:[#allocation25_spill] sm:$0xff] %v3909_v54  ;;  %v3921_v44 = vmul.f32 %v5810_v36, %v5809_v3  ;;  %v3930_v54 = vmul.f32 %v5813_v56, %v5812_v33  ;;  %v5815_v1 = vld [vmem:[#allocation14_spill] sm:$0xff]  ;;  %v5816_v59 = vld [vmem:[#allocation33_spill] sm:$0xff]  ;;  %v1322_v3 = vrot.slane %v3789_v14, %v1321_v51 }
 0x1b8   : > { %5807 = vst [vmem:[#allocation7_spill] sm:$0xff] %v3913_v35  ;;  %v3934_v63 = vmul.f32 %v5816_v59, %v5815_v1  ;;  %5820 = vst [vmem:[#allocation9_spill] sm:$0xff] %v3938_v49  ;;  %v5821_v36 = vld [vmem:[#allocation16_spill] sm:$0xff]  ;;  %v5824_v40 = vld [vmem:[#allocation17_spill] sm:$0xff]  ;;  %v3957_v1 = vmul.f32 %v5831_v30, %v5830_v61  ;;  %v3979_v30 = vrot.slane %v1318_v41, %v1317_v58 }
 0x1b9   : > { %1256 = vperm.xlu1 %3106, %v3265_v17   ;;  %1086 = vperm.xlu0 %3108, %v5795_v39   ;;  %5811 = vst [vmem:[#allocation3_spill] sm:$0xff] %v3921_v44  ;;  %5814 = vst [vmem:[#allocation8_spill] sm:$0xff] %v3930_v54  ;;  %v5822_v44 = vld [vmem:[#allocation35_spill] sm:$0xff]  ;;  %v5825_v5 = vld [vmem:[#allocation36_spill] sm:$0xff] }
 0x1ba   : > { %v3915_v50 = vpop.permute.xlu1 %852  ;;  %v3917_v17 = vpop.permute.xlu0 %872  ;;  %5817 = vst [vmem:[#allocation27_spill] sm:$0xff] %v3934_v63  ;;  %v3943_v35 = vmul.f32 %v5822_v44, %v5821_v36  ;;  %v3947_v9 = vmul.f32 %v5825_v5, %v5824_v40  ;;  %v5827_v33 = vld [vmem:[#allocation18_spill] sm:$0xff]  ;;  %v5828_v56 = vld [vmem:[#allocation37_spill] sm:$0xff]  ;;  %5832 = vst [vmem:[#allocation11_spill] sm:$0xff] %v3957_v1 }
 0x1bb   : > { %5808 = vst [vmem:[#allocation26_spill] sm:$0xff] %v3915_v50  ;;  %v3951_v54 = vmul.f32 %v5828_v56, %v5827_v33  ;;  %v5833_v51 = vld [vmem:[#allocation20_spill] sm:$0xff]  ;;  %v5834_v59 = vld [vmem:[#allocation39_spill] sm:$0xff]  ;;  %v5836_v36 = vld [vmem:[#allocation21_spill] sm:$0xff] }
 0x1bc   : > { %5823 = vst [vmem:[#allocation28_spill] sm:$0xff] %v3943_v35  ;;  %5826 = vst [vmem:[#allocation10_spill] sm:$0xff] %v3947_v9  ;;  %v3961_v44 = vmul.f32 %v5834_v59, %v5833_v51  ;;  %v5837_v35 = vld [vmem:[#allocation40_spill] sm:$0xff]  ;;  %v5839_v5 = vld [vmem:[#allocation22_spill] sm:$0xff]  ;;  %v1108_v51 = vrot.slane %v3789_v14, %v3925_v0 }
 0x1bd   : > { %5829 = vst [vmem:[#allocation29_spill] sm:$0xff] %v3951_v54  ;;  %1264 = vperm.xlu1 %3106, %v3275_v19   ;;  %1094 = vperm.xlu0 %3108, %v3325_v29   ;;  %v3965_v40 = vmul.f32 %v5837_v35, %v5836_v36  ;;  %v5840_v63 = vld [vmem:[#allocation41_spill] sm:$0xff]  ;;  %v5843_v29 = vld [vmem:[#allocation23_spill] sm:$0xff]  ;;  %v5845_v35 = vsub.s32 6, %v3774_v16  ;;  %v5848_v36 = vld [vmem:[#allocation4_spill] sm:$0xff] }
 0x1be   : > { %5835 = vst [vmem:[#allocation30_spill] sm:$0xff] %v3961_v44  ;;  %v3969_v33 = vmul.f32 %v5840_v63, %v5839_v5  ;;  %v3971_v56 = vpop.permute.xlu1 %860  ;;  %v3973_v19 = vpop.permute.xlu0 %880  ;;  %v3977_v61 = vmul.f32 %v3627_v48, %v5843_v29  ;;  %v3992_v48 = vrot.slane %v1322_v3, %v1317_v58  ;;  %v5849_v5 = vld [vmem:[#allocation45_spill] sm:$0xff]  ;;  %v4019_v63 = vrot.slane %v1108_v51, %v3925_v0  ;;  %v5873_v3 = vld [vmem:[#allocation74_spill] sm:$0xff] }
 0x1bf   : > { %5838 = vst [vmem:[#allocation12_spill] sm:$0xff] %v3965_v40  ;;  %5842 = vst [vmem:[#allocation13_spill] sm:$0xff] %v3971_v56  ;;  %v1112_v59 = vrot.slane %v3789_v14, %v5845_v35  ;;  %v196_v40 = vrot.slane %v3789_v14, 6  ;;  %v929_v6 = vmax.f32 %v5873_v3, %v3866_v45 }
 0x1c0   : > { %5841 = vst [vmem:[#allocation31_spill] sm:$0xff] %v3969_v33  ;;  %5844 = vst [vmem:[#allocation32_spill] sm:$0xff] %v3977_v61  ;;  %v5847_v33 = vld [vmem:[#allocation43_spill] sm:$0xff]  ;;  %v3143_v61 = vmov 0.0  }
 0x1c1   : > { %1272 = vperm.xlu1 %3106, %v3285_v21   ;;  %1102 = vperm.xlu0 %3108, %v5848_v36   ;;  %v5851_v21 = vld [vmem:[#allocation47_spill] sm:$0xff]  ;;  %v4022_v58 = vrot.slane %v1112_v59, %v3925_v0  ;;  %v915_v59 = vmax.f32 %v3727_v22, %v3866_v45  ;;  %2540 = vst [vmem:[#allocation2 + $0x100] sm:$0xff] %v3143_v61  ;;  %2542 = vst [vmem:[#allocation2 + $0x110] sm:$0xff] %v3143_v61 }
 0x1c2   : > { %v4010_v29 = vpop.permute.xlu1 %868  ;;  %v4012_v44 = vpop.permute.xlu0 %888  ;;  %2544 = vst [vmem:[#allocation2 + $0x120] sm:$0xff] %v3143_v61  ;;  %2546 = vst [vmem:[#allocation2 + $0x130] sm:$0xff] %v3143_v61  ;;  %v198_v24 = vsub.f32 %v3789_v14, %v196_v40  ;;  %v3111_v14 = vld [vmem:[%s3174_s15 + $0xf8] sm:$0xff]  ;;  %v5879_v1 = vmax.f32 %v5847_v33, %v3825_v11 }
 0x1c3   : > { %5850 = vst [vmem:[#allocation14_spill] sm:$0xff] %v4010_v29  ;;  %2548 = vst [vmem:[#allocation2 + $0x140] sm:$0xff] %v3143_v61 }
 0x1c4   : > { %2550 = vst [vmem:[#allocation2 + $0x150] sm:$0xff] %v3143_v61  ;;  %2552 = vst [vmem:[#allocation2 + $0x160] sm:$0xff] %v3143_v61 }
 0x1c5   : > { %1280 = vperm.xlu1 %3106, %v3295_v23   ;;  %1847 = vperm.xlu0 %3108, %v3815_v26   ;;  %2554 = vst [vmem:[#allocation2 + $0x170] sm:$0xff] %v3143_v61  ;;  %2556 = vst [vmem:[#allocation2 + $0x180] sm:$0xff] %v3143_v61 }
 0x1c6   : > { %v4048_v51 = vpop.permute.xlu1 %876  ;;  %2558 = vst [vmem:[#allocation2 + $0x190] sm:$0xff] %v3143_v61  ;;  %2560 = vst [vmem:[#allocation2 + $0x1a0] sm:$0xff] %v3143_v61 }
 0x1c7   : > { %5855 = vst [vmem:[#allocation33_spill] sm:$0xff] %v4048_v51  ;;  %v4058_v36 = vpop.permute.xlu0 %1192  ;;  %2562 = vst [vmem:[#allocation2 + $0x1b0] sm:$0xff] %v3143_v61  ;;  %v5909_v51 = vld [vmem:[#allocation7_spill] sm:$0xff] }
 0x1c8   : > { %v1335_v26 = vmin.f32 %v4058_v36, %v3979_v30  ;;  %2564 = vst [vmem:[#allocation2 + $0x1c0] sm:$0xff] %v3143_v61  ;;  %2566 = vst [vmem:[#allocation2 + $0x1d0] sm:$0xff] %v3143_v61 }
 0x1c9   : > { %1288 = vperm.xlu1 %3106, %v3305_v25   ;;  %1862 = vperm.xlu0 %3108, %v3833_v7   ;;  %2568 = vst [vmem:[#allocation2 + $0x1e0] sm:$0xff] %v3143_v61  ;;  %2570 = vst [vmem:[#allocation2 + $0x1f0] sm:$0xff] %v3143_v61  ;;  %v3110_v61 = vld [vmem:[%s3174_s15 + $0xe8] sm:$0xff] }
 0x1ca   : > { %v4082_v41 = vsub.f32 %v1335_v26, %v915_v59  ;;  %v4084_v54 = vpop.permute.xlu1 %884  ;;  %v921_v26 = vmax.f32 %v3733_v8, %v3866_v45 }
 0x1cb   : > { %5860 = vst [vmem:[#allocation15_spill] sm:$0xff] %v4084_v54  ;;  %v4092_v35 = vpop.permute.xlu0 %1204 }
 0x1cc   : > { %v1341_v23 = vmin.f32 %v4092_v35, %v3979_v30 }
 0x1cd   : > { %1296 = vperm.xlu1 %3106, %v5795_v39   ;;  %1872 = vperm.xlu0 %3108, %v3843_v43  }
 0x1ce   : > { %v4116_v62 = vsub.f32 %v1341_v23, %v921_v26  ;;  %v4118_v59 = vpop.permute.xlu1 %892  ;;  %v5870_v26 = vld [vmem:[#allocation72_spill] sm:$0xff] }
 0x1cf   : > { %5867 = vst [vmem:[#allocation34_spill] sm:$0xff] %v4118_v59  ;;  %v4126_v12 = vpop.permute.xlu0 %1212  ;;  %v925_v18 = vmax.f32 %v5870_v26, %v3866_v45 }
 0x1d0   : > { %v1345_v7 = vmin.f32 %v4126_v12, %v3979_v30 }
 0x1d1   : > { %1304 = vperm.xlu1 %3106, %v3110_v61   ;;  %1882 = vperm.xlu0 %3108, %v3851_v46   ;;  %v937_v46 = vmax.f32 %v5877_v4, %v3866_v45 }
 0x1d2   : > { %v4151_v10 = vsub.f32 %v1345_v7, %v925_v18  ;;  %v5875_v18 = vld [vmem:[#allocation76_spill] sm:$0xff] }
 0x1d3   : > { %v983_v25 = vpop.permute.xlu1 %982  ;;  %v4159_v23 = vpop.permute.xlu0 %1220  ;;  %v933_v7 = vmax.f32 %v5875_v18, %v3866_v45  ;;  %v199_v18 = vadd.f32 1.0, %v198_v24  ;;  %v5883_v24 = vmov 2  }
 0x1d4   : > { %v1125_v43 = vmin.f32 %v983_v25, %v4019_v63  ;;  %v1126_v57 = vmin.f32 %v983_v25, %v4022_v58  ;;  %v1349_v53 = vmin.f32 %v4159_v23, %v3979_v30  ;;  %v5878_v25 = vmax.f32 %v5847_v33, %v3822_v13 }
 0x1d5   : > { %1312 = vperm.xlu1 %3106, %v3111_v14   ;;  %1892 = vperm.xlu0 %3108, %v3863_v52  }
 0x1d6   : > { %v4183_v61 = vsub.f32 %v1125_v43, %v5878_v25  ;;  %v4188_v9 = vsub.f32 %v1126_v57, %v5879_v1  ;;  %v4194_v40 = vsub.f32 %v1349_v53, %v929_v6  ;;  %v5881_v25 = vld [vmem:[#allocation80_spill] sm:$0xff]  ;;  %v5887_v6 = vmax.f32 %v5849_v5, %v3825_v11 }
 0x1d7   : > { %v987_v39 = vpop.permute.xlu1 %986  ;;  %v4196_v49 = vpop.permute.xlu0 %1228  ;;  %v941_v33 = vmax.f32 %v5881_v25, %v3866_v45  ;;  %v1336_v43 = vmin.f32 %v4058_v36, %v3992_v48 }
 0x1d8   : > { %v1127_v57 = vmin.f32 %v987_v39, %v4019_v63  ;;  %v1128_v1 = vmin.f32 %v987_v39, %v4022_v58  ;;  %v1353_v2 = vmin.f32 %v4196_v49, %v3979_v30  ;;  %v5885_v39 = vmax.f32 %v5849_v5, %v3822_v13 }
 0x1d9   : > { %3109 = vset.pattern.permute.xlu1 %v5883_v24  ;;  %1902 = vperm.xlu0 %3108, %v3878_v47   ;;  %v5894_v24 = vmax.f32 %v5851_v21, %v3822_v13 }
 0x1da   : > { %v4219_v14 = vsub.f32 %v1127_v57, %v5885_v39  ;;  %v4224_v25 = vsub.f32 %v1128_v1, %v5887_v6  ;;  %1852 = vperm.xlu1 %3109, %v3819_v20   ;;  %v4231_v53 = vsub.f32 %v1353_v2, %v933_v7  ;;  %v3024_v57 = vrot.slane %v199_v18, 9  ;;  %v5889_v39 = vld [vmem:[#allocation84_spill] sm:$0xff]  ;;  %v5891_v2 = vld [vmem:[#allocation87_spill] sm:$0xff] }
 0x1db   : > { %v995_v4 = vpop.permute.xlu1 %994  ;;  %v4233_v52 = vpop.permute.xlu0 %1236  ;;  %v5895_v7 = vmax.f32 %v5851_v21, %v3825_v11  ;;  %v1342_v21 = vmin.f32 %v4092_v35, %v3992_v48  ;;  %v5901_v35 = vld [vmem:[#allocation6_spill] sm:$0xff] }
 0x1dc   : > { %5886 = vst [vmem:[#allocation16_spill] sm:$0xff] %v4219_v14  ;;  %v1131_v20 = vmin.f32 %v995_v4, %v4019_v63  ;;  %v1132_v6 = vmin.f32 %v995_v4, %v4022_v58  ;;  %v1357_v47 = vmin.f32 %v4233_v52, %v3979_v30 }
 0x1dd   : > { %1912 = vperm.xlu0 %3108, %v3887_v42  }
 0x1de   : > { %v4257_v5 = vsub.f32 %v1131_v20, %v5894_v24  ;;  %v4262_v36 = vsub.f32 %v1132_v6, %v5895_v7  ;;  %1857 = vperm.xlu1 %3109, %v3829_v31   ;;  %v4269_v1 = vsub.f32 %v1357_v47, %v937_v46  ;;  %v204_v24 = vmul.f32 %v3024_v57, %v199_v18 }
 0x1df   : > { %v1003_v4 = vpop.permute.xlu1 %1002  ;;  %v4271_v45 = vpop.permute.xlu0 %1244  ;;  %v5896_v47 = vmax.f32 %v3727_v22, %v3869_v55  ;;  %v5897_v20 = vmax.f32 %v3652_v32, %v3822_v13  ;;  %v5898_v22 = vmax.f32 %v3652_v32, %v3825_v11  ;;  %v5899_v32 = vmax.f32 %v3733_v8, %v3869_v55 }
 0x1e0   : > { %v1135_v31 = vmin.f32 %v1003_v4, %v4019_v63  ;;  %v1136_v6 = vmin.f32 %v1003_v4, %v4022_v58  ;;  %v1361_v57 = vmin.f32 %v4271_v45, %v3979_v30 }
 0x1e1   : > { %v1592_v18 = vsub.f32 %v1336_v43, %v5896_v47  ;;  %1922 = vperm.xlu0 %3108, %v3895_v28   ;;  %v1655_v47 = vadd.f32 1.0, %v4082_v41  ;;  %v1463_v28 = vadd.f32 1.0, %v4183_v61  ;;  %v4342_v61 = vadd.f32 1.0, %v4116_v62 }
 0x1e2   : > { %v4296_v42 = vsub.f32 %v1135_v31, %v5897_v20  ;;  %v4301_v43 = vsub.f32 %v1136_v6, %v5898_v22  ;;  %1867 = vperm.xlu1 %3109, %v3837_v37   ;;  %v4308_v46 = vsub.f32 %v1361_v57, %v941_v33  ;;  %v2009_v20 = vrot.slane %v204_v24, %v3925_v0 }
 0x1e3   : > { %v1011_v4 = vpop.permute.xlu1 %1010  ;;  %v4310_v7 = vpop.permute.xlu0 %1252  ;;  %v1598_v31 = vsub.f32 %v1342_v21, %v5899_v32  ;;  %v5900_v22 = vsub.s32 6, %v3774_v16  ;;  %v1656_v33 = vadd.f32 1.0, %v1592_v18  ;;  %v1346_v57 = vmin.f32 %v4126_v12, %v3992_v48  ;;  %v5904_v18 = vld [vmem:[#allocation91_spill] sm:$0xff]  ;;  %v5932_v59 = vld [vmem:[#allocation16_spill] sm:$0xff] }
 0x1e4   : > { %v1139_v6 = vmin.f32 %v1011_v4, %v4019_v63  ;;  %v1140_v37 = vmin.f32 %v1011_v4, %v4022_v58  ;;  %v5902_v21 = vmax.f32 %v3658_v27, %v3822_v13  ;;  %v5905_v12 = vlaneseq }
 0x1e5   : > { %v2013_v14 = vrot.slane %v204_v24, %v5900_v22  ;;  %1932 = vperm.xlu0 %3108, %v5901_v35   ;;  %v5903_v24 = vmax.f32 %v3658_v27, %v3825_v11  ;;  %v1464_v35 = vadd.f32 1.0, %v4188_v9  ;;  %v1350_v22 = vmin.f32 %v4159_v23, %v3992_v48 }
 0x1e6   : > { %v4330_v4 = vsub.f32 %v1139_v6, %v5902_v21  ;;  %1877 = vperm.xlu1 %3109, %v5904_v18   ;;  %v4339_v32 = vand.u32 127, %v5905_v12  ;;  %v4350_v27 = vrot.slane %v2009_v20, %v3925_v0  ;;  %v1719_v12 = vmax.f32 %v1655_v47, 0.0  ;;  %v5912_v47 = vld [vmem:[#allocation92_spill] sm:$0xff] }
 0x1e7   : > { %v4335_v41 = vsub.f32 %v1140_v37, %v5903_v24  ;;  %v1019_v6 = vpop.permute.xlu1 %1018  ;;  %v4347_v21 = vpop.permute.xlu0 %1260  ;;  %v4352_v37 = vadd.f32 1.0, %v1598_v31  ;;  %v4357_v62 = vrot.slane %v2013_v14, %v3925_v0  ;;  %v1720_v9 = vmax.f32 %v1656_v33, 0.0 }
 0x1e8   : > { %5906 = vst [vmem:[#allocation35_spill] sm:$0xff] %v4350_v27  ;;  %v1143_v24 = vmin.f32 %v1019_v6, %v4019_v63  ;;  %v1144_v18 = vmin.f32 %v1019_v6, %v4022_v58  ;;  %v5908_v23 = vmax.f32 %v5870_v26, %v3869_v55  ;;  %v1527_v54 = vmax.f32 %v1463_v28, 0.0 }
 0x1e9   : > { %5907 = vst [vmem:[#allocation17_spill] sm:$0xff] %v4357_v62  ;;  %1942 = vperm.xlu0 %3108, %v5909_v51   ;;  %v5910_v31 = vmax.f32 %v3664_v34, %v3822_v13  ;;  %v5911_v0 = vmax.f32 %v3664_v34, %v3825_v11  ;;  %v4377_v26 = vadd.s32 24, %v3774_v16  ;;  %v1725_v51 = vmax.f32 %v4342_v61, 0.0 }
 0x1ea   : > { %v1602_v8 = vsub.f32 %v1346_v57, %v5908_v23  ;;  %1887 = vperm.xlu1 %3109, %v5912_v47   ;;  %v4381_v28 = vadd.f32 1.0, %v4151_v10  ;;  %v1528_v33 = vmax.f32 %v1464_v35, 0.0  ;;  %v5914_v57 = vmax.f32 %v5873_v3, %v3869_v55  ;;  %v5915_v35 = vld [vmem:[#allocation8_spill] sm:$0xff] }
 0x1eb   : > { %v4368_v29 = vsub.f32 %v1143_v24, %v5910_v31  ;;  %v4373_v14 = vsub.f32 %v1144_v18, %v5911_v0  ;;  %5913 = vst [vmem:[#allocation36_spill] sm:$0xff] %v4377_v26  ;;  %v1027_v24 = vpop.permute.xlu1 %1026  ;;  %v4386_v23 = vpop.permute.xlu0 %1268  ;;  %v1726_v34 = vmax.f32 %v4352_v37, 0.0  ;;  %v1354_v18 = vmin.f32 %v4196_v49, %v3992_v48 }
 0x1ec   : > { %v1606_v6 = vsub.f32 %v1350_v22, %v5914_v57  ;;  %v1147_v31 = vmin.f32 %v1027_v24, %v4019_v63  ;;  %v1148_v61 = vmin.f32 %v1027_v24, %v4022_v58  ;;  %v4393_v0 = vadd.f32 1.0, %v1602_v8  ;;  %v5920_v24 = vld [vmem:[#allocation94_spill] sm:$0xff] }
 0x1ed   : > { %v1469_v10 = vadd.f32 1.0, %v4257_v5  ;;  %1952 = vperm.xlu0 %3108, %v5915_v35   ;;  %v4398_v3 = vadd.s32 40, %v3774_v16  ;;  %v4400_v22 = vmul.f32 %v1719_v12, %v1527_v54  ;;  %v4403_v37 = vadd.f32 1.0, %v4194_v40 }
 0x1ee   : > { %v1358_v49 = vmin.f32 %v4233_v52, %v3992_v48  ;;  %v5918_v47 = vmax.f32 %v3670_v38, %v3822_v13  ;;  %v5919_v5 = vmax.f32 %v3670_v38, %v3825_v11  ;;  %1897 = vperm.xlu1 %3109, %v5920_v24   ;;  %v1729_v54 = vmax.f32 %v4381_v28, 0.0  ;;  %v5924_v24 = vld [vmem:[#allocation9_spill] sm:$0xff] }
 0x1ef   : > { %5916 = vst [vmem:[#allocation18_spill] sm:$0xff] %v4398_v3  ;;  %5917 = vst [vmem:[#allocation37_spill] sm:$0xff] %v4400_v22  ;;  %v4417_v12 = vadd.f32 1.0, %v1606_v6  ;;  %v1470_v40 = vadd.f32 1.0, %v4262_v36  ;;  %v1035_v35 = vpop.permute.xlu1 %1034  ;;  %v4420_v20 = vpop.permute.xlu0 %1276  ;;  %v4422_v52 = vmul.f32 %v1720_v9, %v1528_v33  ;;  %v5922_v22 = vld [vmem:[#allocation76_spill] sm:$0xff]  ;;  %v1473_v38 = vadd.f32 1.0, %v4296_v42 }
 0x1f0   : > { %v1421_v8 = vsub.f32 %v1147_v31, %v5918_v47  ;;  %v4413_v57 = vsub.f32 %v1148_v61, %v5919_v5  ;;  %v5923_v31 = vmax.f32 %v5922_v22, %v3869_v55  ;;  %v1151_v61 = vmin.f32 %v1035_v35, %v4019_v63  ;;  %v5926_v22 = vld [vmem:[#allocation78_spill] sm:$0xff] }
 0x1f1   : > { %5921 = vst [vmem:[#allocation19_spill] sm:$0xff] %v4422_v52  ;;  %v1152_v5 = vmin.f32 %v1035_v35, %v4022_v58  ;;  %v1730_v28 = vmax.f32 %v4393_v0, 0.0  ;;  %v1533_v6 = vmax.f32 %v1469_v10, 0.0  ;;  %v1474_v36 = vadd.f32 1.0, %v4301_v43  ;;  %1962 = vperm.xlu0 %3108, %v5924_v24   ;;  %v5931_v43 = vld [vmem:[#allocation95_spill] sm:$0xff] }
 0x1f2   : > { %v1610_v47 = vsub.f32 %v1354_v18, %v5923_v31  ;;  %v4434_v9 = vadd.s32 56, %v3774_v16  ;;  %v1733_v33 = vmax.f32 %v4403_v37, 0.0  ;;  %v5927_v18 = vmax.f32 %v5926_v22, %v3869_v55  ;;  %v5928_v31 = vld [vmem:[#allocation53_spill] sm:$0xff]  ;;  %1907 = vperm.xlu1 %3109, %v5931_v43  }
 0x1f3   : > { %v5929_v52 = vmax.f32 %v5928_v31, %v3822_v13  ;;  %v5930_v0 = vmax.f32 %v5928_v31, %v3825_v11  ;;  %v1734_v24 = vmax.f32 %v4417_v12, 0.0  ;;  %v4452_v37 = vadd.f32 1.0, %v4231_v53 }
 0x1f4   : > { %5925 = vst [vmem:[#allocation38_spill] sm:$0xff] %v4434_v9  ;;  %v1614_v42 = vsub.f32 %v1358_v49, %v5927_v18  ;;  %v4449_v9 = vadd.f32 1.0, %v5932_v59  ;;  %v1534_v22 = vmax.f32 %v1470_v40, 0.0  ;;  %v1043_v49 = vpop.permute.xlu1 %1042  ;;  %v4454_v18 = vpop.permute.xlu0 %1284  ;;  %v1674_v3 = vadd.f32 1.0, %v1610_v47  ;;  %v5935_v47 = vld [vmem:[#allocation55_spill] sm:$0xff] }
 0x1f5   : > { %v1425_v35 = vsub.f32 %v1151_v61, %v5929_v52  ;;  %v1426_v10 = vsub.f32 %v1152_v5, %v5930_v0  ;;  %v4457_v52 = vadd.f32 1.0, %v4269_v1  ;;  %v1537_v61 = vmax.f32 %v1473_v38, 0.0  ;;  %v5933_v0 = vld [vmem:[#allocation10_spill] sm:$0xff] }
 0x1f6   : > { %v1156_v5 = vmin.f32 %v1043_v49, %v4022_v58  ;;  %v1538_v31 = vmax.f32 %v1474_v36, 0.0  ;;  %v1477_v12 = vadd.f32 1.0, %v4330_v4  ;;  %v1478_v59 = vadd.f32 1.0, %v4335_v41  ;;  %1972 = vperm.xlu0 %3108, %v5933_v0   ;;  %v5937_v4 = vld [vmem:[#allocation5_spill] sm:$0xff] }
 0x1f7   : > { %v4463_v53 = vmul.f32 %v1725_v51, %v1533_v6  ;;  %v4466_v40 = vadd.f32 1.0, %v4224_v25  ;;  %v4468_v43 = vadd.f32 1.0, %v1614_v42  ;;  %v1362_v1 = vmin.f32 %v4271_v45, %v3992_v48  ;;  %1917 = vperm.xlu1 %3109, %v5937_v4  }
 0x1f8   : > { %v5936_v38 = vmax.f32 %v5935_v47, %v3825_v11  ;;  %v1737_v41 = vmax.f32 %v4452_v37, 0.0  ;;  %v1481_v51 = vadd.f32 1.0, %v4368_v29  ;;  %v1482_v6 = vadd.f32 1.0, %v4373_v14  ;;  %v1051_v25 = vpop.permute.xlu1 %1050  ;;  %v4481_v49 = vpop.permute.xlu0 %1292  ;;  %v5939_v37 = vld [vmem:[#allocation11_spill] sm:$0xff] }
 0x1f9   : > { %5934 = vst [vmem:[#allocation20_spill] sm:$0xff] %v4463_v53  ;;  %v4483_v42 = vmul.f32 %v1726_v34, %v1534_v22  ;;  %v1738_v0 = vmax.f32 %v1674_v3, 0.0  ;;  %v1741_v45 = vmax.f32 %v4457_v52, 0.0  ;;  %v1160_v47 = vmin.f32 %v1051_v25, %v4022_v58  ;;  %v5942_v34 = vld [vmem:[#allocation80_spill] sm:$0xff]  ;;  %v5947_v25 = vld [vmem:[#allocation82_spill] sm:$0xff] }
 0x1fa   : > { %v4475_v36 = vsub.f32 %v1156_v5, %v5936_v38  ;;  %v1366_v5 = vmin.f32 %v4310_v7, %v3992_v48  ;;  %v1541_v38 = vmax.f32 %v1477_v12, 0.0  ;;  %v1542_v4 = vmax.f32 %v1478_v59, 0.0  ;;  %1982 = vperm.xlu0 %3108, %v5939_v37   ;;  %v5946_v12 = vld [vmem:[#allocation24_spill] sm:$0xff] }
 0x1fb   : > { %5938 = vst [vmem:[#allocation39_spill] sm:$0xff] %v4483_v42  ;;  %v4490_v29 = vmul.f32 %v1729_v54, %v1537_v61  ;;  %v4492_v14 = vmul.f32 %v1730_v28, %v1538_v31  ;;  %v1742_v53 = vmax.f32 %v4468_v43, 0.0  ;;  %v5943_v3 = vmax.f32 %v5942_v34, %v3869_v55  ;;  %v5944_v42 = vld [vmem:[#allocation57_spill] sm:$0xff]  ;;  %1927 = vperm.xlu1 %3109, %v5946_v12  }
 0x1fc   : > { %v1485_v52 = vadd.f32 1.0, %v1421_v8  ;;  %v5945_v7 = vmax.f32 %v5944_v42, %v3825_v11  ;;  %v1681_v59 = vadd.f32 1.0, %v4308_v46  ;;  %v1545_v54 = vmax.f32 %v1481_v51, 0.0  ;;  %v1059_v31 = vpop.permute.xlu1 %1058  ;;  %v1301_v43 = vpop.permute.xlu0 %1300 }
 0x1fd   : > { %5940 = vst [vmem:[#allocation21_spill] sm:$0xff] %v4490_v29  ;;  %5941 = vst [vmem:[#allocation40_spill] sm:$0xff] %v4492_v14  ;;  %v1618_v22 = vsub.f32 %v1362_v1, %v5943_v3  ;;  %v1546_v61 = vmax.f32 %v1482_v6, 0.0  ;;  %v1486_v28 = vadd.f32 1.0, %v4413_v57  ;;  %v5948_v37 = vmax.f32 %v5947_v25, %v3869_v55  ;;  %v5949_v6 = vld [vmem:[#allocation12_spill] sm:$0xff] }
 0x1fe   : > { %v4501_v56 = vsub.f32 %v1160_v47, %v5945_v7  ;;  %v1370_v8 = vmin.f32 %v4347_v21, %v3992_v48  ;;  %v1164_v42 = vmin.f32 %v1059_v31, %v4022_v58  ;;  %v1390_v47 = vmin.f32 %v1301_v43, %v3992_v48  ;;  %1992 = vperm.xlu0 %3108, %v5949_v6   ;;  %v5952_v7 = vld [vmem:[#allocation59_spill] sm:$0xff]  ;;  %v6020_v14 = vld [vmem:[#allocation48_spill] sm:$0xff] }
 0x1ff   : > { %v1622_v1 = vsub.f32 %v1366_v5, %v5948_v37  ;;  %v1374_v46 = vmin.f32 %v4386_v23, %v3992_v48  ;;  %v1489_v51 = vadd.f32 1.0, %v1425_v35  ;;  %v4516_v57 = vmul.f32 %v1733_v33, %v1541_v38  ;;  %v5955_v23 = vld [vmem:[#allocation25_spill] sm:$0xff] }
 0x200   : > { %v4518_v34 = vmul.f32 %v1734_v24, %v1542_v4  ;;  %v1549_v3 = vmax.f32 %v1485_v52, 0.0  ;;  %v1378_v5 = vmin.f32 %v4420_v20, %v3992_v48  ;;  %v5953_v21 = vmax.f32 %v5952_v7, %v3825_v11  ;;  %1937 = vperm.xlu1 %3109, %v5955_v23   ;;  %v1067_v38 = vpop.permute.xlu1 %1066  ;;  %v1309_v24 = vpop.permute.xlu0 %1308  ;;  %v5992_v23 = vld [vmem:[#allocation29_spill] sm:$0xff] }
 0x201   : > { %5950 = vst [vmem:[#allocation22_spill] sm:$0xff] %v4516_v57  ;;  %v5954_v31 = vmax.f32 %v3973_v19, %v3869_v55  ;;  %v1550_v35 = vmax.f32 %v1486_v28, 0.0  ;;  %v1490_v33 = vadd.f32 1.0, %v1426_v10  ;;  %v4531_v4 = vmul.f32 %v1737_v41, %v1545_v54  ;;  %v5959_v28 = vld [vmem:[#allocation32_spill] sm:$0xff] }
 0x202   : > { %5951 = vst [vmem:[#allocation41_spill] sm:$0xff] %v4518_v34  ;;  %v1438_v12 = vsub.f32 %v1164_v42, %v5953_v21  ;;  %v4533_v52 = vmul.f32 %v1738_v0, %v1546_v61  ;;  %v1682_v20 = vadd.f32 1.0, %v1618_v22  ;;  %v1745_v25 = vmax.f32 %v1681_v59, 0.0  ;;  %2002 = vperm.xlu0 %3108, %v5959_v28   ;;  %v5961_v22 = vld [vmem:[#allocation90_spill] sm:$0xff]  ;;  %v5963_v61 = vld [vmem:[#allocation61_spill] sm:$0xff] }
 0x203   : > { %v4528_v43 = vsub.f32 %v1390_v47, %v5954_v31  ;;  %5956 = vst [vmem:[#allocation23_spill] sm:$0xff] %v4531_v4  ;;  %v1168_v37 = vmin.f32 %v1067_v38, %v4022_v58  ;;  %v1394_v42 = vmin.f32 %v1309_v24, %v3992_v48  ;;  %v1686_v6 = vadd.f32 1.0, %v1622_v1 }
 0x204   : > { %5957 = vst [vmem:[#allocation43_spill] sm:$0xff] %v4533_v52  ;;  %v5958_v19 = vmax.f32 %v5889_v39, %v3869_v55  ;;  %v1553_v7 = vmax.f32 %v1489_v51, 0.0  ;;  %v1382_v10 = vmin.f32 %v4454_v18, %v3992_v48  ;;  %v5960_v41 = vmax.f32 %v5891_v2, %v3869_v55  ;;  %v5966_v18 = vld [vmem:[#allocation3_spill] sm:$0xff] }
 0x205   : > { %v5962_v59 = vmax.f32 %v5961_v22, %v3869_v55  ;;  %v5964_v1 = vmax.f32 %v5963_v61, %v3825_v11  ;;  %v5965_v39 = vmax.f32 %v4012_v44, %v3869_v55  ;;  %1947 = vperm.xlu1 %3109, %v5966_v18   ;;  %v1554_v51 = vmax.f32 %v1490_v33, 0.0 }
 0x206   : > { %v1626_v47 = vsub.f32 %v1370_v8, %v5958_v19  ;;  %v1630_v0 = vsub.f32 %v1374_v46, %v5960_v41  ;;  %v1386_v2 = vmin.f32 %v4481_v49, %v3992_v48  ;;  %v1075_v46 = vpop.permute.xlu1 %1074  ;;  %v4562_v31 = vmul.f32 %v1741_v45, %v1549_v3  ;;  %v5973_v41 = vld [vmem:[#allocation27_spill] sm:$0xff] }
 0x207   : > { %v1634_v54 = vsub.f32 %v1378_v5, %v5962_v59  ;;  %v4552_v21 = vsub.f32 %v1168_v37, %v5964_v1  ;;  %v4557_v8 = vsub.f32 %v1394_v42, %v5965_v39  ;;  %v4564_v5 = vmul.f32 %v1742_v53, %v1550_v35  ;;  %v979_v37 = vpop.permute.xlu0 %978  ;;  %v5971_v53 = vld [vmem:[#allocation63_spill] sm:$0xff] }
 0x208   : > { %5967 = vst [vmem:[#allocation4_spill] sm:$0xff] %v4562_v31  ;;  %v1494_v24 = vadd.f32 1.0, %v4475_v36  ;;  %v1172_v44 = vmin.f32 %v1075_v46, %v4022_v58  ;;  %v1746_v42 = vmax.f32 %v1682_v20, 0.0  ;;  %v1690_v19 = vadd.f32 1.0, %v1626_v47 }
 0x209   : > { %5968 = vst [vmem:[#allocation45_spill] sm:$0xff] %v4564_v5  ;;  %v5969_v33 = vmax.f32 %v3859_v15, %v3869_v55  ;;  %v4573_v28 = vmul.f32 %v1745_v25, %v1553_v7  ;;  %v4575_v45 = vadd.f32 1.0, %v1630_v0  ;;  %v5972_v3 = vmax.f32 %v5971_v53, %v3825_v11  ;;  %1957 = vperm.xlu1 %3109, %v5973_v41  }
 0x20a   : > { %v4582_v36 = vadd.s32 72, %v3774_v16  ;;  %v4585_v20 = vadd.s32 88, %v3774_v16  ;;  %v1750_v47 = vmax.f32 %v1686_v6, 0.0  ;;  %v4587_v22 = vadd.f32 1.0, %v1634_v54  ;;  %v1083_v7 = vpop.permute.xlu1 %1082 }
 0x20b   : > { %v1638_v49 = vsub.f32 %v1382_v10, %v5969_v33  ;;  %5970 = vst [vmem:[#allocation47_spill] sm:$0xff] %v4573_v28  ;;  %v1446_v35 = vsub.f32 %v1172_v44, %v5972_v3  ;;  %v5976_v15 = vmax.f32 %v3917_v17, %v3869_v55  ;;  %v4592_v10 = vmul.f32 %v1746_v42, %v1554_v51  ;;  %v991_v1 = vpop.permute.xlu0 %990  ;;  %v5997_v28 = vld [vmem:[#allocation42_spill] sm:$0xff] }
 0x20c   : > { %5974 = vst [vmem:[#allocation72_spill] sm:$0xff] %v4582_v36  ;;  %5975 = vst [vmem:[#allocation74_spill] sm:$0xff] %v4585_v20  ;;  %v1558_v0 = vmax.f32 %v1494_v24, 0.0  ;;  %v1498_v59 = vadd.f32 1.0, %v4501_v56  ;;  %v1176_v61 = vmin.f32 %v1083_v7, %v4022_v58  ;;  %v4597_v39 = vadd.s32 8, %v3774_v16  ;;  %v5983_v24 = vld [vmem:[#allocation28_spill] sm:$0xff] }
 0x20d   : > { %v1642_v25 = vsub.f32 %v1386_v2, %v5976_v15  ;;  %5977 = vst [vmem:[#allocation84_spill] sm:$0xff] %v4592_v10  ;;  %v1754_v18 = vmax.f32 %v1690_v19, 0.0  ;;  %v4599_v6 = vadd.f32 1.0, %v1638_v49  ;;  %v4602_v54 = vadd.s32 104, %v3774_v16  ;;  %v5981_v2 = vld [vmem:[#allocation65_spill] sm:$0xff]  ;;  %1967 = vperm.xlu1 %3109, %v5983_v24   ;;  %v6048_v36 = vld [vmem:[#allocation75_spill] sm:$0xff] }
 0x20e   : > { %5978 = vst [vmem:[#allocation87_spill] sm:$0xff] %v4597_v39  ;;  %v4605_v17 = vadd.s32 16, %v3774_v16  ;;  %v1758_v51 = vmax.f32 %v4575_v45, 0.0  ;;  %v5982_v56 = vmax.f32 %v5981_v2, %v3825_v11  ;;  %v4613_v44 = vadd.s32 120, %v3774_v16  ;;  %v1091_v53 = vpop.permute.xlu1 %1090  ;;  %v6044_v39 = vld [vmem:[#allocation51_spill] sm:$0xff] }
 0x20f   : > { %5979 = vst [vmem:[#allocation6_spill] sm:$0xff] %v4602_v54  ;;  %v4616_v42 = vadd.s32 32, %v3774_v16  ;;  %v4619_v33 = vadd.f32 1.0, %v1642_v25  ;;  %v1502_v49 = vadd.f32 1.0, %v1438_v12  ;;  %v4622_v45 = vadd.s32 136, %v3774_v16  ;;  %v999_v15 = vpop.permute.xlu0 %998 }
 0x210   : > { %5980 = vst [vmem:[#allocation91_spill] sm:$0xff] %v4605_v17  ;;  %v1450_v46 = vsub.f32 %v1176_v61, %v5982_v56  ;;  %5984 = vst [vmem:[#allocation7_spill] sm:$0xff] %v4613_v44  ;;  %v1562_v3 = vmax.f32 %v1498_v59, 0.0  ;;  %v1180_v41 = vmin.f32 %v1091_v53, %v4022_v58  ;;  %v4626_v7 = vadd.s32 128, %v4339_v32  ;;  %v5990_v59 = vld [vmem:[#allocation67_spill] sm:$0xff] }
 0x211   : > { %5985 = vst [vmem:[#allocation92_spill] sm:$0xff] %v4616_v42  ;;  %5986 = vst [vmem:[#allocation8_spill] sm:$0xff] %v4622_v45  ;;  %v4628_v61 = vmul.f32 %v1750_v47, %v1558_v0  ;;  %v1123_v56 = vmin.f32 %v979_v37, %v4019_v63  ;;  %v1124_v25 = vmin.f32 %v979_v37, %v4022_v58  ;;  %v4634_v12 = vadd.s32 48, %v3774_v16 }
 0x212   : > { %5987 = vst [vmem:[#allocation94_spill] sm:$0xff] %v4626_v7  ;;  %v4637_v24 = vadd.f32 1.0, %v4528_v43  ;;  %v5991_v53 = vmax.f32 %v5990_v59, %v3825_v11  ;;  %1977 = vperm.xlu1 %3109, %v5992_v23   ;;  %v4644_v47 = vadd.s32 152, %v3774_v16  ;;  %v4647_v0 = vadd.s32 64, %v3774_v16  ;;  %v6034_v7 = vld [vmem:[#allocation71_spill] sm:$0xff] }
 0x213   : > { %5988 = vst [vmem:[#allocation76_spill] sm:$0xff] %v4628_v61  ;;  %5989 = vst [vmem:[#allocation9_spill] sm:$0xff] %v4634_v12  ;;  %v1566_v2 = vmax.f32 %v1502_v49, 0.0  ;;  %v1129_v19 = vmin.f32 %v991_v1, %v4019_v63  ;;  %v1099_v61 = vpop.permute.xlu1 %1098  ;;  %v4652_v43 = vadd.s32 168, %v3774_v16  ;;  %v1506_v59 = vadd.f32 1.0, %v4552_v21 }
 0x214   : > { %v1454_v38 = vsub.f32 %v1180_v41, %v5991_v53  ;;  %5993 = vst [vmem:[#allocation78_spill] sm:$0xff] %v4644_v47  ;;  %5994 = vst [vmem:[#allocation53_spill] sm:$0xff] %v4647_v0  ;;  %v1130_v41 = vmin.f32 %v991_v1, %v4022_v58  ;;  %v1184_v23 = vmin.f32 %v1099_v61, %v4022_v58  ;;  %v1007_v53 = vpop.permute.xlu0 %1006  ;;  %v4666_v52 = vadd.s32 80, %v3774_v16  ;;  %v6029_v0 = vld [vmem:[#allocation49_spill] sm:$0xff] }
 0x215   : > { %5995 = vst [vmem:[#allocation95_spill] sm:$0xff] %v4652_v43  ;;  %v4657_v10 = vmul.f32 %v1754_v18, %v1562_v3  ;;  %v5998_v5 = vmax.f32 %v5997_v28, %v3822_v13  ;;  %v5999_v49 = vmax.f32 %v5997_v28, %v3825_v11  ;;  %v4669_v21 = vadd.s32 184, %v3774_v16  ;;  %v6002_v18 = vld [vmem:[#allocation69_spill] sm:$0xff] }
 0x216   : > { %6000 = vst [vmem:[#allocation10_spill] sm:$0xff] %v4666_v52  ;;  %v4673_v61 = vadd.f32 1.0, %v4557_v8  ;;  %v6003_v3 = vmax.f32 %v6002_v18, %v3825_v11  ;;  %v4680_v28 = vadd.s32 96, %v3774_v16  ;;  %v1133_v1 = vmin.f32 %v999_v15, %v4019_v63 }
 0x217   : > { %5996 = vst [vmem:[#allocation16_spill] sm:$0xff] %v4657_v10  ;;  %v1397_v37 = vsub.f32 %v1123_v56, %v5998_v5  ;;  %v1398_v31 = vsub.f32 %v1124_v25, %v5999_v49  ;;  %6001 = vst [vmem:[#allocation55_spill] sm:$0xff] %v4669_v21  ;;  %v6004_v5 = vld [vmem:[#allocation30_spill] sm:$0xff]  ;;  %v4682_v56 = vadd.f32 1.0, %v1446_v35  ;;  %v6006_v25 = vld [vmem:[#allocation44_spill] sm:$0xff]  ;;  %v4689_v8 = vadd.s32 200, %v3774_v16 }
 0x218   : > { %v1458_v10 = vsub.f32 %v1184_v23, %v6003_v3  ;;  %1987 = vperm.xlu1 %3109, %v6004_v5   ;;  %6005 = vst [vmem:[#allocation5_spill] sm:$0xff] %v4680_v28  ;;  %v6007_v49 = vmax.f32 %v6006_v25, %v3822_v13  ;;  %v1570_v21 = vmax.f32 %v1506_v59, 0.0  ;;  %v6009_v23 = vmax.f32 %v6006_v25, %v3825_v11  ;;  %v1189_v5 = vpop.permute.xlu1 %1188  ;;  %v1015_v28 = vpop.permute.xlu0 %1014 }
 0x219   : > { %6008 = vst [vmem:[#allocation11_spill] sm:$0xff] %v4689_v8  ;;  %v1134_v3 = vmin.f32 %v999_v15, %v4022_v58  ;;  %v4695_v35 = vmul.f32 %v1758_v51, %v1566_v2  ;;  %v4697_v34 = vadd.f32 1.0, %v1397_v37  ;;  %v4699_v57 = vadd.f32 1.0, %v1398_v31 }
 0x21a   : > { %v1403_v4 = vsub.f32 %v1129_v19, %v6007_v49  ;;  %v1404_v18 = vsub.f32 %v1130_v41, %v6009_v23  ;;  %v1137_v19 = vmin.f32 %v1007_v53, %v4019_v63  ;;  %v4703_v49 = vadd.s32 112, %v3774_v16  ;;  %v6012_v41 = vld [vmem:[#allocation31_spill] sm:$0xff]  ;;  %v6015_v23 = vld [vmem:[#allocation46_spill] sm:$0xff] }
 0x21b   : > { %6010 = vst [vmem:[#allocation80_spill] sm:$0xff] %v4695_v35  ;;  %v1138_v25 = vmin.f32 %v1007_v53, %v4022_v58  ;;  %v4709_v15 = vadd.s32 216, %v3774_v16  ;;  %v4712_v51 = vadd.s32 128, %v3774_v16  ;;  %v4715_v2 = vadd.f32 1.0, %v1450_v46 }
 0x21c   : > { %6011 = vst [vmem:[#allocation57_spill] sm:$0xff] %v4703_v49  ;;  %1997 = vperm.xlu1 %3109, %v6012_v41   ;;  %v4717_v37 = vadd.f32 1.0, %v1403_v4  ;;  %v6016_v35 = vmax.f32 %v6015_v23, %v3822_v13  ;;  %v4722_v49 = vadd.f32 1.0, %v1404_v18  ;;  %v6017_v53 = vmax.f32 %v6015_v23, %v3825_v11  ;;  %v1197_v8 = vpop.permute.xlu1 %1196 }
 0x21d   : > { %6013 = vst [vmem:[#allocation24_spill] sm:$0xff] %v4709_v15  ;;  %6014 = vst [vmem:[#allocation82_spill] sm:$0xff] %v4712_v51  ;;  %v1333_v15 = vmin.f32 %v1189_v5, %v3979_v30  ;;  %v1023_v51 = vpop.permute.xlu0 %1022  ;;  %v6018_v31 = vmax.f32 %v4587_v22, 0.0  ;;  %v4738_v23 = vadd.f32 1.0, %v1454_v38  ;;  %v1141_v22 = vmin.f32 %v1015_v28, %v4019_v63 }
 0x21e   : > { %v1407_v59 = vsub.f32 %v1133_v1, %v6016_v35  ;;  %v1408_v41 = vsub.f32 %v1134_v3, %v6017_v53  ;;  %v6021_v1 = vmax.f32 %v6020_v14, %v3822_v13  ;;  %v1334_v35 = vmin.f32 %v1189_v5, %v3992_v48 }
 0x21f   : > { %v4730_v46 = vmul.f32 %v6018_v31, %v1570_v21  ;;  %v6022_v3 = vmax.f32 %v6020_v14, %v3825_v11  ;;  %v4745_v21 = vadd.s32 232, %v3774_v16  ;;  %v6025_v14 = vld [vmem:[#allocation70_spill] sm:$0xff]  ;;  %v4761_v31 = vadd.f32 1.0, %v1458_v10 }
 0x220   : > { %v1411_v18 = vsub.f32 %v1137_v19, %v6021_v1  ;;  %v4749_v4 = vadd.f32 1.0, %v1407_v59  ;;  %v4752_v19 = vadd.s32 144, %v3774_v16  ;;  %v4755_v5 = vadd.f32 1.0, %v1408_v41 }
 0x221   : > { %6019 = vst [vmem:[#allocation12_spill] sm:$0xff] %v4730_v46  ;;  %v1412_v53 = vsub.f32 %v1138_v25, %v6022_v3  ;;  %6023 = vst [vmem:[#allocation59_spill] sm:$0xff] %v4745_v21  ;;  %v6026_v25 = vld [vmem:[#allocation93_spill] sm:$0xff]  ;;  %v1142_v46 = vmin.f32 %v1015_v28, %v4022_v58  ;;  %v1201_v21 = vpop.permute.xlu1 %1200  ;;  %v1031_v43 = vpop.permute.xlu0 %1030  ;;  %v6028_v59 = vmax.f32 %v6025_v14, %v3869_v55  ;;  %v4779_v47 = vadd.s32 248, %v3774_v16 }
 0x222   : > { %6024 = vst [vmem:[#allocation25_spill] sm:$0xff] %v4752_v19  ;;  %v6027_v1 = vmax.f32 %v6025_v14, %v6026_v25  ;;  %v4763_v52 = vadd.f32 1.0, %v1411_v18  ;;  %v1337_v38 = vmin.f32 %v1197_v8, %v3979_v30  ;;  %v1145_v18 = vmin.f32 %v1023_v51, %v4019_v63 }
 0x223   : > { %v1590_v19 = vsub.f32 %v1334_v35, %v6028_v59  ;;  %v4770_v29 = vadd.f32 1.0, %v1412_v53  ;;  %6031 = vst [vmem:[#allocation32_spill] sm:$0xff] %v4779_v47  ;;  %v4782_v35 = vadd.s32 160, %v3774_v16  ;;  %v6033_v59 = vmax.f32 %v6029_v0, %v3825_v11 }
 0x224   : > { %v1589_v3 = vsub.f32 %v1333_v15, %v6027_v1  ;;  %v6030_v15 = vmax.f32 %v6029_v0, %v3822_v13  ;;  %v1338_v1 = vmin.f32 %v1197_v8, %v3992_v48  ;;  %v1146_v8 = vmin.f32 %v1023_v51, %v4022_v58 }
 0x225   : > { %6032 = vst [vmem:[#allocation90_spill] sm:$0xff] %v4782_v35  ;;  %v1039_v41 = vpop.permute.xlu0 %1038  ;;  %v4793_v47 = vadd.f32 1.0, %v1590_v19  ;;  %v6035_v35 = vmax.f32 %v6034_v7, %v6026_v25  ;;  %v6036_v0 = vmax.f32 %v6034_v7, %v3869_v55  ;;  %v1340_v19 = vmin.f32 %v1201_v21, %v3992_v48 }
 0x226   : > { %v1415_v28 = vsub.f32 %v1141_v22, %v6030_v15  ;;  %v4785_v53 = vadd.f32 1.0, %v1589_v3  ;;  %v1416_v22 = vsub.f32 %v1142_v46, %v6033_v59  ;;  %v1209_v15 = vpop.permute.xlu1 %1208  ;;  %v1339_v46 = vmin.f32 %v1201_v21, %v3979_v30  ;;  %v6037_v59 = vld [vmem:[#allocation50_spill] sm:$0xff] }
 0x227   : > { %v1593_v14 = vsub.f32 %v1337_v38, %v6035_v35  ;;  %v1594_v51 = vsub.f32 %v1338_v1, %v6036_v0  ;;  %v6038_v10 = vmax.f32 %v6037_v59, %v3822_v13  ;;  %v1149_v42 = vmin.f32 %v1031_v43, %v4019_v63 }
 0x228   : > { %v4799_v45 = vadd.f32 1.0, %v1415_v28  ;;  %v1150_v38 = vmin.f32 %v1031_v43, %v4022_v58  ;;  %v1717_v35 = vmax.f32 %v4785_v53, 0.0  ;;  %v4812_v28 = vadd.f32 1.0, %v1416_v22  ;;  %v6040_v22 = vld [vmem:[#allocation73_spill] sm:$0xff] }
 0x229   : > { %v1419_v12 = vsub.f32 %v1145_v18, %v6038_v10  ;;  %v6039_v7 = vmax.f32 %v6037_v59, %v3825_v11  ;;  %v1343_v0 = vmin.f32 %v1209_v15, %v3979_v30  ;;  %v1047_v44 = vpop.permute.xlu0 %1046  ;;  %v1657_v18 = vadd.f32 1.0, %v1593_v14 }
 0x22a   : > { %v1217_v3 = vpop.permute.xlu1 %1216  ;;  %v1344_v21 = vmin.f32 %v1209_v15, %v3992_v48  ;;  %v1153_v17 = vmin.f32 %v1039_v41, %v4019_v63  ;;  %v4822_v53 = vadd.f32 1.0, %v1594_v51  ;;  %v6041_v54 = vmax.f32 %v6040_v22, %v6026_v25 }
 0x22b   : > { %v1420_v1 = vsub.f32 %v1146_v8, %v6039_v7  ;;  %v1154_v8 = vmin.f32 %v1039_v41, %v4022_v58  ;;  %v4828_v7 = vadd.f32 1.0, %v1419_v12  ;;  %v6043_v10 = vmax.f32 %v6040_v22, %v3869_v55 }
 0x22c   : > { %v1595_v59 = vsub.f32 %v1339_v46, %v6041_v54  ;;  %v6045_v15 = vmax.f32 %v6044_v39, %v3822_v13  ;;  %v6046_v51 = vmax.f32 %v6044_v39, %v3825_v11  ;;  %v6049_v54 = vmax.f32 %v6048_v36, %v6026_v25 }
 0x22d   : > { %6042 = vst [vmem:[#allocation61_spill] sm:$0xff] %v4828_v7  ;;  %v1596_v14 = vsub.f32 %v1340_v19, %v6043_v10  ;;  %v4839_v20 = vadd.f32 1.0, %v1420_v1  ;;  %v1347_v12 = vmin.f32 %v1217_v3, %v3979_v30  ;;  %v1348_v46 = vmin.f32 %v1217_v3, %v3992_v48  ;;  %v1055_v19 = vpop.permute.xlu0 %1054 }
 0x22e   : > { %v1423_v63 = vsub.f32 %v1149_v42, %v6045_v15  ;;  %v1424_v43 = vsub.f32 %v1150_v38, %v6046_v51  ;;  %v1599_v41 = vsub.f32 %v1343_v0, %v6049_v54  ;;  %v1225_v22 = vpop.permute.xlu1 %1224  ;;  %v1721_v62 = vmax.f32 %v1657_v18, 0.0  ;;  %v6051_v38 = vld [vmem:[#allocation52_spill] sm:$0xff] }
 0x22f   : > { %6047 = vst [vmem:[#allocation3_spill] sm:$0xff] %v4839_v20  ;;  %v6050_v42 = vmax.f32 %v6048_v36, %v3869_v55  ;;  %v6052_v1 = vmax.f32 %v6051_v38, %v3822_v13  ;;  %v1659_v0 = vadd.f32 1.0, %v1595_v59  ;;  %v6053_v54 = vmax.f32 %v6051_v38, %v3825_v11 }
 0x230   : > { %v1158_v26 = vmin.f32 %v1047_v44, %v4022_v58  ;;  %v1660_v18 = vadd.f32 1.0, %v1596_v14  ;;  %v4859_v27 = vadd.f32 1.0, %v1423_v63  ;;  %v4861_v36 = vadd.f32 1.0, %v1424_v43 }
 0x231   : > { %v1600_v39 = vsub.f32 %v1344_v21, %v6050_v42  ;;  %v1427_v15 = vsub.f32 %v1153_v17, %v6052_v1  ;;  %v1428_v3 = vsub.f32 %v1154_v8, %v6053_v54  ;;  %v1663_v13 = vadd.f32 1.0, %v1599_v41  ;;  %v6054_v17 = vld [vmem:[#allocation77_spill] sm:$0xff]  ;;  %v1063_v44 = vpop.permute.xlu0 %1062  ;;  %v6057_v41 = vld [vmem:[#allocation54_spill] sm:$0xff] }
 0x232   : > { %v6055_v42 = vmax.f32 %v6054_v17, %v6026_v25  ;;  %v6056_v38 = vmax.f32 %v6054_v17, %v3869_v55  ;;  %v1233_v1 = vpop.permute.xlu1 %1232  ;;  %v1351_v14 = vmin.f32 %v1225_v22, %v3979_v30  ;;  %v1352_v43 = vmin.f32 %v1225_v22, %v3992_v48 }
 0x233   : > { %v1664_v54 = vadd.f32 1.0, %v1600_v39  ;;  %v4870_v10 = vadd.f32 1.0, %v1427_v15  ;;  %v1723_v63 = vmax.f32 %v1659_v0, 0.0  ;;  %v4874_v21 = vadd.f32 1.0, %v1428_v3 }
 0x234   : > { %v1603_v59 = vsub.f32 %v1347_v12, %v6055_v42  ;;  %v1604_v8 = vsub.f32 %v1348_v46, %v6056_v38  ;;  %v6058_v51 = vmax.f32 %v6057_v41, %v3825_v11  ;;  %v1162_v42 = vmin.f32 %v1055_v19, %v4022_v58 }
 0x235   : > { %v1724_v17 = vmax.f32 %v1660_v18, 0.0  ;;  %v1551_v46 = vmax.f32 %v4859_v27, 0.0  ;;  %v6059_v15 = vmax.f32 %v4697_v34, 0.0  ;;  %v1727_v50 = vmax.f32 %v1663_v13, 0.0  ;;  %v1071_v20 = vpop.permute.xlu0 %1070 }
 0x236   : > { %v1432_v12 = vsub.f32 %v1158_v26, %v6058_v51  ;;  %v1667_v22 = vadd.f32 1.0, %v1603_v59  ;;  %v1668_v0 = vadd.f32 1.0, %v1604_v8  ;;  %v1241_v3 = vpop.permute.xlu1 %1240  ;;  %v6060_v7 = vmax.f32 %v4449_v9, 0.0  ;;  %v6061_v51 = vld [vmem:[#allocation79_spill] sm:$0xff]  ;;  %v6064_v8 = vld [vmem:[#allocation56_spill] sm:$0xff] }
 0x237   : > { %v4884_v38 = vmul.f32 %v1717_v35, %v6059_v15  ;;  %v1728_v26 = vmax.f32 %v1664_v54, 0.0  ;;  %v6062_v18 = vmax.f32 %v6061_v51, %v6026_v25  ;;  %v6063_v34 = vmax.f32 %v6061_v51, %v3869_v55 }
 0x238   : > { %v4888_v41 = vmul.f32 %v1721_v62, %v6060_v7  ;;  %v4898_v59 = vadd.f32 1.0, %v1432_v12  ;;  %v6065_v9 = vmax.f32 %v6064_v8, %v3825_v11  ;;  %v1355_v7 = vmin.f32 %v1233_v1, %v3979_v30 }
 0x239   : > { %v1607_v39 = vsub.f32 %v1351_v14, %v6062_v18  ;;  %v1608_v35 = vsub.f32 %v1352_v43, %v6063_v34  ;;  %v1356_v54 = vmin.f32 %v1233_v1, %v3992_v48  ;;  %v6066_v15 = vmax.f32 %v4699_v57, 0.0  ;;  %v1079_v1 = vpop.permute.xlu0 %1078 }
 0x23a   : > { %v1436_v62 = vsub.f32 %v1162_v42, %v6065_v9  ;;  %v6067_v14 = vmax.f32 %v4793_v47, 0.0  ;;  %v6068_v43 = vmax.f32 %v4717_v37, 0.0  ;;  %v6069_v12 = vmax.f32 %v4722_v49, 0.0  ;;  %v1249_v13 = vpop.permute.xlu1 %1248 }
 0x23b   : > { %v1731_v8 = vmax.f32 %v1667_v22, 0.0  ;;  %v1732_v42 = vmax.f32 %v1668_v0, 0.0  ;;  %v1359_v9 = vmin.f32 %v1241_v3, %v3979_v30  ;;  %v6070_v57 = vmax.f32 %v4682_v56, 0.0  ;;  %v6072_v0 = vld [vmem:[#allocation81_spill] sm:$0xff] }
 0x23c   : > { %v4909_v18 = vmul.f32 %v6067_v14, %v6066_v15  ;;  %v4913_v51 = vmul.f32 %v1723_v63, %v6068_v43  ;;  %v4917_v34 = vmul.f32 %v1724_v17, %v6069_v12  ;;  %v6071_v47 = vmax.f32 %v4599_v6, 0.0 }
 0x23d   : > { %v1671_v14 = vadd.f32 1.0, %v1607_v39  ;;  %v1672_v37 = vadd.f32 1.0, %v1608_v35  ;;  %v1166_v63 = vmin.f32 %v1063_v44, %v4022_v58  ;;  %v1360_v49 = vmin.f32 %v1241_v3, %v3992_v48 }
 0x23e   : > { %v4924_v15 = vmul.f32 %v6071_v47, %v6070_v57  ;;  %v4929_v22 = vadd.f32 1.0, %v1436_v62  ;;  %v6073_v43 = vmax.f32 %v6072_v0, %v6026_v25  ;;  %v6074_v56 = vmax.f32 %v4749_v4, 0.0  ;;  %v6076_v62 = vld [vmem:[#allocation83_spill] sm:$0xff]  ;;  %v1257_v17 = vpop.permute.xlu1 %1256 }
 0x23f   : > { %v6075_v6 = vmax.f32 %v6072_v0, %v3869_v55  ;;  %v1170_v44 = vmin.f32 %v1071_v20, %v4022_v58  ;;  %v1363_v3 = vmin.f32 %v1249_v13, %v3979_v30  ;;  %v1364_v35 = vmin.f32 %v1249_v13, %v3992_v48 }
 0x240   : > { %v1611_v12 = vsub.f32 %v1355_v7, %v6073_v43  ;;  %v4936_v19 = vmul.f32 %v1727_v50, %v6074_v56  ;;  %v6077_v57 = vmax.f32 %v6076_v62, %v6026_v25  ;;  %v1087_v7 = vpop.permute.xlu0 %1086  ;;  %v6078_v4 = vmax.f32 %v4755_v5, 0.0  ;;  %v6081_v56 = vld [vmem:[#allocation58_spill] sm:$0xff] }
 0x241   : > { %v1612_v39 = vsub.f32 %v1356_v54, %v6075_v6  ;;  %v6079_v43 = vmax.f32 %v4763_v52, 0.0  ;;  %v6080_v20 = vmax.f32 %v4770_v29, 0.0  ;;  %v1735_v30 = vmax.f32 %v1671_v14, 0.0 }
 0x242   : > { %v1615_v47 = vsub.f32 %v1359_v9, %v6077_v57  ;;  %v4949_v50 = vmul.f32 %v1728_v26, %v6078_v4  ;;  %v1736_v13 = vmax.f32 %v1672_v37, 0.0  ;;  %v6082_v6 = vmax.f32 %v6081_v56, %v3825_v11 }
 0x243   : > { %v4953_v0 = vmul.f32 %v1731_v8, %v6079_v43  ;;  %v4957_v54 = vmul.f32 %v1732_v42, %v6080_v20  ;;  %v6083_v57 = vmax.f32 %v6076_v62, %v3869_v55  ;;  %v1564_v26 = vmax.f32 %v4929_v22, 0.0  ;;  %v6084_v42 = vld [vmem:[#allocation60_spill] sm:$0xff]  ;;  %v6086_v43 = vld [vmem:[#allocation86_spill] sm:$0xff] }
 0x244   : > { %v1440_v9 = vsub.f32 %v1166_v63, %v6082_v6  ;;  %v1675_v4 = vadd.f32 1.0, %v1611_v12  ;;  %v1174_v52 = vmin.f32 %v1079_v1, %v4022_v58  ;;  %v1368_v8 = vmin.f32 %v1257_v17, %v3992_v48  ;;  %v1265_v6 = vpop.permute.xlu1 %1264  ;;  %v1095_v1 = vpop.permute.xlu0 %1094 }
 0x245   : > { %v1616_v5 = vsub.f32 %v1360_v49, %v6083_v57  ;;  %v1676_v29 = vadd.f32 1.0, %v1612_v39  ;;  %v6085_v14 = vmax.f32 %v6084_v42, %v3825_v11  ;;  %v6087_v20 = vmax.f32 %v6086_v43, %v6026_v25 }
 0x246   : > { %v6088_v62 = vmax.f32 %v6086_v43, %v3869_v55  ;;  %v1679_v56 = vadd.f32 1.0, %v1615_v47  ;;  %v1178_v12 = vmin.f32 %v1087_v7, %v4022_v58  ;;  %v6089_v17 = vmax.f32 %v4715_v2, 0.0 }
 0x247   : > { %v1444_v37 = vsub.f32 %v1170_v44, %v6085_v14  ;;  %v1619_v63 = vsub.f32 %v1363_v3, %v6087_v20  ;;  %v6090_v39 = vmax.f32 %v4619_v33, 0.0  ;;  %v6091_v44 = vmax.f32 %v4738_v23, 0.0  ;;  %v6096_v20 = vld [vmem:[#allocation62_spill] sm:$0xff] }
 0x248   : > { %v1620_v49 = vsub.f32 %v1364_v35, %v6088_v62  ;;  %v6092_v25 = vmax.f32 %v4637_v24, 0.0  ;;  %v4990_v42 = vadd.f32 1.0, %v1440_v9  ;;  %v1680_v35 = vadd.f32 1.0, %v1616_v5  ;;  %v6098_v62 = vld [vmem:[#allocation89_spill] sm:$0xff] }
 0x249   : > { %v4982_v57 = vmul.f32 %v6090_v39, %v6089_v17  ;;  %v6093_v47 = vmax.f32 %v4799_v45, 0.0  ;;  %v6094_v14 = vmax.f32 %v4466_v40, 0.0  ;;  %v6095_v2 = vmax.f32 %v4822_v53, 0.0  ;;  %v6100_v53 = vld [vmem:[#allocation64_spill] sm:$0xff] }
 0x24a   : > { %v4988_v3 = vmul.f32 %v6092_v25, %v6091_v44  ;;  %v1739_v43 = vmax.f32 %v1675_v4, 0.0  ;;  %v6097_v23 = vmax.f32 %v6096_v20, %v3825_v11  ;;  %v6099_v9 = vmax.f32 %v6098_v62, %v3869_v55 }
 0x24b   : > { %v4994_v7 = vmul.f32 %v1735_v30, %v6093_v47  ;;  %v5000_v33 = vmul.f32 %v6095_v2, %v6094_v14  ;;  %v1372_v5 = vmin.f32 %v1265_v6, %v3992_v48  ;;  %v1740_v45 = vmax.f32 %v1676_v29, 0.0  ;;  %v1273_v14 = vpop.permute.xlu1 %1272 }
 0x24c   : > { %v1448_v24 = vsub.f32 %v1174_v52, %v6097_v23  ;;  %v1624_v17 = vsub.f32 %v1368_v8, %v6099_v9  ;;  %v5009_v30 = vadd.f32 1.0, %v1444_v37  ;;  %v1683_v39 = vadd.f32 1.0, %v1619_v63  ;;  %v1103_v52 = vpop.permute.xlu0 %1102 }
 0x24d   : > { %v1684_v40 = vadd.f32 1.0, %v1620_v49  ;;  %v1743_v44 = vmax.f32 %v1679_v56, 0.0  ;;  %v6101_v25 = vmax.f32 %v6100_v53, %v3825_v11  ;;  %v1182_v47 = vmin.f32 %v1095_v1, %v4022_v58  ;;  %v6106_v1 = vld [vmem:[#allocation61_spill] sm:$0xff] }
 0x24e   : > { %v6102_v2 = vmax.f32 %v4761_v31, 0.0  ;;  %v6103_v8 = vmax.f32 %v4673_v61, 0.0  ;;  %v1568_v29 = vmax.f32 %v4990_v42, 0.0  ;;  %v1744_v37 = vmax.f32 %v1680_v35, 0.0 }
 0x24f   : > { %v1452_v4 = vsub.f32 %v1178_v12, %v6101_v25  ;;  %v1376_v63 = vmin.f32 %v1273_v14, %v3992_v48  ;;  %vm2316_vm0 = vcmp.gt.s32.totalorder %v4339_v32, %v3774_v16  ;;  %v6104_v49 = vmax.f32 %v4812_v28, 0.0  ;;  %v6108_v25 = vld [vmem:[#allocation3_spill] sm:$0xff] }
 0x250   : > { %v5019_v20 = vmul.f32 %v6103_v8, %v6102_v2  ;;  %v5029_v12 = vadd.f32 1.0, %v1448_v24  ;;  %v1688_v6 = vadd.f32 1.0, %v1624_v17  ;;  %v6105_v61 = vmax.f32 %v3857_v60, %v3869_v55  ;;  %v6110_v24 = vld [vmem:[#allocation66_spill] sm:$0xff]  ;;  %v1848_v8 = vpop.permute.xlu0 %1847 }
 0x251   : > { %v5027_v56 = vmul.f32 %v1736_v13, %v6104_v49  ;;  %v6107_v23 = vmax.f32 %v6106_v1, 0.0  ;;  %v1572_v35 = vmax.f32 %v5009_v30, 0.0  ;;  %v1747_v9 = vmax.f32 %v1683_v39, 0.0  ;;  %v6112_v39 = vld [vmem:[#allocation26_spill] sm:$0xff]  ;;  %v6115_v1 = vld [vmem:[#allocation36_spill] sm:$0xff] }
 0x252   : > { %v1628_v31 = vsub.f32 %v1372_v5, %v6105_v61  ;;  %v1748_v53 = vmax.f32 %v1684_v40, 0.0  ;;  %v6109_v14 = vmax.f32 %v6108_v25, 0.0  ;;  %v5043_v13 = vadd.f32 1.0, %v1452_v4  ;;  %v1281_v5 = vpop.permute.xlu1 %1280  ;;  %v6114_v4 = vld [vmem:[#allocation35_spill] sm:$0xff]  ;;  %v6118_v25 = vld [vmem:[#allocation13_spill] sm:$0xff] }
 0x253   : > { %v5036_v62 = vmul.f32 %v1739_v43, %v6107_v23  ;;  %v6111_v17 = vmax.f32 %v6110_v24, %v3825_v11  ;;  %v1186_v60 = vmin.f32 %v1103_v52, %v4022_v58  ;;  %v5051_v43 = vmul.f32 %v1743_v44, %v1551_v46  ;;  %v6117_v44 = vld [vmem:[#allocation17_spill] sm:$0xff] }
 0x254   : > { %v5041_v28 = vmul.f32 %v1740_v45, %v6109_v14  ;;  %v6113_v40 = vmax.f32 %v6112_v39, %v3869_v55  ;;  %v1380_v45 = vmin.f32 %v1281_v5, %v3992_v48  ;;  %v2024_v61 = vadd.f32 %v6114_v4, %v1848_v8 }
 0x255   : > { %v1456_v2 = vsub.f32 %v1182_v47, %v6111_v17  ;;  %vm2322_vm1 = vcmp.gt.s32.totalorder %v4339_v32, %v6115_v1  ;;  %v6116_v47 = vmax.f32 %v4861_v36, 0.0  ;;  %v1576_v52 = vmax.f32 %v5029_v12, 0.0 }
 0x256   : > { %v1632_v49 = vsub.f32 %v1376_v63, %v6113_v40  ;;  %v1752_v27 = vmax.f32 %v1688_v6, 0.0  ;;  %v1692_v46 = vadd.f32 1.0, %v1628_v31  ;;  %v2025_v23 = vadd.f32 %v6117_v44, %v1848_v8  ;;  %v6122_v31 = vld [vmem:[#allocation68_spill] sm:$0xff] }
 0x257   : > { %v5062_v58 = vmul.f32 %v1744_v37, %v6116_v47  ;;  %v6119_v63 = vmax.f32 %v6118_v25, %v3869_v55  ;;  %v2088_v24 = vsub.f32 %v2024_v61, %v4884_v38  ;;  %v6120_v17 = vmax.f32 %v4870_v10, 0.0  ;;  %v1289_v47 = vpop.permute.xlu1 %1288  ;;  %v1863_v61 = vpop.permute.xlu0 %1862 }
 0x258   : > { %v6121_v36 = vmax.f32 %v4874_v21, 0.0  ;;  %v1580_v39 = vmax.f32 %v5043_v13, 0.0  ;;  %v5079_v6 = vadd.f32 1.0, %v1456_v2  ;;  %v6123_v8 = vmax.f32 %v6122_v31, %v3825_v11  ;;  %v6124_v2 = vld [vmem:[#allocation18_spill] sm:$0xff] }
 0x259   : > { %v1636_v14 = vsub.f32 %v1380_v45, %v6119_v63  ;;  %v5072_v5 = vmul.f32 %v1747_v9, %v6120_v17  ;;  %v2089_v45 = vsub.f32 %v2025_v23, %v4909_v18  ;;  %v1696_v25 = vadd.f32 1.0, %v1632_v49  ;;  %v6126_v49 = vld [vmem:[#allocation14_spill] sm:$0xff] }
 0x25a   : > { %v5076_v37 = vmul.f32 %v1748_v53, %v6121_v36  ;;  %v1460_v40 = vsub.f32 %v1186_v60, %v6123_v8  ;;  %v2188_v10 = vmul.f32 0.7, %v2088_v24  ;;  %v1384_v9 = vmin.f32 %v1289_v47, %v3992_v48 }
 0x25b   : > { %v2030_v21 = vadd.f32 %v6114_v4, %v1863_v61  ;;  %v1756_v53 = vmax.f32 %v1692_v46, 0.0  ;;  %v2189_v63 = vmul.f32 0.7, %v2089_v45  ;;  %v2031_v17 = vadd.f32 %v6117_v44, %v1863_v61  ;;  %v5107_v45 = vld [vmem:[#allocation2 + $0x100] sm:$0xff] }
 0x25c   : > { %vm2326_vm2 = vcmp.gt.s32.totalorder %v4339_v32, %v6124_v2  ;;  %v6125_v11 = vmax.f32 %v4898_v59, 0.0  ;;  %v1700_v23 = vadd.f32 1.0, %v1636_v14  ;;  %vm2252_vm3 = vcmp.gt.f32.partialorder %v4884_v38, %v2188_v10  ;;  %v1873_v38 = vpop.permute.xlu0 %1872  ;;  %v6135_v2 = vld [vmem:[#allocation87_spill] sm:$0xff] }
 0x25d   : > { %v6127_v24 = vmax.f32 %v6126_v49, %v3869_v55  ;;  %v2094_v31 = vsub.f32 %v2030_v21, %v4913_v51  ;;  %v1584_v46 = vmax.f32 %v5079_v6, 0.0  ;;  %v5100_v8 = vadd.f32 1.0, %v1460_v40  ;;  %vm2380_vm5 = vmand %vm2252_vm3, %vm2316_vm0  ;;  %v6128_v40 = vld [vmem:[#allocation38_spill] sm:$0xff]  ;;  %v6129_v49 = vld [vmem:[#allocation33_spill] sm:$0xff] }
 0x25e   : > { %v5092_v60 = vmul.f32 %v1752_v27, %v6125_v11  ;;  %vm2253_vm4 = vcmp.gt.f32.partialorder %v4909_v18, %v2189_v63  ;;  %v2095_v59 = vsub.f32 %v2031_v17, %v4917_v34  ;;  %v1297_v27 = vpop.permute.xlu1 %1296  ;;  %v1760_v14 = vmax.f32 %v1696_v25, 0.0 }
 0x25f   : > { %v1640_v36 = vsub.f32 %v1384_v9, %v6127_v24  ;;  %v2444_v47 = vsel %vm2380_vm5, 1.0, %v5107_v45  ;;  %v2445_v61 = vsel %vm2253_vm4, 1.0, %v5107_v45  ;;  %v2194_v10 = vmul.f32 0.7, %v2094_v31 }
 0x260   : > { %vm2330_vm6 = vcmp.gt.s32.totalorder %v4339_v32, %v6128_v40  ;;  %2508 = vst [vmem:[#allocation2] sm:$0xff] %v2444_v47  ;;  %2509 = vst [vmem:[#allocation2 + $0x8] sm:$0xff] %v2445_v61  ;;  %v2195_v18 = vmul.f32 0.7, %v2095_v59  ;;  %v1388_v9 = vmin.f32 %v1297_v27, %v3992_v48  ;;  %v2034_v21 = vadd.f32 %v6114_v4, %v1873_v38  ;;  %v6131_v47 = vld [vmem:[#allocation72_spill] sm:$0xff] }
 0x261   : > { %v2035_v63 = vadd.f32 %v6117_v44, %v1873_v38  ;;  %v1764_v25 = vmax.f32 %v1700_v23, 0.0  ;;  %v1704_v17 = vadd.f32 1.0, %v1640_v36  ;;  %vm2258_vm7 = vcmp.gt.f32.partialorder %v4913_v51, %v2194_v10  ;;  %v1883_v51 = vpop.permute.xlu0 %1882 }
 0x262   : > { %v5119_v11 = vmul.f32 %v1756_v53, %v1564_v26  ;;  %vm2259_vm8 = vcmp.gt.f32.partialorder %v4917_v34, %v2195_v18  ;;  %vm2386_vm9 = vmand %vm2258_vm7, %vm2322_vm1  ;;  %v6130_v24 = vmax.f32 %v6129_v49, %v3869_v55  ;;  %v2098_v59 = vsub.f32 %v2034_v21, %v4936_v19  ;;  %v1305_v36 = vpop.permute.xlu1 %1304 }
 0x263   : > { %v2099_v23 = vsub.f32 %v2035_v63, %v4949_v50  ;;  %v2450_v22 = vsel %vm2386_vm9, 1.0, %v5107_v45  ;;  %v2451_v26 = vsel %vm2259_vm8, 1.0, %v5107_v45  ;;  %v1392_v34 = vmin.f32 %v1305_v36, %v3992_v48 }
 0x264   : > { %v1644_v31 = vsub.f32 %v1388_v9, %v6130_v24  ;;  %v2038_v53 = vadd.f32 %v6114_v4, %v1883_v51  ;;  %2514 = vst [vmem:[#allocation2 + $0x30] sm:$0xff] %v2450_v22  ;;  %2515 = vst [vmem:[#allocation2 + $0x38] sm:$0xff] %v2451_v26  ;;  %v2198_v1 = vmul.f32 0.7, %v2098_v59  ;;  %v2039_v38 = vadd.f32 %v6117_v44, %v1883_v51  ;;  %v6132_v9 = vld [vmem:[#allocation15_spill] sm:$0xff]  ;;  %v6136_v51 = vld [vmem:[#allocation34_spill] sm:$0xff] }
 0x265   : > { %v2199_v27 = vmul.f32 0.7, %v2099_v23  ;;  %vm2334_vm10 = vcmp.gt.s32.totalorder %v4339_v32, %v6131_v47  ;;  %v5139_v61 = vmul.f32 %v1760_v14, %v1568_v29  ;;  %v1768_v10 = vmax.f32 %v1704_v17, 0.0  ;;  %v1893_v23 = vpop.permute.xlu0 %1892 }
 0x266   : > { %v1708_v18 = vadd.f32 1.0, %v1644_v31  ;;  %v6133_v21 = vmax.f32 %v6132_v9, %v3869_v55  ;;  %v2102_v49 = vsub.f32 %v2038_v53, %v4953_v0  ;;  %vm2262_vm11 = vcmp.gt.f32.partialorder %v4936_v19, %v2198_v1  ;;  %v1313_v59 = vpop.permute.xlu1 %1312 }
 0x267   : > { %vm2263_vm12 = vcmp.gt.f32.partialorder %v4949_v50, %v2199_v27  ;;  %v2103_v24 = vsub.f32 %v2039_v38, %v4957_v54  ;;  %v5150_v42 = vmul.f32 %v1764_v25, %v1572_v35  ;;  %vm2390_vm13 = vmand %vm2262_vm11, %vm2326_vm2  ;;  %v1396_v19 = vmin.f32 %v1313_v59, %v3992_v48  ;;  %v6134_v50 = vld [vmem:[#allocation74_spill] sm:$0xff] }
 0x268   : > { %v1648_v63 = vsub.f32 %v1392_v34, %v6133_v21  ;;  %v2455_v29 = vsel %vm2263_vm12, 1.0, %v5107_v45  ;;  %v2202_v17 = vmul.f32 0.7, %v2102_v49  ;;  %vm2338_vm14 = vcmp.gt.s32.totalorder %v4339_v32, %v6134_v50 }
 0x269   : > { %v2454_v31 = vsel %vm2390_vm13, 1.0, %v5107_v45  ;;  %2519 = vst [vmem:[#allocation2 + $0x58] sm:$0xff] %v2455_v29  ;;  %v2203_v30 = vmul.f32 0.7, %v2103_v24  ;;  %v2042_v35 = vadd.f32 %v6114_v4, %v1893_v23  ;;  %v2043_v25 = vadd.f32 %v6117_v44, %v1893_v23  ;;  %v1903_v1 = vpop.permute.xlu0 %1902  ;;  %v6139_v23 = vld [vmem:[#allocation37_spill] sm:$0xff] }
 0x26a   : > { %v5156_v14 = vadd.f32 1.0, %v1648_v63  ;;  %vm2318_vm15 = vcmp.gt.s32.totalorder %v4339_v32, %v6135_v2  ;;  %v1772_v36 = vmax.f32 %v1708_v18, 0.0  ;;  %2518 = vst [vmem:[#allocation2 + $0x50] sm:$0xff] %v2454_v31  ;;  %vm2266_vm0 = vcmp.gt.f32.partialorder %v4953_v0, %v2202_v17  ;;  %v1853_v38 = vpop.permute.xlu1 %1852  ;;  %v6141_v31 = vld [vmem:[#allocation19_spill] sm:$0xff] }
 0x26b   : > { %v6137_v48 = vmax.f32 %v6136_v51, %v3869_v55  ;;  %v5172_v26 = vmul.f32 %v1768_v10, %v1576_v52  ;;  %vm2267_vm1 = vcmp.gt.f32.partialorder %v4957_v54, %v2203_v30  ;;  %vm2394_vm2 = vmand %vm2266_vm0, %vm2330_vm6  ;;  %v2106_v53 = vsub.f32 %v2042_v35, %v4994_v7  ;;  %v6138_v10 = vld [vmem:[#allocation6_spill] sm:$0xff] }
 0x26c   : > { %v1776_v34 = vmax.f32 %v5156_v14, 0.0  ;;  %v2107_v0 = vsub.f32 %v2043_v25, %v5027_v56  ;;  %v2458_v55 = vsel %vm2394_vm2, 1.0, %v5107_v45  ;;  %v2459_v27 = vsel %vm2267_vm1, 1.0, %v5107_v45 }
 0x26d   : > { %v1652_v22 = vsub.f32 %v1396_v19, %v6137_v48  ;;  %v2046_v52 = vadd.f32 %v6114_v4, %v1903_v1  ;;  %vm2342_vm3 = vcmp.gt.s32.totalorder %v4339_v32, %v6138_v10  ;;  %2522 = vst [vmem:[#allocation2 + $0x70] sm:$0xff] %v2458_v55  ;;  %2523 = vst [vmem:[#allocation2 + $0x78] sm:$0xff] %v2459_v27  ;;  %v2206_v54 = vmul.f32 0.7, %v2106_v53  ;;  %v1913_v17 = vpop.permute.xlu0 %1912  ;;  %v6140_v19 = vld [vmem:[#allocation91_spill] sm:$0xff]  ;;  %v6143_v55 = vld [vmem:[#allocation92_spill] sm:$0xff] }
 0x26e   : > { %v2207_v40 = vmul.f32 0.7, %v2107_v0  ;;  %v2047_v18 = vadd.f32 %v6117_v44, %v1903_v1  ;;  %v2026_v9 = vadd.f32 %v6114_v4, %v1853_v38  ;;  %v2027_v49 = vadd.f32 %v6117_v44, %v1853_v38  ;;  %v6142_v53 = vld [vmem:[#allocation7_spill] sm:$0xff] }
 0x26f   : > { %v5183_v12 = vadd.f32 1.0, %v1652_v22  ;;  %v2110_v63 = vsub.f32 %v2046_v52, %v5036_v62  ;;  %v5195_v24 = vmul.f32 %v1772_v36, %v1580_v39  ;;  %vm2270_vm4 = vcmp.gt.f32.partialorder %v4994_v7, %v2206_v54 }
 0x270   : > { %vm2271_vm5 = vcmp.gt.f32.partialorder %v5027_v56, %v2207_v40  ;;  %v2111_v59 = vsub.f32 %v2047_v18, %v5041_v28  ;;  %v2090_v29 = vsub.f32 %v2026_v9, %v6139_v23  ;;  %vm2320_vm6 = vcmp.gt.s32.totalorder %v4339_v32, %v6140_v19  ;;  %vm2398_vm7 = vmand %vm2270_vm4, %vm2334_vm10  ;;  %v1858_v56 = vpop.permute.xlu1 %1857 }
 0x271   : > { %v1780_v21 = vmax.f32 %v5183_v12, 0.0  ;;  %v2463_v13 = vsel %vm2271_vm5, 1.0, %v5107_v45  ;;  %v2210_v39 = vmul.f32 0.7, %v2110_v63  ;;  %v2091_v30 = vsub.f32 %v2027_v49, %v6141_v31  ;;  %v1923_v1 = vpop.permute.xlu0 %1922  ;;  %v6144_v49 = vld [vmem:[#allocation8_spill] sm:$0xff] }
 0x272   : > { %v2050_v7 = vadd.f32 %v6114_v4, %v1913_v17  ;;  %v2462_v35 = vsel %vm2398_vm7, 1.0, %v5107_v45  ;;  %2527 = vst [vmem:[#allocation2 + $0x98] sm:$0xff] %v2463_v13  ;;  %v2211_v25 = vmul.f32 0.7, %v2111_v59  ;;  %v2190_v36 = vmul.f32 0.7, %v2090_v29 }
 0x273   : > { %v2051_v51 = vadd.f32 %v6117_v44, %v1913_v17  ;;  %2526 = vst [vmem:[#allocation2 + $0x90] sm:$0xff] %v2462_v35  ;;  %vm2274_vm8 = vcmp.gt.f32.partialorder %v5036_v62, %v2210_v39  ;;  %v2191_v47 = vmul.f32 0.7, %v2091_v30  ;;  %v2028_v22 = vadd.f32 %v6114_v4, %v1858_v56  ;;  %v6145_v59 = vld [vmem:[#allocation94_spill] sm:$0xff]  ;;  %v6146_v13 = vld [vmem:[#allocation9_spill] sm:$0xff] }
 0x274   : > { %v2114_v48 = vsub.f32 %v2050_v7, %v5051_v43  ;;  %vm2346_vm9 = vcmp.gt.s32.totalorder %v4339_v32, %v6142_v53  ;;  %vm2275_vm10 = vcmp.gt.f32.partialorder %v5041_v28, %v2211_v25  ;;  %vm2402_vm11 = vmand %vm2274_vm8, %vm2338_vm14  ;;  %vm2254_vm12 = vcmp.gt.f32.partialorder %v6139_v23, %v2190_v36  ;;  %v1868_v50 = vpop.permute.xlu1 %1867  ;;  %v6148_v25 = vld [vmem:[#allocation39_spill] sm:$0xff] }
 0x275   : > { %v2115_v0 = vsub.f32 %v2051_v51, %v5062_v58  ;;  %v2029_v62 = vadd.f32 %v6117_v44, %v1858_v56  ;;  %vm2324_vm13 = vcmp.gt.s32.totalorder %v4339_v32, %v6143_v55  ;;  %v2466_v27 = vsel %vm2402_vm11, 1.0, %v5107_v45  ;;  %vm2382_vm14 = vmand %vm2254_vm12, %vm2318_vm15  ;;  %v1933_v17 = vpop.permute.xlu0 %1932  ;;  %v6147_v56 = vld [vmem:[#allocation20_spill] sm:$0xff] }
 0x276   : > { %v2467_v52 = vsel %vm2275_vm10, 1.0, %v5107_v45  ;;  %vm2255_vm0 = vcmp.gt.f32.partialorder %v6141_v31, %v2191_v47  ;;  %v2214_v28 = vmul.f32 0.7, %v2114_v48  ;;  %2530 = vst [vmem:[#allocation2 + $0xb0] sm:$0xff] %v2466_v27  ;;  %v2446_v38 = vsel %vm2382_vm14, 1.0, %v5107_v45 }
 0x277   : > { %2531 = vst [vmem:[#allocation2 + $0xb8] sm:$0xff] %v2467_v52  ;;  %v2447_v54 = vsel %vm2255_vm0, 1.0, %v5107_v45  ;;  %v2215_v40 = vmul.f32 0.7, %v2115_v0  ;;  %v2092_v18 = vsub.f32 %v2028_v22, %v4888_v41  ;;  %2510 = vst [vmem:[#allocation2 + $0x10] sm:$0xff] %v2446_v38  ;;  %v2093_v9 = vsub.f32 %v2029_v62, %v5000_v33  ;;  %v6149_v22 = vld [vmem:[#allocation78_spill] sm:$0xff] }
 0x278   : > { %2511 = vst [vmem:[#allocation2 + $0x18] sm:$0xff] %v2447_v54  ;;  %vm2278_vm1 = vcmp.gt.f32.partialorder %v5051_v43, %v2214_v28  ;;  %v2054_v2 = vadd.f32 %v6114_v4, %v1923_v1  ;;  %v2055_v63 = vadd.f32 %v6117_v44, %v1923_v1  ;;  %vm2351_vm15 = vcmp.gt.s32.totalorder %v6145_v59, %v6144_v49  ;;  %v1878_v7 = vpop.permute.xlu1 %1877  ;;  %v6150_v28 = vld [vmem:[#allocation53_spill] sm:$0xff]  ;;  %v6157_v49 = vld [vmem:[#allocation55_spill] sm:$0xff] }
 0x279   : > { %vm2279_vm2 = vcmp.gt.f32.partialorder %v5062_v58, %v2215_v40  ;;  %vm2406_vm4 = vmand %vm2278_vm1, %vm2342_vm3  ;;  %v2192_v23 = vmul.f32 0.7, %v2092_v18  ;;  %v2032_v29 = vadd.f32 %v6114_v4, %v1868_v50  ;;  %v2033_v43 = vadd.f32 %v6117_v44, %v1868_v50  ;;  %v1943_v27 = vpop.permute.xlu0 %1942  ;;  %v6151_v38 = vld [vmem:[#allocation21_spill] sm:$0xff]  ;;  %v6152_v40 = vld [vmem:[#allocation95_spill] sm:$0xff] }
 0x27a   : > { %vm2328_vm5 = vcmp.gt.s32.totalorder %v4339_v32, %v6146_v13  ;;  %v2470_v39 = vsel %vm2406_vm4, 1.0, %v5107_v45  ;;  %v2471_v31 = vsel %vm2279_vm2, 1.0, %v5107_v45  ;;  %v2193_v30 = vmul.f32 0.7, %v2093_v9  ;;  %v6158_v13 = vld [vmem:[#allocation5_spill] sm:$0xff] }
 0x27b   : > { %v2118_v58 = vsub.f32 %v2054_v2, %v5072_v5  ;;  %2534 = vst [vmem:[#allocation2 + $0xd0] sm:$0xff] %v2470_v39  ;;  %2535 = vst [vmem:[#allocation2 + $0xd8] sm:$0xff] %v2471_v31  ;;  %vm2256_vm3 = vcmp.gt.f32.partialorder %v4888_v41, %v2192_v23  ;;  %v2119_v10 = vsub.f32 %v2055_v63, %v5076_v37  ;;  %v6153_v63 = vld [vmem:[#allocation40_spill] sm:$0xff] }
 0x27c   : > { %v2096_v35 = vsub.f32 %v2032_v29, %v6147_v56  ;;  %v2097_v36 = vsub.f32 %v2033_v43, %v6148_v25  ;;  %vm2257_vm7 = vcmp.gt.f32.partialorder %v5000_v33, %v2193_v30  ;;  %vm2384_vm8 = vmand %vm2256_vm3, %vm2320_vm6  ;;  %v2059_v47 = vadd.f32 %v6117_v44, %v1933_v17  ;;  %v1888_v50 = vpop.permute.xlu1 %1887  ;;  %v6154_v17 = vld [vmem:[#allocation10_spill] sm:$0xff] }
 0x27d   : > { %v2218_v51 = vmul.f32 0.7, %v2118_v58  ;;  %v2036_v48 = vadd.f32 %v6114_v4, %v1878_v7  ;;  %vm2355_vm10 = vcmp.gt.s32.totalorder %v6145_v59, %v6149_v22  ;;  %v2448_v41 = vsel %vm2384_vm8, 1.0, %v5107_v45  ;;  %v1953_v43 = vpop.permute.xlu0 %1952 }
 0x27e   : > { %v2449_v0 = vsel %vm2257_vm7, 1.0, %v5107_v45  ;;  %v2219_v62 = vmul.f32 0.7, %v2119_v10  ;;  %v2196_v1 = vmul.f32 0.7, %v2096_v35  ;;  %2512 = vst [vmem:[#allocation2 + $0x20] sm:$0xff] %v2448_v41  ;;  %v2123_v19 = vsub.f32 %v2059_v47, %v5092_v60 }
 0x27f   : > { %2513 = vst [vmem:[#allocation2 + $0x28] sm:$0xff] %v2449_v0  ;;  %vm2282_vm11 = vcmp.gt.f32.partialorder %v5072_v5, %v2218_v51  ;;  %v2197_v33 = vmul.f32 0.7, %v2097_v36  ;;  %v2037_v52 = vadd.f32 %v6117_v44, %v1878_v7  ;;  %vm2332_vm6 = vcmp.gt.s32.totalorder %v4339_v32, %v6150_v28  ;;  %v6155_v35 = vld [vmem:[#allocation22_spill] sm:$0xff]  ;;  %v6156_v36 = vld [vmem:[#allocation41_spill] sm:$0xff] }
 0x280   : > { %vm2283_vm12 = vcmp.gt.f32.partialorder %v5076_v37, %v2219_v62  ;;  %vm2410_vm0 = vmand %vm2282_vm11, %vm2346_vm9  ;;  %vm2260_vm14 = vcmp.gt.f32.partialorder %v6147_v56, %v2196_v1  ;;  %v2100_v54 = vsub.f32 %v2036_v48, %v6151_v38  ;;  %v2063_v5 = vadd.f32 %v6117_v44, %v1943_v27  ;;  %v1898_v30 = vpop.permute.xlu1 %1897 }
 0x281   : > { %vm2359_vm1 = vcmp.gt.s32.totalorder %v6145_v59, %v6152_v40  ;;  %v2474_v18 = vsel %vm2410_vm0, 1.0, %v5107_v45  ;;  %v2475_v9 = vsel %vm2283_vm12, 1.0, %v5107_v45  ;;  %vm2261_vm2 = vcmp.gt.f32.partialorder %v6148_v25, %v2197_v33  ;;  %vm2388_vm4 = vmand %vm2260_vm14, %vm2324_vm13  ;;  %v1963_v0 = vpop.permute.xlu0 %1962 }
 0x282   : > { %v2223_v37 = vmul.f32 0.7, %v2123_v19  ;;  %2538 = vst [vmem:[#allocation2 + $0xf0] sm:$0xff] %v2474_v18  ;;  %2539 = vst [vmem:[#allocation2 + $0xf8] sm:$0xff] %v2475_v9  ;;  %v2452_v53 = vsel %vm2388_vm4, 1.0, %v5107_v45  ;;  %v2453_v2 = vsel %vm2261_vm2, 1.0, %v5107_v45  ;;  %v2101_v23 = vsub.f32 %v2037_v52, %v6153_v63 }
 0x283   : > { %v2200_v29 = vmul.f32 0.7, %v2100_v54  ;;  %vm2336_vm9 = vcmp.gt.s32.totalorder %v4339_v32, %v6154_v17  ;;  %2516 = vst [vmem:[#allocation2 + $0x40] sm:$0xff] %v2452_v53  ;;  %2517 = vst [vmem:[#allocation2 + $0x48] sm:$0xff] %v2453_v2  ;;  %v2127_v55 = vsub.f32 %v2063_v5, %v5119_v11  ;;  %v2040_v39 = vadd.f32 %v6114_v4, %v1888_v50  ;;  %v6159_v52 = vld [vmem:[#allocation23_spill] sm:$0xff] }
 0x284   : > { %vm2287_vm3 = vcmp.gt.f32.partialorder %v5092_v60, %v2223_v37  ;;  %v2041_v31 = vadd.f32 %v6117_v44, %v1888_v50  ;;  %v2201_v58 = vmul.f32 0.7, %v2101_v23  ;;  %v2067_v7 = vadd.f32 %v6117_v44, %v1953_v43  ;;  %v1908_v33 = vpop.permute.xlu1 %1907  ;;  %v6161_v18 = vld [vmem:[#allocation11_spill] sm:$0xff]  ;;  %v6163_v43 = vld [vmem:[#allocation4_spill] sm:$0xff] }
 0x285   : > { %vm2415_vm13 = vmand %vm2287_vm3, %vm2351_vm15  ;;  %vm2264_vm7 = vcmp.gt.f32.partialorder %v6151_v38, %v2200_v29  ;;  %v2044_v10 = vadd.f32 %v6114_v4, %v1898_v30  ;;  %v2227_v56 = vmul.f32 0.7, %v2127_v55  ;;  %v2104_v25 = vsub.f32 %v2040_v39, %v6155_v35  ;;  %v6160_v38 = vld [vmem:[#allocation43_spill] sm:$0xff]  ;;  %v1973_v2 = vpop.permute.xlu0 %1972  ;;  %v6164_v39 = vld [vmem:[#allocation24_spill] sm:$0xff] }
 0x286   : > { %v2479_v60 = vsel %vm2415_vm13, 1.0, %v5107_v45  ;;  %vm2392_vm8 = vmand %vm2264_vm7, %vm2328_vm5  ;;  %v2105_v51 = vsub.f32 %v2041_v31, %v6156_v36  ;;  %vm2363_vm15 = vcmp.gt.s32.totalorder %v6145_v59, %v6157_v49  ;;  %vm2265_vm11 = vcmp.gt.f32.partialorder %v6153_v63, %v2201_v58  ;;  %v6162_v63 = vld [vmem:[#allocation57_spill] sm:$0xff] }
 0x287   : > { %2543 = vst [vmem:[#allocation2 + $0x118] sm:$0xff] %v2479_v60  ;;  %v2456_v47 = vsel %vm2392_vm8, 1.0, %v5107_v45  ;;  %v2131_v48 = vsub.f32 %v2067_v7, %v5139_v61  ;;  %v2045_v41 = vadd.f32 %v6117_v44, %v1898_v30  ;;  %vm2340_vm5 = vcmp.gt.s32.totalorder %v4339_v32, %v6158_v13  ;;  %v6165_v7 = vld [vmem:[#allocation45_spill] sm:$0xff] }
 0x288   : > { %v2457_v62 = vsel %vm2265_vm11, 1.0, %v5107_v45  ;;  %2520 = vst [vmem:[#allocation2 + $0x60] sm:$0xff] %v2456_v47  ;;  %vm2291_vm12 = vcmp.gt.f32.partialorder %v5119_v11, %v2227_v56  ;;  %v2204_v1 = vmul.f32 0.7, %v2104_v25  ;;  %v2205_v27 = vmul.f32 0.7, %v2105_v51 }
 0x289   : > { %2521 = vst [vmem:[#allocation2 + $0x68] sm:$0xff] %v2457_v62  ;;  %vm2419_vm0 = vmand %vm2291_vm12, %vm2355_vm10  ;;  %v2231_v19 = vmul.f32 0.7, %v2131_v48  ;;  %v2108_v50 = vsub.f32 %v2044_v10, %v6159_v52  ;;  %v2109_v54 = vsub.f32 %v2045_v41, %v6160_v38  ;;  %v2071_v5 = vadd.f32 %v6117_v44, %v1963_v0  ;;  %v6166_v56 = vld [vmem:[#allocation82_spill] sm:$0xff]  ;;  %v1983_v17 = vpop.permute.xlu0 %1982  ;;  %v6167_v0 = vld [vmem:[#allocation59_spill] sm:$0xff] }
 0x28a   : > { %vm2367_vm14 = vcmp.gt.s32.totalorder %v6145_v59, %v6161_v18  ;;  %v2483_v11 = vsel %vm2419_vm0, 1.0, %v5107_v45  ;;  %vm2268_vm2 = vcmp.gt.f32.partialorder %v6155_v35, %v2204_v1  ;;  %vm2269_vm4 = vcmp.gt.f32.partialorder %v6156_v36, %v2205_v27  ;;  %v6168_v62 = vld [vmem:[#allocation47_spill] sm:$0xff]  ;;  %v6169_v27 = vld [vmem:[#allocation84_spill] sm:$0xff] }
 0x28b   : > { %v2048_v9 = vadd.f32 %v6114_v4, %v1908_v33  ;;  %2547 = vst [vmem:[#allocation2 + $0x138] sm:$0xff] %v2483_v11  ;;  %vm2396_vm10 = vmand %vm2268_vm2, %vm2332_vm6  ;;  %v2461_v22 = vsel %vm2269_vm4, 1.0, %v5107_v45  ;;  %vm2295_vm3 = vcmp.gt.f32.partialorder %v5139_v61, %v2231_v19  ;;  %v2208_v37 = vmul.f32 0.7, %v2108_v50  ;;  %v1918_v61 = vpop.permute.xlu1 %1917  ;;  %v6170_v11 = vld [vmem:[#allocation76_spill] sm:$0xff] }
 0x28c   : > { %v2209_v53 = vmul.f32 0.7, %v2109_v54  ;;  %vm2344_vm13 = vcmp.gt.s32.totalorder %v4339_v32, %v6162_v63  ;;  %v2460_v23 = vsel %vm2396_vm10, 1.0, %v5107_v45  ;;  %2525 = vst [vmem:[#allocation2 + $0x88] sm:$0xff] %v2461_v22  ;;  %vm2423_vm7 = vmand %vm2295_vm3, %vm2359_vm1  ;;  %v2135_v28 = vsub.f32 %v2071_v5, %v5150_v42 }
 0x28d   : > { %v2049_v29 = vadd.f32 %v6117_v44, %v1908_v33  ;;  %v2112_v55 = vsub.f32 %v2048_v9, %v6163_v43  ;;  %vm2371_vm6 = vcmp.gt.s32.totalorder %v6145_v59, %v6164_v39  ;;  %2524 = vst [vmem:[#allocation2 + $0x80] sm:$0xff] %v2460_v23  ;;  %v2487_v31 = vsel %vm2423_vm7, 1.0, %v5107_v45  ;;  %v1993_v5 = vpop.permute.xlu0 %1992 }
 0x28e   : > { %vm2272_vm8 = vcmp.gt.f32.partialorder %v6159_v52, %v2208_v37  ;;  %vm2273_vm11 = vcmp.gt.f32.partialorder %v6160_v38, %v2209_v53  ;;  %v2075_v40 = vadd.f32 %v6117_v44, %v1973_v2  ;;  %2551 = vst [vmem:[#allocation2 + $0x158] sm:$0xff] %v2487_v31  ;;  %v2235_v58 = vmul.f32 0.7, %v2135_v28  ;;  %v6171_v2 = vld [vmem:[#allocation16_spill] sm:$0xff] }
 0x28f   : > { %vm2400_vm1 = vmand %vm2272_vm8, %vm2336_vm9  ;;  %v2465_v30 = vsel %vm2273_vm11, 1.0, %v5107_v45  ;;  %v2113_v10 = vsub.f32 %v2049_v29, %v6165_v7  ;;  %v2212_v60 = vmul.f32 0.7, %v2112_v55  ;;  %vm2349_vm12 = vcmp.gt.s32.totalorder %v6145_v59, %v6166_v56  ;;  %v1928_v41 = vpop.permute.xlu1 %1927 }
 0x290   : > { %v2464_v35 = vsel %vm2400_vm1, 1.0, %v5107_v45  ;;  %2529 = vst [vmem:[#allocation2 + $0xa8] sm:$0xff] %v2465_v30  ;;  %v2139_v25 = vsub.f32 %v2075_v40, %v5172_v26  ;;  %v2052_v36 = vadd.f32 %v6114_v4, %v1918_v61  ;;  %v2053_v51 = vadd.f32 %v6117_v44, %v1918_v61  ;;  %v6172_v61 = vld [vmem:[#allocation25_spill] sm:$0xff]  ;;  %v6173_v40 = vld [vmem:[#allocation80_spill] sm:$0xff] }
 0x291   : > { %2528 = vst [vmem:[#allocation2 + $0xa0] sm:$0xff] %v2464_v35  ;;  %vm2299_vm9 = vcmp.gt.f32.partialorder %v5150_v42, %v2235_v58  ;;  %v2213_v47 = vmul.f32 0.7, %v2113_v10  ;;  %vm2276_vm0 = vcmp.gt.f32.partialorder %v6163_v43, %v2212_v60  ;;  %v2079_v48 = vadd.f32 %v6117_v44, %v1983_v17  ;;  %v2003_v28 = vpop.permute.xlu0 %2002  ;;  %v6175_v60 = vld [vmem:[#allocation90_spill] sm:$0xff]  ;;  %v6176_v17 = vld [vmem:[#allocation12_spill] sm:$0xff] }
 0x292   : > { %vm2375_vm2 = vcmp.gt.s32.totalorder %v6145_v59, %v6167_v0  ;;  %vm2427_vm4 = vmand %vm2299_vm9, %vm2363_vm15  ;;  %v2239_v4 = vmul.f32 0.7, %v2139_v25  ;;  %v2116_v1 = vsub.f32 %v2052_v36, %v6168_v62  ;;  %v2117_v33 = vsub.f32 %v2053_v51, %v6169_v27 }
 0x293   : > { %v2057_v42 = vadd.f32 %v6117_v44, %v1928_v41  ;;  %v2491_v19 = vsel %vm2427_vm4, 1.0, %v5107_v45  ;;  %vm2277_vm10 = vcmp.gt.f32.partialorder %v6165_v7, %v2213_v47  ;;  %vm2404_vm3 = vmand %vm2276_vm0, %vm2340_vm5  ;;  %v2143_v52 = vsub.f32 %v2079_v48, %v5195_v24  ;;  %v6174_v7 = vld [vmem:[#allocation32_spill] sm:$0xff] }
 0x294   : > { %v1840_v49 = vmul.f32 %v1776_v34, %v1584_v46  ;;  %2555 = vst [vmem:[#allocation2 + $0x178] sm:$0xff] %v2491_v19  ;;  %v2468_v50 = vsel %vm2404_vm3, 1.0, %v5107_v45  ;;  %v2469_v38 = vsel %vm2277_vm10, 1.0, %v5107_v45  ;;  %vm2303_vm15 = vcmp.gt.f32.partialorder %v5172_v26, %v2239_v4  ;;  %v1938_v34 = vpop.permute.xlu1 %1937 }
 0x295   : > { %v2216_v54 = vmul.f32 0.7, %v2116_v1  ;;  %2532 = vst [vmem:[#allocation2 + $0xc0] sm:$0xff] %v2468_v50  ;;  %2533 = vst [vmem:[#allocation2 + $0xc8] sm:$0xff] %v2469_v38  ;;  %v2217_v13 = vmul.f32 0.7, %v2117_v33  ;;  %v2121_v14 = vsub.f32 %v2057_v42, %v6170_v11  ;;  %v2083_v46 = vadd.f32 %v6117_v44, %v1993_v5 }
 0x296   : > { %vm2431_vm5 = vmand %vm2303_vm15, %vm2367_vm14  ;;  %v2243_v6 = vmul.f32 0.7, %v2143_v52  ;;  %v1588_v9 = vmax.f32 %v5100_v8, 0.0  ;;  %v2061_v26 = vadd.f32 %v6117_v44, %v1938_v34  ;;  %v2087_v43 = vadd.f32 %v6117_v44, %v2003_v28 }
 0x297   : > { %v2495_v22 = vsel %vm2431_vm5, 1.0, %v5107_v45  ;;  %vm2280_vm7 = vcmp.gt.f32.partialorder %v6168_v62, %v2216_v54  ;;  %vm2281_vm8 = vcmp.gt.f32.partialorder %v6169_v27, %v2217_v13  ;;  %v2221_v18 = vmul.f32 0.7, %v2121_v14 }
 0x298   : > { %2559 = vst [vmem:[#allocation2 + $0x198] sm:$0xff] %v2495_v22  ;;  %vm2408_vm14 = vmand %vm2280_vm7, %vm2344_vm13  ;;  %vm2307_vm11 = vcmp.gt.f32.partialorder %v5195_v24, %v2243_v6  ;;  %v2147_v37 = vsub.f32 %v2083_v46, %v1840_v49  ;;  %v2473_v8 = vsel %vm2281_vm8, 1.0, %v5107_v45  ;;  %v2125_v23 = vsub.f32 %v2061_v26, %v6171_v2  ;;  %v1948_v55 = vpop.permute.xlu1 %1947 }
 0x299   : > { %v2472_v53 = vsel %vm2408_vm14, 1.0, %v5107_v45  ;;  %vm2435_vm1 = vmand %vm2307_vm11, %vm2371_vm6  ;;  %v1844_v29 = vmul.f32 %v1780_v21, %v1588_v9  ;;  %2537 = vst [vmem:[#allocation2 + $0xe8] sm:$0xff] %v2473_v8  ;;  %vm2285_vm13 = vcmp.gt.f32.partialorder %v6170_v11, %v2221_v18  ;;  %vm2353_vm9 = vcmp.gt.s32.totalorder %v6145_v59, %v6172_v61 }
 0x29a   : > { %2536 = vst [vmem:[#allocation2 + $0xe0] sm:$0xff] %v2472_v53  ;;  %v2499_v24 = vsel %vm2435_vm1, 1.0, %v5107_v45  ;;  %v2247_v63 = vmul.f32 0.7, %v2147_v37  ;;  %vm2413_vm6 = vmand %vm2285_vm13, %vm2349_vm12  ;;  %v2225_v12 = vmul.f32 0.7, %v2125_v23  ;;  %v2065_v21 = vadd.f32 %v6117_v44, %v1948_v55 }
 0x29b   : > { %2563 = vst [vmem:[#allocation2 + $0x1b8] sm:$0xff] %v2499_v24  ;;  %v2477_v39 = vsel %vm2413_vm6, 1.0, %v5107_v45  ;;  %v2151_v31 = vsub.f32 %v2087_v43, %v1844_v29  ;;  %vm2379_vm3 = vcmp.gt.s32.totalorder %v6145_v59, %v6174_v7  ;;  %vm2357_vm15 = vcmp.gt.s32.totalorder %v6145_v59, %v6175_v60 }
 0x29c   : > { %vm2311_vm0 = vcmp.gt.f32.partialorder %v1840_v49, %v2247_v63  ;;  %2541 = vst [vmem:[#allocation2 + $0x108] sm:$0xff] %v2477_v39  ;;  %vm2289_vm10 = vcmp.gt.f32.partialorder %v6171_v2, %v2225_v12  ;;  %v2129_v30 = vsub.f32 %v2065_v21, %v6173_v40  ;;  %v1958_v56 = vpop.permute.xlu1 %1957  ;;  %v2175_v36 = vadd.s32 176, %v3774_v16 }
 0x29d   : > { %vm2439_vm4 = vmand %vm2311_vm0, %vm2375_vm2  ;;  %v2251_v10 = vmul.f32 0.7, %v2151_v31  ;;  %v2069_v51 = vadd.f32 %v6117_v44, %v1958_v56  ;;  %v2177_v41 = vadd.s32 192, %v3774_v16  ;;  %v2179_v52 = vadd.s32 208, %v3774_v16 }
 0x29e   : > { %v2503_v58 = vsel %vm2439_vm4, 1.0, %v5107_v45  ;;  %vm2417_vm12 = vmand %vm2289_vm10, %vm2353_vm9  ;;  %v2229_v25 = vmul.f32 0.7, %v2129_v30  ;;  %vm2361_vm14 = vcmp.gt.s32.totalorder %v6145_v59, %v2175_v36  ;;  %v2181_v38 = vadd.s32 224, %v3774_v16 }
 0x29f   : > { %2567 = vst [vmem:[#allocation2 + $0x1d8] sm:$0xff] %v2503_v58  ;;  %v2481_v35 = vsel %vm2417_vm12, 1.0, %v5107_v45  ;;  %vm2315_vm2 = vcmp.gt.f32.partialorder %v1844_v29, %v2251_v10  ;;  %v2133_v47 = vsub.f32 %v2069_v51, %v6176_v17  ;;  %vm2365_vm13 = vcmp.gt.s32.totalorder %v6145_v59, %v2177_v41 }
 0x2a0   : > { %2545 = vst [vmem:[#allocation2 + $0x128] sm:$0xff] %v2481_v35  ;;  %vm2443_vm5 = vmand %vm2315_vm2, %vm2379_vm3  ;;  %vm2293_vm7 = vcmp.gt.f32.partialorder %v6173_v40, %v2229_v25  ;;  %v1968_v0 = vpop.permute.xlu1 %1967  ;;  %vm2369_vm0 = vcmp.gt.s32.totalorder %v6145_v59, %v2179_v52  ;;  %vm2373_vm12 = vcmp.gt.s32.totalorder %v6145_v59, %v2181_v38  ;;  %v2183_v34 = vadd.s32 240, %v3774_v16 }
 0x2a1   : > { %v2507_v48 = vsel %vm2443_vm5, 1.0, %v5107_v45  ;;  %vm2421_vm8 = vmand %vm2293_vm7, %vm2357_vm15  ;;  %v2233_v62 = vmul.f32 0.7, %v2133_v47  ;;  %v2073_v1 = vadd.f32 %v6117_v44, %v1968_v0  ;;  %v5459_v16 = vmov 1.0  }
 0x2a2   : > { %2571 = vst [vmem:[#allocation2 + $0x1f8] sm:$0xff] %v2507_v48  ;;  %v2485_v4 = vsel %vm2421_vm8, 1.0, %v5107_v45  ;;  %vm2377_vm2 = vcmp.gt.s32.totalorder %v6145_v59, %v2183_v34 }
 0x2a3   : > { %2549 = vst [vmem:[#allocation2 + $0x148] sm:$0xff] %v2485_v4  ;;  %vm2297_vm11 = vcmp.gt.f32.partialorder %v6176_v17, %v2233_v62  ;;  %v2137_v27 = vsub.f32 %v2073_v1, %v4924_v15 }
 0x2a4   : > { %vm2425_vm1 = vmand %vm2297_vm11, %vm2361_vm14  ;;  %v1978_v33 = vpop.permute.xlu1 %1977 }
 0x2a5   : > { %v2489_v42 = vsel %vm2425_vm1, 1.0, %v5107_v45  ;;  %v2237_v19 = vmul.f32 0.7, %v2137_v27  ;;  %v2077_v49 = vadd.f32 %v6117_v44, %v1978_v33 }
 0x2a6   : > { %2553 = vst [vmem:[#allocation2 + $0x168] sm:$0xff] %v2489_v42 }
 0x2a7   : > { %vm2301_vm6 = vcmp.gt.f32.partialorder %v4924_v15, %v2237_v19  ;;  %v2141_v50 = vsub.f32 %v2077_v49, %v4982_v57 }
 0x2a8   : > { %vm2429_vm9 = vmand %vm2301_vm6, %vm2365_vm13  ;;  %v1988_v54 = vpop.permute.xlu1 %1987 }
 0x2a9   : > { %v2493_v5 = vsel %vm2429_vm9, 1.0, %v5107_v45  ;;  %v2241_v13 = vmul.f32 0.7, %v2141_v50  ;;  %v2081_v6 = vadd.f32 %v6117_v44, %v1988_v54 }
 0x2aa   : > { %2557 = vst [vmem:[#allocation2 + $0x188] sm:$0xff] %v2493_v5 }
 0x2ab   : > { %vm2305_vm4 = vcmp.gt.f32.partialorder %v4982_v57, %v2241_v13  ;;  %v2145_v11 = vsub.f32 %v2081_v6, %v4988_v3 }
 0x2ac   : > { %vm2433_vm10 = vmand %vm2305_vm4, %vm2369_vm0  ;;  %v1998_v15 = vpop.permute.xlu1 %1997 }
 0x2ad   : > { %v2497_v14 = vsel %vm2433_vm10, 1.0, %v5107_v45  ;;  %v2245_v46 = vmul.f32 0.7, %v2145_v11  ;;  %v2085_v9 = vadd.f32 %v6117_v44, %v1998_v15 }
 0x2ae   : > { %2561 = vst [vmem:[#allocation2 + $0x1a8] sm:$0xff] %v2497_v14 }
 0x2af   : > { %vm2309_vm3 = vcmp.gt.f32.partialorder %v4988_v3, %v2245_v46  ;;  %v2149_v22 = vsub.f32 %v2085_v9, %v5019_v20 }
 0x2b0   : > { %vm2437_vm15 = vmand %vm2309_vm3, %vm2373_vm12 }
 0x2b1   : > { %v2501_v57 = vsel %vm2437_vm15, 1.0, %v5107_v45  ;;  %v2249_v26 = vmul.f32 0.7, %v2149_v22 }
 0x2b2   : > { %2565 = vst [vmem:[#allocation2 + $0x1c8] sm:$0xff] %v2501_v57 }
 0x2b3   : > { %vm2313_vm5 = vcmp.gt.f32.partialorder %v5019_v20, %v2249_v26 }
 0x2b4   : > { %vm2441_vm7 = vmand %vm2313_vm5, %vm2377_vm2 }
 0x2b5   : > { %v2505_v18 = vsel %vm2441_vm7, 1.0, %v5107_v45 }
 0x2b6   : > { %2569 = vst [vmem:[#allocation2 + $0x1e8] sm:$0xff] %v2505_v18 }
 0x2b7 LB: >> { %s5468_s26 = sshll.u32 %s3135_s25, 3  ;;  %v6177_v3 = vld [vmem:[#allocation85_spill] sm:$0xff]  ;;  %v6178_v44 = vld [vmem:[#allocation88_spill] sm:$0xff]  ;;  %vm2596_vm8 = vcmask 1040384   ;;  %v6179_v37 = vld [vmem:[#allocation94_spill] sm:$0xff]  ;;  %s2577_s25 = sadd.s32 1, %s3135_s25   ;;  %s3135_s25 = sphi %s5461_s25, %s2577_s25   ;;  %v3131_v16 = vphi %v5459_v16, %v6180_v16  }
 0x2b8   : >> { %v2587_v20 = vrot.slane %v3131_v16, %v6177_v3  ;;  %v2591_v45 = vrot.slane %v3131_v16, %v6178_v44  ;;  %v2580_v59 = vstv %s5468_s26  ;;  %s2609_s27 = sshra.s32 %s5468_s26, 3  ;;  %s2619_s3 = sadd.s32 1, %s5468_s26 }
 0x2b9   : >> { %vm2581_vm14 = vcmp.eq.s32.totalorder %v4339_v32, %v2580_v59  ;;  %vm2582_vm11 = vcmp.eq.s32.totalorder %v6179_v37, %v2580_v59  ;;  %s3046_s28 = sshll.u32 %s2609_s27, 4  ;;  %v2620_v30 = vstv %s2619_s3  ;;  %s2648_s4 = sshra.s32 %s2619_s3, 3 }
 0x2ba   : >> { %v2594_v53 = vsel %vm2581_vm14, %v2587_v20, 0.0  ;;  %v2595_v8 = vsel %vm2582_vm11, %v2591_v45, 0.0  ;;  %s2613_s29 = scalar_lea.vmem [#allocation2], %s3046_s28  ;;  %vm2621_vm1 = vcmp.eq.s32.totalorder %v4339_v32, %v2620_v30  ;;  %vm2622_vm13 = vcmp.eq.s32.totalorder %v6179_v37, %v2620_v30  ;;  %s2651_s5 = sand.u32 7, %s2619_s3 }
 0x2bb   : >> { %v2597_v2 = vsel %vm2596_vm8, %v2594_v53, -inf  ;;  %v2598_v23 = vsel %vm2596_vm8, %v2595_v8, -inf  ;;  %s3047_s6 = sshll.u32 %s2648_s4, 4  ;;  %s2661_s11 = sadd.s32 2, %s5468_s26 }
 0x2bc   : >> { %v2599_v28 = vmax.f32 %v2597_v2, %v2598_v23  ;;  %s2654_s7 = sadd.s32 %s3047_s6, %s2651_s5  ;;  %v2662_v42 = vstv %s2661_s11  ;;  %s2690_s12 = sshra.s32 %s2661_s11, 3 }
 0x2bd   : >> { %v2614_v21 = vld [vmem:[%s2613_s29] ss:$8 sm:$0x3]  ;;  %s2655_s8 = scalar_lea.vmem [#allocation2], %s2654_s7  ;;  %vm2663_vm6 = vcmp.eq.s32.totalorder %v4339_v32, %v2662_v42  ;;  %vm2664_vm9 = vcmp.eq.s32.totalorder %v6179_v37, %v2662_v42  ;;  %s2693_s13 = sand.u32 7, %s2661_s11 }
 0x2be   : >> { %2600 = vmax.xlane.f32.xlu0 %v2599_v28  ;;  %v2656_v62 = vld [vmem:[%s2655_s8] ss:$8 sm:$0x3]  ;;  %s3048_s14 = sshll.u32 %s2690_s12, 4  ;;  %s2703_s19 = sadd.s32 3, %s5468_s26 }
 0x2bf   : >> { %s2696_s15 = sadd.s32 %s3048_s14, %s2693_s13  ;;  %s2732_s20 = sshra.s32 %s2703_s19, 3 }
 0x2c0   : >> { %s2697_s16 = scalar_lea.vmem [#allocation2], %s2696_s15  ;;  %s2735_s21 = sand.u32 7, %s2703_s19 }
 0x2c1   : >> { %v2698_v22 = vld [vmem:[%s2697_s16] ss:$8 sm:$0x3]  ;;  %s3049_s22 = sshll.u32 %s2732_s20, 4  ;;  %s2745_s28 = sadd.s32 4, %s5468_s26 }
 0x2c2   : >> { %s2738_s23 = sadd.s32 %s3049_s22, %s2735_s21  ;;  %v2746_v30 = vstv %s2745_s28  ;;  %s2774_s29 = sshra.s32 %s2745_s28, 3 }
 0x2c3   : >> { %s2739_s24 = scalar_lea.vmem [#allocation2], %s2738_s23  ;;  %vm2747_vm10 = vcmp.eq.s32.totalorder %v4339_v32, %v2746_v30  ;;  %vm2748_vm12 = vcmp.eq.s32.totalorder %v6179_v37, %v2746_v30  ;;  %s3050_s3 = sshll.u32 %s2774_s29, 4 }
 0x2c4   : >> { %s2787_s7 = sadd.s32 5, %s5468_s26  ;;  %s2829_s15 = sadd.s32 6, %s5468_s26 }
 0x2c5   : >> { %v2788_v42 = vstv %s2787_s7  ;;  %s2816_s8 = sshra.s32 %s2787_s7, 3  ;;  %s2858_s16 = sshra.s32 %s2829_s15, 3 }
 0x2c6   : >> { %vm2789_vm3 = vcmp.eq.s32.totalorder %v4339_v32, %v2788_v42  ;;  %vm2790_vm15 = vcmp.eq.s32.totalorder %v6179_v37, %v2788_v42  ;;  %s3051_s11 = sshll.u32 %s2816_s8, 4  ;;  %s2871_s23 = sadd.s32 7, %s5468_s26 }
 0x2c7   : >> { %v2872_v30 = vstv %s2871_s23  ;;  %s2900_s26 = sshra.s32 %s2871_s23, 3  ;;  %p2574_p4 = scmp.ge.s32.totalorder %s2577_s25, 32  }
 0x2c8   : >> { %vm2873_vm7 = vcmp.eq.s32.totalorder %v4339_v32, %v2872_v30  ;;  %vm2874_vm14 = vcmp.eq.s32.totalorder %v6179_v37, %v2872_v30  ;;  %v6181_v42 = vlaneseq (%p2574_p4) }
 0x34b   : >> { %v2601_v29 = vpop.xlane.xlu0 %2600 }
 0x34c   : >> { %v2602_v24 = vrot.slane %v2601_v29, 4 }
 0x34e   : >> { %v2603_v63 = vmax.f32 %v2601_v29, %v2602_v24 }
 0x350   : >> { %v2604_v43 = vrot.slane %v2603_v63, 2 }
 0x352   : >> { %v2605_v55 = vmax.f32 %v2603_v63, %v2604_v43 }
 0x354   : >> { %v2606_v61 = vrot.slane %v2605_v55, 1 }
 0x356   : >> { %v2607_v12 = vmax.f32 %v2605_v55, %v2606_v61 }
 0x358   : >> { %3054 = vpush %v2607_v12 }
 0x389   : >> { %s3055_s30 = spop %3054 }
 0x38a   : >> { %v2615_v39 = vstv %s3055_s30  ;;  %s2777_s30 = sand.u32 7, %s2745_s28 }
 0x38b   : >> { %v2616_v31 = vmul.f32 %v2615_v39, %v2614_v21  ;;  %v2740_v21 = vld [vmem:[%s2739_s24] ss:$8 sm:$0x3]  ;;  %s2780_s4 = sadd.s32 %s3050_s3, %s2777_s30  ;;  %s2903_s24 = sand.u32 7, %s2871_s23 }
 0x38c   : >> { %s2781_s5 = scalar_lea.vmem [#allocation2], %s2780_s4 }
 0x38d   : >> { %v2617_v40 = vsub.f32 1.0, %v2616_v31 }
 0x38f   : >> { %v2618_v58 = vmul.f32 %v3131_v16, %v2617_v40  ;;  %v2704_v16 = vstv %s2703_s19  ;;  %s3052_s19 = sshll.u32 %s2858_s16, 4 }
 0x390   : >> { %vm2705_vm0 = vcmp.eq.s32.totalorder %v4339_v32, %v2704_v16  ;;  %vm2706_vm4 = vcmp.eq.s32.totalorder %v6179_v37, %v2704_v16  ;;  %v2830_v16 = vstv %s2829_s15 }
 0x391   : >> { %v2627_v7 = vrot.slane %v2618_v58, %v6177_v3  ;;  %v2631_v10 = vrot.slane %v2618_v58, %v6178_v44  ;;  %vm2831_vm2 = vcmp.eq.s32.totalorder %v4339_v32, %v2830_v16  ;;  %vm2832_vm5 = vcmp.eq.s32.totalorder %v6179_v37, %v2830_v16 }
 0x393   : >> { %v2634_v60 = vsel %vm2621_vm1, %v2627_v7, 0.0  ;;  %v2635_v56 = vsel %vm2622_vm13, %v2631_v10, 0.0 }
 0x394   : >> { %v2636_v35 = vsel %vm2596_vm8, %v2634_v60, -inf  ;;  %v2637_v25 = vsel %vm2596_vm8, %v2635_v56, -inf }
 0x395   : >> { %v2638_v36 = vmax.f32 %v2636_v35, %v2637_v25 }
 0x397   : >> { %2639 = vmax.xlane.f32.xlu0 %v2638_v36 }
 0x424   : >> { %v2640_v51 = vpop.xlane.xlu0 %2639 }
 0x425   : >> { %v2641_v17 = vrot.slane %v2640_v51, 4 }
 0x427   : >> { %v2642_v47 = vmax.f32 %v2640_v51, %v2641_v17 }
 0x429   : >> { %v2643_v48 = vrot.slane %v2642_v47, 2 }
 0x42b   : >> { %v2644_v41 = vmax.f32 %v2642_v47, %v2643_v48 }
 0x42d   : >> { %v2645_v0 = vrot.slane %v2644_v41, 1 }
 0x42f   : >> { %v2646_v4 = vmax.f32 %v2644_v41, %v2645_v0 }
 0x431   : >> { %3056 = vpush %v2646_v4 }
 0x462   : >> { %s3057_s10 = spop %3056 }
 0x463   : >> { %v2657_v1 = vstv %s3057_s10  ;;  %s2819_s10 = sand.u32 7, %s2787_s7 }
 0x464   : >> { %v2658_v27 = vmul.f32 %v2657_v1, %v2656_v62  ;;  %v2782_v62 = vld [vmem:[%s2781_s5] ss:$8 sm:$0x3]  ;;  %s2822_s12 = sadd.s32 %s3051_s11, %s2819_s10 }
 0x465   : >> { %s2823_s13 = scalar_lea.vmem [#allocation2], %s2822_s12 }
 0x466   : >> { %v2659_v33 = vsub.f32 1.0, %v2658_v27 }
 0x468   : >> { %v2660_v19 = vmul.f32 %v2659_v33, %v2618_v58 }
 0x46a   : >> { %v2669_v52 = vrot.slane %v2660_v19, %v6177_v3  ;;  %v2673_v49 = vrot.slane %v2660_v19, %v6178_v44 }
 0x46c   : >> { %v2676_v50 = vsel %vm2663_vm6, %v2669_v52, 0.0  ;;  %v2677_v38 = vsel %vm2664_vm9, %v2673_v49, 0.0 }
 0x46d   : >> { %v2678_v54 = vsel %vm2596_vm8, %v2676_v50, -inf  ;;  %v2679_v5 = vsel %vm2596_vm8, %v2677_v38, -inf }
 0x46e   : >> { %v2680_v13 = vmax.f32 %v2678_v54, %v2679_v5 }
 0x470   : >> { %2681 = vmax.xlane.f32.xlu1 %v2680_v13 }
 0x4fd   : >> { %v2682_v6 = vpop.xlane.xlu1 %2681 }
 0x4fe   : >> { %v2683_v11 = vrot.slane %v2682_v6, 4 }
 0x500   : >> { %v2684_v15 = vmax.f32 %v2682_v6, %v2683_v11 }
 0x502   : >> { %v2685_v14 = vrot.slane %v2684_v15, 2 }
 0x504   : >> { %v2686_v46 = vmax.f32 %v2684_v15, %v2685_v14 }
 0x506   : >> { %v2687_v34 = vrot.slane %v2686_v46, 1 }
 0x508   : >> { %v2688_v9 = vmax.f32 %v2686_v46, %v2687_v34 }
 0x50a   : >> { %3058 = vpush %v2688_v9 }
 0x53b   : >> { %s3059_s17 = spop %3058 }
 0x53c   : >> { %v2699_v57 = vstv %s3059_s17  ;;  %s2861_s17 = sand.u32 7, %s2829_s15 }
 0x53d   : >> { %v2700_v26 = vmul.f32 %v2699_v57, %v2698_v22  ;;  %v2824_v22 = vld [vmem:[%s2823_s13] ss:$8 sm:$0x3]  ;;  %s2864_s20 = sadd.s32 %s3052_s19, %s2861_s17 }
 0x53e   : >> { %s2865_s21 = scalar_lea.vmem [#allocation2], %s2864_s20 }
 0x53f   : >> { %v2701_v18 = vsub.f32 1.0, %v2700_v26 }
 0x541   : >> { %v2702_v20 = vmul.f32 %v2701_v18, %v2660_v19 }
 0x543   : >> { %v2711_v45 = vrot.slane %v2702_v20, %v6177_v3  ;;  %v2715_v59 = vrot.slane %v2702_v20, %v6178_v44 }
 0x545   : >> { %v2718_v53 = vsel %vm2705_vm0, %v2711_v45, 0.0  ;;  %v2719_v8 = vsel %vm2706_vm4, %v2715_v59, 0.0 }
 0x546   : >> { %v2720_v2 = vsel %vm2596_vm8, %v2718_v53, -inf  ;;  %v2721_v23 = vsel %vm2596_vm8, %v2719_v8, -inf }
 0x547   : >> { %v2722_v28 = vmax.f32 %v2720_v2, %v2721_v23 }
 0x549   : >> { %2723 = vmax.xlane.f32.xlu1 %v2722_v28 }
 0x5d6   : >> { %v2724_v29 = vpop.xlane.xlu1 %2723 }
 0x5d7   : >> { %v2725_v24 = vrot.slane %v2724_v29, 4 }
 0x5d9   : >> { %v2726_v63 = vmax.f32 %v2724_v29, %v2725_v24 }
 0x5db   : >> { %v2727_v43 = vrot.slane %v2726_v63, 2 }
 0x5dd   : >> { %v2728_v55 = vmax.f32 %v2726_v63, %v2727_v43 }
 0x5df   : >> { %v2729_v61 = vrot.slane %v2728_v55, 1 }
 0x5e1   : >> { %v2730_v12 = vmax.f32 %v2728_v55, %v2729_v61 }
 0x5e3   : >> { %3060 = vpush %v2730_v12 }
 0x614   : >> { %s3061_s27 = spop %3060 }
 0x615   : >> { %v2741_v39 = vstv %s3061_s27  ;;  %s3053_s27 = sshll.u32 %s2900_s26, 4 }
 0x616   : >> { %v2742_v31 = vmul.f32 %v2741_v39, %v2740_v21  ;;  %v2866_v21 = vld [vmem:[%s2865_s21] ss:$8 sm:$0x3]  ;;  %s2906_s28 = sadd.s32 %s3053_s27, %s2903_s24 }
 0x617   : >> { %s2907_s29 = scalar_lea.vmem [#allocation2], %s2906_s28 }
 0x618   : >> { %v2743_v40 = vsub.f32 1.0, %v2742_v31  ;;  %v2908_v37 = vld [vmem:[%s2907_s29] ss:$8 sm:$0x3] }
 0x61a   : >> { %v2744_v58 = vmul.f32 %v2743_v40, %v2702_v20 }
 0x61c   : >> { %v2753_v7 = vrot.slane %v2744_v58, %v6177_v3  ;;  %v2757_v10 = vrot.slane %v2744_v58, %v6178_v44 }
 0x61e   : >> { %v2760_v60 = vsel %vm2747_vm10, %v2753_v7, 0.0  ;;  %v2761_v56 = vsel %vm2748_vm12, %v2757_v10, 0.0 }
 0x61f   : >> { %v2762_v35 = vsel %vm2596_vm8, %v2760_v60, -inf  ;;  %v2763_v25 = vsel %vm2596_vm8, %v2761_v56, -inf }
 0x620   : >> { %v2764_v36 = vmax.f32 %v2762_v35, %v2763_v25 }
 0x622   : >> { %2765 = vmax.xlane.f32.xlu0 %v2764_v36 }
 0x6af   : >> { %v2766_v51 = vpop.xlane.xlu0 %2765 }
 0x6b0   : >> { %v2767_v17 = vrot.slane %v2766_v51, 4 }
 0x6b2   : >> { %v2768_v47 = vmax.f32 %v2766_v51, %v2767_v17 }
 0x6b4   : >> { %v2769_v48 = vrot.slane %v2768_v47, 2 }
 0x6b6   : >> { %v2770_v41 = vmax.f32 %v2768_v47, %v2769_v48 }
 0x6b8   : >> { %v2771_v0 = vrot.slane %v2770_v41, 1 }
 0x6ba   : >> { %v2772_v4 = vmax.f32 %v2770_v41, %v2771_v0 }
 0x6bc   : >> { %3062 = vpush %v2772_v4 }
 0x6ed   : >> { %s3063_s6 = spop %3062 }
 0x6ee   : >> { %v2783_v1 = vstv %s3063_s6 }
 0x6ef   : >> { %v2784_v27 = vmul.f32 %v2783_v1, %v2782_v62 }
 0x6f1   : >> { %v2785_v33 = vsub.f32 1.0, %v2784_v27 }
 0x6f3   : >> { %v2786_v19 = vmul.f32 %v2785_v33, %v2744_v58 }
 0x6f5   : >> { %v2795_v52 = vrot.slane %v2786_v19, %v6177_v3  ;;  %v2799_v49 = vrot.slane %v2786_v19, %v6178_v44 }
 0x6f7   : >> { %v2802_v50 = vsel %vm2789_vm3, %v2795_v52, 0.0  ;;  %v2803_v38 = vsel %vm2790_vm15, %v2799_v49, 0.0 }
 0x6f8   : >> { %v2804_v54 = vsel %vm2596_vm8, %v2802_v50, -inf  ;;  %v2805_v5 = vsel %vm2596_vm8, %v2803_v38, -inf }
 0x6f9   : >> { %v2806_v13 = vmax.f32 %v2804_v54, %v2805_v5 }
 0x6fb   : >> { %2807 = vmax.xlane.f32.xlu1 %v2806_v13 }
 0x788   : >> { %v2808_v6 = vpop.xlane.xlu1 %2807 }
 0x789   : >> { %v2809_v11 = vrot.slane %v2808_v6, 4 }
 0x78b   : >> { %v2810_v15 = vmax.f32 %v2808_v6, %v2809_v11 }
 0x78d   : >> { %v2811_v14 = vrot.slane %v2810_v15, 2 }
 0x78f   : >> { %v2812_v46 = vmax.f32 %v2810_v15, %v2811_v14 }
 0x791   : >> { %v2813_v34 = vrot.slane %v2812_v46, 1 }
 0x793   : >> { %v2814_v9 = vmax.f32 %v2812_v46, %v2813_v34 }
 0x795   : >> { %3064 = vpush %v2814_v9 }
 0x7c6   : >> { %s3065_s14 = spop %3064 }
 0x7c7   : >> { %v2825_v57 = vstv %s3065_s14 }
 0x7c8   : >> { %v2826_v26 = vmul.f32 %v2825_v57, %v2824_v22 }
 0x7ca   : >> { %v2827_v18 = vsub.f32 1.0, %v2826_v26 }
 0x7cc   : >> { %v2828_v20 = vmul.f32 %v2827_v18, %v2786_v19 }
 0x7ce   : >> { %v2837_v45 = vrot.slane %v2828_v20, %v6177_v3  ;;  %v2841_v59 = vrot.slane %v2828_v20, %v6178_v44 }
 0x7d0   : >> { %v2844_v53 = vsel %vm2831_vm2, %v2837_v45, 0.0  ;;  %v2845_v8 = vsel %vm2832_vm5, %v2841_v59, 0.0 }
 0x7d1   : >> { %v2846_v2 = vsel %vm2596_vm8, %v2844_v53, -inf  ;;  %v2847_v23 = vsel %vm2596_vm8, %v2845_v8, -inf }
 0x7d2   : >> { %v2848_v28 = vmax.f32 %v2846_v2, %v2847_v23 }
 0x7d4   : >> { %2849 = vmax.xlane.f32.xlu0 %v2848_v28 }
 0x861   : >> { %v2850_v29 = vpop.xlane.xlu0 %2849 }
 0x862   : >> { %v2851_v24 = vrot.slane %v2850_v29, 4 }
 0x864   : >> { %v2852_v63 = vmax.f32 %v2850_v29, %v2851_v24 }
 0x866   : >> { %v2853_v43 = vrot.slane %v2852_v63, 2 }
 0x868   : >> { %v2854_v55 = vmax.f32 %v2852_v63, %v2853_v43 }
 0x86a   : >> { %v2855_v61 = vrot.slane %v2854_v55, 1 }
 0x86c   : >> { %v2856_v12 = vmax.f32 %v2854_v55, %v2855_v61 }
 0x86e   : >> { %3066 = vpush %v2856_v12 }
 0x89f   : >> { %s3067_s22 = spop %3066 }
 0x8a0   : >> { %v2867_v39 = vstv %s3067_s22 }
 0x8a1   : >> { %v2868_v31 = vmul.f32 %v2867_v39, %v2866_v21 }
 0x8a3   : >> { %v2869_v40 = vsub.f32 1.0, %v2868_v31 }
 0x8a5   : >> { %v2870_v58 = vmul.f32 %v2869_v40, %v2828_v20 }
 0x8a7   : >> { %v2879_v7 = vrot.slane %v2870_v58, %v6177_v3  ;;  %v2883_v10 = vrot.slane %v2870_v58, %v6178_v44 }
 0x8a9   : >> { %v2886_v60 = vsel %vm2873_vm7, %v2879_v7, 0.0  ;;  %v2887_v56 = vsel %vm2874_vm14, %v2883_v10, 0.0 }
 0x8aa   : >> { %v2888_v35 = vsel %vm2596_vm8, %v2886_v60, -inf  ;;  %v2889_v25 = vsel %vm2596_vm8, %v2887_v56, -inf  ;;  %vm2915_vm8 = vcmp.lt.s32.totalorder (%p2574_p4), %v6181_v42, 256 }
 0x8ab   : >> { %v2890_v36 = vmax.f32 %v2888_v35, %v2889_v25 }
 0x8ad   : >> { %2891 = vmax.xlane.f32.xlu1 %v2890_v36 }
 0x93a   : >> { %v2892_v51 = vpop.xlane.xlu1 %2891 }
 0x93b   : >> { %v2893_v17 = vrot.slane %v2892_v51, 4 }
 0x93d   : >> { %v2894_v47 = vmax.f32 %v2892_v51, %v2893_v17 }
 0x93f   : >> { %v2895_v48 = vrot.slane %v2894_v47, 2 }
 0x941   : >> { %v2896_v41 = vmax.f32 %v2894_v47, %v2895_v48 }
 0x943   : >> { %v2897_v0 = vrot.slane %v2896_v41, 1 }
 0x945   : >> { %v2898_v4 = vmax.f32 %v2896_v41, %v2897_v0 }
 0x947   : >> { %3068 = vpush %v2898_v4 }
 0x978   : >> { %s3069_s30 = spop %3068 }
 0x979   : >> { %v2909_v62 = vstv %s3069_s30 }
 0x97a   : >> { %v2910_v1 = vmul.f32 %v2909_v62, %v2908_v37  ;;  %2576 = sbr.rel (!%p2574_p4) target bundleno = 695 (0x2b7), region = 76 }
 0x97c   : >> { %v2911_v27 = vsub.f32 1.0, %v2910_v1 }
 0x97e   : >> { %v2912_v33 = vmul.f32 %v2911_v27, %v2870_v58  }
 0x980   : >> { %v6180_v16 = vmov %v2912_v33  ;;  %2917 = vst.msk [vmem:[%s3179_s18] sm:$0x3] (%p2574_p4), %vm2915_vm8, %v2912_v33 }
 0x981 PF: > { %s12_s9 = sadd.s32 1, %s3127_s9  }
 0x982   : > { %p9_p5 = scmp.ge.s32.totalorder %s12_s9, 4  }
 0x984   :  { %11 = sbr.rel (!%p9_p5) target bundleno = 1 (0x1), region = 87 }

</bundles_post_ra>
